<compile_context>
chip_gen: v7x
topology: tpu7x:2x2x1
jax: 0.10.0
libtpu: 0.0.40
codegen_flags: <defaults>
</compile_context>

<pallas_src>
import functools

import jax
import jax.numpy as jnp
from jax.experimental import pallas as pl
from jax.experimental.pallas import tpu as pltpu


def _round_up(x, m):
    return ((x + m - 1) // m) * m


def _plan_m(M):
    """16-row aligned M tile, <= 512 rows, >= 2 grid steps when M allows."""
    M16 = _round_up(max(M, 16), 16)
    steps = pl.cdiv(M16, 512)
    if steps == 1 and M16 > 16:
        steps = 2                      # give v7x's second TensorCore work
    tm = _round_up(pl.cdiv(M16, steps), 16)
    return tm, tm * steps


# ----------------------------------------------------------------------------
# Kernel 1: out = relu?(A @ W + b), single shot over K, M tiled ("parallel").
# Used for the three conv-as-matmul layers.
# ----------------------------------------------------------------------------
def _matmul_bias_kernel(a_ref, w_ref, b_ref, o_ref, *, apply_relu):
    out = jnp.dot(a_ref[...], w_ref[...], preferred_element_type=jnp.float32)
    out = out + b_ref[...]
    if apply_relu:
        out = jnp.maximum(out, 0.0)
    o_ref[...] = out.astype(o_ref.dtype)


def pallas_linear_packed(a, w_p, b_p, *, apply_relu, n_out,
                         out_dtype=jnp.float32):
    """y = a @ w_p + b_p (optional ReLU).

    a:   (M, K)         any float dtype (cast to bf16 here)
    w_p: (K_pad, N_pad)  bf16, pre-packed/padded weights (grid-invariant)
    b_p: (1, N_pad)      f32 bias
    Returns (M, n_out) in out_dtype.
    """
    M, K = a.shape
    K_pad, N_pad = w_p.shape
    assert K <= K_pad, (K, K_pad)
    tm, M_pad = _plan_m(M)

    a_p = a.astype(jnp.bfloat16)
    if (M_pad - M) or (K_pad - K):
        a_p = jnp.pad(a_p, ((0, M_pad - M), (0, K_pad - K)))

    out_bytes = M_pad * N_pad * jnp.dtype(out_dtype).itemsize
    out = pl.pallas_call(
        functools.partial(_matmul_bias_kernel, apply_relu=apply_relu),
        out_shape=jax.ShapeDtypeStruct((M_pad, N_pad), out_dtype),
        grid=(M_pad // tm,),
        in_specs=[
            pl.BlockSpec((tm, K_pad), lambda i: (i, 0)),    # A tile (streamed)
            pl.BlockSpec(w_p.shape, lambda i: (0, 0)),      # W (grid-invariant)
            pl.BlockSpec(b_p.shape, lambda i: (0, 0)),      # bias
        ],
        out_specs=pl.BlockSpec((tm, N_pad), lambda i: (i, 0)),
        compiler_params=pltpu.CompilerParams(
            dimension_semantics=("parallel",),
            vmem_limit_bytes=32 * 1024 * 1024),
        cost_estimate=pl.CostEstimate(
            flops=2 * M_pad * K_pad * N_pad,
            transcendentals=0,
            bytes_accessed=(M_pad * K_pad * 2        # A (bf16), streamed
                            + K_pad * N_pad * 2      # W read once per call
                            + N_pad * 4              # bias read once
                            + out_bytes)),
    )(a_p, w_p, b_p)
    return out[:M, :n_out]


# ----------------------------------------------------------------------------
# Kernel 2: fused tail.
#   small = relu([drop_poly|poly] @ Wsmall + bsmall)   (block-diag fc_drop_poly / fc_poly)
#   h     = relu(conv_out @ W1a + small @ W1b + b1)    (fc1, split at column 3136)
#   out   = h @ W2 + b2                                (fc2)
# `small` and `h` stay in VMEM; one launch instead of three.
# ----------------------------------------------------------------------------
def _tail_kernel(conv_ref, small_ref, ws_ref, bs_ref, w1a_ref, w1b_ref,
                 b1_ref, w2_ref, b2_ref, o_ref):
    small = jnp.dot(small_ref[...], ws_ref[...],
                    preferred_element_type=jnp.float32)
    small = jnp.maximum(small + bs_ref[...], 0.0)

    h = jnp.dot(conv_ref[...], w1a_ref[...],
                preferred_element_type=jnp.float32)
    h = h + jnp.dot(small.astype(jnp.bfloat16), w1b_ref[...],
                    preferred_element_type=jnp.float32)
    h = jnp.maximum(h + b1_ref[...], 0.0)

    out = jnp.dot(h.astype(jnp.bfloat16), w2_ref[...],
                  preferred_element_type=jnp.float32)
    o_ref[...] = (out + b2_ref[...]).astype(o_ref.dtype)


def pallas_fused_tail(conv_out, small_in, packed, head, *, n_out):
    M = conv_out.shape[0]
    ws, bs = packed["small_w"], packed["small_b"]
    w1a, w1b, b1 = head["fc1_wa"], head["fc1_wb"], head["fc1_b"]
    w2, b2 = head["fc2_w"], head["fc2_b"]
    Kc, N1 = w1a.shape             # (3200, 512)
    Ks, Ns = ws.shape              # (128, 256)
    _, N2 = w2.shape               # (512, 128)
    tm, M_pad = _plan_m(M)

    conv_p = jnp.pad(conv_out.astype(jnp.bfloat16),
                     ((0, M_pad - M), (0, Kc - conv_out.shape[1])))
    small_p = jnp.pad(small_in.astype(jnp.bfloat16),
                      ((0, M_pad - M), (0, Ks - small_in.shape[1])))

    flops = 2 * M_pad * (Ks * Ns + Kc * N1 + Ns * N1 + N1 * N2)
    w_bytes = (Ks * Ns + Kc * N1 + Ns * N1 + N1 * N2) * 2   # read once per call
    bytes_accessed = (M_pad * (Kc + Ks) * 2 + w_bytes
                      + (Ns + N1 + N2) * 4 + M_pad * N2 * 4)

    out = pl.pallas_call(
        _tail_kernel,
        out_shape=jax.ShapeDtypeStruct((M_pad, N2), jnp.float32),
        grid=(M_pad // tm,),
        in_specs=[
            pl.BlockSpec((tm, Kc), lambda i: (i, 0)),   # conv activations (streamed)
            pl.BlockSpec((tm, Ks), lambda i: (i, 0)),   # [drop_poly | poly]
            pl.BlockSpec(ws.shape, lambda i: (0, 0)),   # Wsmall (block diagonal)
            pl.BlockSpec(bs.shape, lambda i: (0, 0)),
            pl.BlockSpec(w1a.shape, lambda i: (0, 0)),  # fc1 conv columns
            pl.BlockSpec(w1b.shape, lambda i: (0, 0)),  # fc1 small columns
            pl.BlockSpec(b1.shape, lambda i: (0, 0)),
            pl.BlockSpec(w2.shape, lambda i: (0, 0)),   # fc2
            pl.BlockSpec(b2.shape, lambda i: (0, 0)),
        ],
        out_specs=pl.BlockSpec((tm, N2), lambda i: (i, 0)),
        compiler_params=pltpu.CompilerParams(
            dimension_semantics=("parallel",),
            vmem_limit_bytes=32 * 1024 * 1024),
        cost_estimate=pl.CostEstimate(
            flops=flops, transcendentals=0, bytes_accessed=bytes_accessed),
    )(conv_p, small_p, ws, bs, w1a, w1b, b1, w2, b2)
    return out[:M, :n_out]


# ----------------------------------------------------------------------------
# Conv2d (VALID, stride s) as channels-last im2col (static strided slices,
# no gather) + Pallas matmul with fused bias + ReLU.
# ----------------------------------------------------------------------------
def _im2col_nhwc(x, kh, kw, stride):
    """x: (B,H,W,C) -> (B*Ho*Wo, kh*kw*C), feature order (kh, kw, C)."""
    B, H, W, C = x.shape
    Ho = (H - kh) // stride + 1
    Wo = (W - kw) // stride + 1
    cols = []
    for dh in range(kh):
        for dw in range(kw):
            cols.append(jax.lax.slice(
                x, (0, dh, dw, 0),
                (B, dh + (Ho - 1) * stride + 1, dw + (Wo - 1) * stride + 1, C),
                (1, stride, stride, 1)))            # (B, Ho, Wo, C)
    p = jnp.stack(cols, axis=3)                     # (B, Ho, Wo, kh*kw, C)
    return p.reshape(B * Ho * Wo, kh * kw * C), Ho, Wo


def conv2d_relu_nhwc(x, w_p, b_p, *, kh, kw, stride, out_c):
    B = x.shape[0]
    patches, Ho, Wo = _im2col_nhwc(x, kh, kw, stride)
    y = pallas_linear_packed(patches, w_p, b_p, apply_relu=True,
                             n_out=out_c, out_dtype=jnp.bfloat16)
    return y.reshape(B, Ho, Wo, out_c)              # NHWC, bf16


# ----------------------------------------------------------------------------
# Parameters (deterministic init, PyTorch-like uniform(+-1/sqrt(fan_in))),
# kept in PyTorch layout for the reference path.
# ----------------------------------------------------------------------------
def _init_linear(key, out_f, in_f):
    k1, k2 = jax.random.split(key)
    bound = 1.0 / float(in_f) ** 0.5
    w = jax.random.uniform(k1, (out_f, in_f), jnp.float32, -bound, bound)
    b = jax.random.uniform(k2, (out_f,), jnp.float32, -bound, bound)
    return w, b


def _init_conv(key, out_c, in_c, kh, kw):
    k1, k2 = jax.random.split(key)
    bound = 1.0 / float(in_c * kh * kw) ** 0.5
    w = jax.random.uniform(k1, (out_c, in_c, kh, kw), jnp.float32, -bound, bound)
    b = jax.random.uniform(k2, (out_c,), jnp.float32, -bound, bound)
    return w, b


def init_mugicha_params(key, input_dim, output_dim, drop_poly_dim, poly_dim):
    c, h, w = input_dim
    assert h == 84 and w == 84, "Expecting 84x84 input (as in the PyTorch module)"
    keys = jax.random.split(key, 7)
    c1w, c1b = _init_conv(keys[0], 32, c, 8, 8)
    c2w, c2b = _init_conv(keys[1], 64, 32, 4, 4)
    c3w, c3b = _init_conv(keys[2], 64, 64, 3, 3)
    dpw, dpb = _init_linear(keys[3], 128, drop_poly_dim)
    pw, pb = _init_linear(keys[4], 128, poly_dim)
    f1w, f1b = _init_linear(keys[5], 512, 3136 + 128 + 128)
    f2w, f2b = _init_linear(keys[6], output_dim, 512)
    online = {"fc1_w": f1w, "fc1_b": f1b, "fc2_w": f2w, "fc2_b": f2b}
    # target = deepcopy(online): identical weights at init
    target = jax.tree_util.tree_map(lambda x: x.copy(), online)
    return {
        "conv1_w": c1w, "conv1_b": c1b,
        "conv2_w": c2w, "conv2_b": c2b,
        "conv3_w": c3w, "conv3_b": c3b,
        "fc_drop_poly_w": dpw, "fc_drop_poly_b": dpb,
        "fc_poly_w": pw, "fc_poly_b": pb,
        "online": online, "target": target,
    }


# ----------------------------------------------------------------------------
# One-time weight packing into the padded bf16 layout the Pallas kernels want.
# ----------------------------------------------------------------------------
def _pack_w(w):
    K, N = w.shape
    K_pad, N_pad = _round_up(K, 128), _round_up(N, 128)
    return jnp.pad(w, ((0, K_pad - K), (0, N_pad - N))).astype(jnp.bfloat16)


def _pack_b(b):
    N = b.shape[0]
    N_pad = _round_up(N, 128)
    return jnp.pad(b, (0, N_pad - N)).astype(jnp.float32).reshape(1, N_pad)


# Fixed by the architecture (the PyTorch module hard-codes these too).
_CONV_CFG = (("conv1", 8, 4, 32), ("conv2", 4, 2, 64), ("conv3", 3, 1, 64))
_CONV_OUT_C, _CONV_OUT_H, _CONV_OUT_W = 64, 7, 7          # conv3 output, 84x84 in
_CONV_FLAT = _CONV_OUT_C * _CONV_OUT_H * _CONV_OUT_W       # 3136


def pack_mugicha_params(params, drop_poly_dim, poly_dim):
    packed = {}
    # Conv weights: OIHW -> (kh, kw, I, O) matching the NHWC im2col feature order.
    for name, _k, _s, _oc in _CONV_CFG:
        w = params[name + "_w"]                              # (O, I, kh, kw)
        O, I, kh, kw = w.shape
        w2 = w.transpose(2, 3, 1, 0).reshape(kh * kw * I, O)
        packed[name + "_w"] = _pack_w(w2)
        packed[name + "_b"] = _pack_b(params[name + "_b"])

    # fc_drop_poly + fc_poly fused into one block-diagonal matmul.
    dpw, dpb = params["fc_drop_poly_w"], params["fc_drop_poly_b"]  # (128, dp)
    pw, pb = params["fc_poly_w"], params["fc_poly_b"]              # (128, p)
    K_small = drop_poly_dim + poly_dim
    w_small = jnp.zeros((K_small, 256), jnp.float32)
    w_small = w_small.at[:drop_poly_dim, :128].set(dpw.T)
    w_small = w_small.at[drop_poly_dim:, 128:].set(pw.T)
    packed["small_w"] = _pack_w(w_small)
    packed["small_b"] = _pack_b(jnp.concatenate([dpb, pb]))

    # Heads: split fc1 at the conv/flat boundary (so the tail kernel needs no
    # concatenate) and permute its conv columns from torch (C,H,W) flatten
    # order to the NHWC (H,W,C) flatten order used by the Pallas conv stack.
    heads = {}
    for hname in ("online", "target"):
        hp = params[hname]
        f1w = hp["fc1_w"]                                    # (512, 3392)
        n512 = f1w.shape[0]
        conv_cols = (f1w[:, :_CONV_FLAT]
                     .reshape(n512, _CONV_OUT_C, _CONV_OUT_H, _CONV_OUT_W)
                     .transpose(0, 2, 3, 1)
                     .reshape(n512, _CONV_FLAT))
        heads[hname] = {
            "fc1_wa": _pack_w(conv_cols.T),                  # (3200, 512) bf16
            "fc1_wb": _pack_w(f1w[:, _CONV_FLAT:].T),        # (256, 512)  bf16
            "fc1_b": _pack_b(hp["fc1_b"]),
            "fc2_w": _pack_w(hp["fc2_w"].T),                 # (512, 128)  bf16
            "fc2_b": _pack_b(hp["fc2_b"]),
        }
    packed["heads"] = heads
    return packed


# ----------------------------------------------------------------------------
# Forward passes
# ----------------------------------------------------------------------------
def mugicha_forward(packed, image, drop_poly, poly, model, output_dim):
    # One NCHW -> NHWC transpose; channels-last from here on.
    x = jnp.transpose(image, (0, 2, 3, 1)).astype(jnp.bfloat16)
    for name, k, s, oc in _CONV_CFG:
        x = conv2d_relu_nhwc(x, packed[name + "_w"], packed[name + "_b"],
                             kh=k, kw=k, stride=s, out_c=oc)
    B = image.shape[0]
    conv_out = x.reshape(B, -1)                               # (B, 3136) (H,W,C) order
    small_in = jnp.concatenate([drop_poly, poly], axis=1)     # (B, dp+p)
    head = packed["heads"][model]
    return pallas_fused_tail(conv_out, small_in, packed, head, n_out=output_dim)


def reference_forward(params, image, drop_poly, poly, model="online"):
    hp = jax.lax.Precision.HIGHEST

    def conv(x, w, b, s):
        y = jax.lax.conv_general_dilated(
            x, w, (s, s), "VALID",
            dimension_numbers=("NCHW", "OIHW", "NCHW"), precision=hp)
        return jax.nn.relu(y + b[None, :, None, None])

    x = conv(image, params["conv1_w"], params["conv1_b"], 4)
    x = conv(x, params["conv2_w"], params["conv2_b"], 2)
    x = conv(x, params["conv3_w"], params["conv3_b"], 1)
    conv_out = x.reshape(image.shape[0], -1)
    dp = jax.nn.relu(jnp.dot(drop_poly, params["fc_drop_poly_w"].T, precision=hp)
                     + params["fc_drop_poly_b"])
    p = jax.nn.relu(jnp.dot(poly, params["fc_poly_w"].T, precision=hp)
                    + params["fc_poly_b"])
    combined = jnp.concatenate([conv_out, dp, p], axis=1)
    head = params[model]
    h = jax.nn.relu(jnp.dot(combined, head["fc1_w"].T, precision=hp) + head["fc1_b"])
    return jnp.dot(h, head["fc2_w"].T, precision=hp) + head["fc2_b"]


# ----------------------------------------------------------------------------
if __name__ == "__main__":
    B, C, H, W = 2, 4, 84, 84          # module requires 84x84 spatial input
    drop_poly_dim, poly_dim = 8, 8
    output_dim = 6

    key = jax.random.PRNGKey(0)
    k_params, k_img, k_dp, k_p = jax.random.split(key, 4)

    params = init_mugicha_params(k_params, (C, H, W), output_dim,
                                 drop_poly_dim, poly_dim)
    packed = pack_mugicha_params(params, drop_poly_dim, poly_dim)

    image = jax.random.normal(k_img, (B, C, H, W), jnp.float32)
    drop_poly = jax.random.normal(k_dp, (B, drop_poly_dim), jnp.float32)
    poly = jax.random.normal(k_p, (B, poly_dim), jnp.float32)

    fwd = jax.jit(mugicha_forward, static_argnames=("model", "output_dim"))
    out_online = jax.block_until_ready(
        fwd(packed, image, drop_poly, poly, model="online", output_dim=output_dim))
    out_target = jax.block_until_ready(
        fwd(packed, image, drop_poly, poly, model="target", output_dim=output_dim))

    assert out_online.shape == (B, output_dim)
    assert out_target.shape == (B, output_dim)
    assert bool(jnp.all(jnp.isfinite(out_online)))

    ref = reference_forward(params, image, drop_poly, poly, model="online")
    assert jnp.allclose(out_online, ref, rtol=5e-2, atol=5e-2), (
        "Pallas output mismatch vs reference:\n"
        f"max abs diff = {float(jnp.max(jnp.abs(out_online - ref)))}")
    # online and target share identical (deep-copied) init weights
    assert jnp.allclose(out_online, out_target, rtol=1e-5, atol=1e-5)

    print("KERNEL_OK")
</pallas_src>

<mosaic_0001>
module attributes {stable_mosaic.version = 11 : i64} {
  func.func @_matmul_bias_kernel(%arg0: i32, %arg1: memref<400x256xbf16, #tpu.memory_space<vmem>>, %arg2: memref<256x128xbf16, #tpu.memory_space<vmem>>, %arg3: memref<1x128xf32, #tpu.memory_space<vmem>>, %arg4: memref<400x128xbf16, #tpu.memory_space<vmem>>) attributes {dimension_semantics = [#tpu.dimension_semantics<parallel>], iteration_bounds = array<i64: 2>, scalar_prefetch = 0 : i64, scratch_operands = 0 : i64, tpu.core_type = #tpu.core_type<tc>, window_params = [{transform_indices = @transform_0, window_bounds = array<i64: 400, 256>}, {pipeline_mode = #tpu.pipeline_mode<synchronous>, transform_indices = @transform_1, window_bounds = array<i64: 256, 128>}, {pipeline_mode = #tpu.pipeline_mode<synchronous>, transform_indices = @transform_2, window_bounds = array<i64: 1, 128>}, {transform_indices = @transform_3, window_bounds = array<i64: 400, 128>}]} {
    %c0 = arith.constant 0 : index
    %c0_0 = arith.constant 0 : index
    %0 = vector.load %arg1[%c0, %c0_0] : memref<400x256xbf16, #tpu.memory_space<vmem>>, vector<400x256xbf16>
    %c0_1 = arith.constant 0 : index
    %c0_2 = arith.constant 0 : index
    %1 = vector.load %arg2[%c0_1, %c0_2] : memref<256x128xbf16, #tpu.memory_space<vmem>>, vector<256x128xbf16>
    %cst = arith.constant dense<0.000000e+00> : vector<400x128xf32>
    %2 = tpu.matmul %0, %1, %cst {dimension_numbers = #tpu.dot_dimension_numbers<[1], [0], [0], [1], [0, 0, 1, 1], [], []>} : vector<400x256xbf16>, vector<256x128xbf16>, vector<400x128xf32> -> vector<400x128xf32>
    %c0_3 = arith.constant 0 : index
    %c0_4 = arith.constant 0 : index
    %3 = vector.load %arg3[%c0_3, %c0_4] : memref<1x128xf32, #tpu.memory_space<vmem>>, vector<1x128xf32>
    %4 = vector.broadcast %3 : vector<1x128xf32> to vector<400x128xf32>
    %5 = arith.addf %2, %4 : vector<400x128xf32>
    %cst_5 = arith.constant 0.000000e+00 : f32
    %6 = vector.broadcast %cst_5 : f32 to vector<400x128xf32>
    %7 = arith.maximumf %5, %6 : vector<400x128xf32>
    %8 = arith.truncf %7 : vector<400x128xf32> to vector<400x128xbf16>
    %c0_6 = arith.constant 0 : index
    %c0_7 = arith.constant 0 : index
    %9 = vector.load %arg4[%c0_6, %c0_7] : memref<400x128xbf16, #tpu.memory_space<vmem>>, vector<400x128xbf16>
    tpu.vector_store %arg4[%c0_6, %c0_7], %8 {strides = array<i32>} : memref<400x128xbf16, #tpu.memory_space<vmem>>, vector<400x128xbf16>,
    return
  }
  func.func @transform_0(%arg0: i32) -> (i32, i32) {
    %c0_i32 = arith.constant 0 : i32
    %c0_i32_0 = arith.constant 0 : i32
    return %arg0, %c0_i32 : i32, i32
  }
  func.func @transform_1(%arg0: i32) -> (i32, i32) {
    %c0_i32 = arith.constant 0 : i32
    %c0_i32_0 = arith.constant 0 : i32
    %c0_i32_1 = arith.constant 0 : i32
    return %c0_i32, %c0_i32_0 : i32, i32
  }
  func.func @transform_2(%arg0: i32) -> (i32, i32) {
    %c0_i32 = arith.constant 0 : i32
    %c0_i32_0 = arith.constant 0 : i32
    %c0_i32_1 = arith.constant 0 : i32
    return %c0_i32, %c0_i32_0 : i32, i32
  }
  func.func @transform_3(%arg0: i32) -> (i32, i32) {
    %c0_i32 = arith.constant 0 : i32
    %c0_i32_0 = arith.constant 0 : i32
    return %arg0, %c0_i32 : i32, i32
  }
}

module attributes {stable_mosaic.version = 11 : i64} {
  func.func @_matmul_bias_kernel(%arg0: i32, %arg1: memref<96x512xbf16, #tpu.memory_space<vmem>>, %arg2: memref<512x128xbf16, #tpu.memory_space<vmem>>, %arg3: memref<1x128xf32, #tpu.memory_space<vmem>>, %arg4: memref<96x128xbf16, #tpu.memory_space<vmem>>) attributes {dimension_semantics = [#tpu.dimension_semantics<parallel>], iteration_bounds = array<i64: 2>, scalar_prefetch = 0 : i64, scratch_operands = 0 : i64, tpu.core_type = #tpu.core_type<tc>, window_params = [{transform_indices = @transform_0, window_bounds = array<i64: 96, 512>}, {pipeline_mode = #tpu.pipeline_mode<synchronous>, transform_indices = @transform_1, window_bounds = array<i64: 512, 128>}, {pipeline_mode = #tpu.pipeline_mode<synchronous>, transform_indices = @transform_2, window_bounds = array<i64: 1, 128>}, {transform_indices = @transform_3, window_bounds = array<i64: 96, 128>}]} {
    %c0 = arith.constant 0 : index
    %c0_0 = arith.constant 0 : index
    %0 = vector.load %arg1[%c0, %c0_0] : memref<96x512xbf16, #tpu.memory_space<vmem>>, vector<96x512xbf16>
    %c0_1 = arith.constant 0 : index
    %c0_2 = arith.constant 0 : index
    %1 = vector.load %arg2[%c0_1, %c0_2] : memref<512x128xbf16, #tpu.memory_space<vmem>>, vector<512x128xbf16>
    %cst = arith.constant dense<0.000000e+00> : vector<96x128xf32>
    %2 = tpu.matmul %0, %1, %cst {dimension_numbers = #tpu.dot_dimension_numbers<[1], [0], [0], [1], [0, 0, 1, 1], [], []>} : vector<96x512xbf16>, vector<512x128xbf16>, vector<96x128xf32> -> vector<96x128xf32>
    %c0_3 = arith.constant 0 : index
    %c0_4 = arith.constant 0 : index
    %3 = vector.load %arg3[%c0_3, %c0_4] : memref<1x128xf32, #tpu.memory_space<vmem>>, vector<1x128xf32>
    %4 = vector.broadcast %3 : vector<1x128xf32> to vector<96x128xf32>
    %5 = arith.addf %2, %4 : vector<96x128xf32>
    %cst_5 = arith.constant 0.000000e+00 : f32
    %6 = vector.broadcast %cst_5 : f32 to vector<96x128xf32>
    %7 = arith.maximumf %5, %6 : vector<96x128xf32>
    %8 = arith.truncf %7 : vector<96x128xf32> to vector<96x128xbf16>
    %c0_6 = arith.constant 0 : index
    %c0_7 = arith.constant 0 : index
    %9 = vector.load %arg4[%c0_6, %c0_7] : memref<96x128xbf16, #tpu.memory_space<vmem>>, vector<96x128xbf16>
    tpu.vector_store %arg4[%c0_6, %c0_7], %8 {strides = array<i32>} : memref<96x128xbf16, #tpu.memory_space<vmem>>, vector<96x128xbf16>,
    return
  }
  func.func @transform_0(%arg0: i32) -> (i32, i32) {
    %c0_i32 = arith.constant 0 : i32
    %c0_i32_0 = arith.constant 0 : i32
    return %arg0, %c0_i32 : i32, i32
  }
  func.func @transform_1(%arg0: i32) -> (i32, i32) {
    %c0_i32 = arith.constant 0 : i32
    %c0_i32_0 = arith.constant 0 : i32
    %c0_i32_1 = arith.constant 0 : i32
    return %c0_i32, %c0_i32_0 : i32, i32
  }
  func.func @transform_2(%arg0: i32) -> (i32, i32) {
    %c0_i32 = arith.constant 0 : i32
    %c0_i32_0 = arith.constant 0 : i32
    %c0_i32_1 = arith.constant 0 : i32
    return %c0_i32, %c0_i32_0 : i32, i32
  }
  func.func @transform_3(%arg0: i32) -> (i32, i32) {
    %c0_i32 = arith.constant 0 : i32
    %c0_i32_0 = arith.constant 0 : i32
    return %arg0, %c0_i32 : i32, i32
  }
}

module attributes {stable_mosaic.version = 11 : i64} {
  func.func @_matmul_bias_kernel(%arg0: i32, %arg1: memref<64x640xbf16, #tpu.memory_space<vmem>>, %arg2: memref<640x128xbf16, #tpu.memory_space<vmem>>, %arg3: memref<1x128xf32, #tpu.memory_space<vmem>>, %arg4: memref<64x128xbf16, #tpu.memory_space<vmem>>) attributes {dimension_semantics = [#tpu.dimension_semantics<parallel>], iteration_bounds = array<i64: 2>, scalar_prefetch = 0 : i64, scratch_operands = 0 : i64, tpu.core_type = #tpu.core_type<tc>, window_params = [{transform_indices = @transform_0, window_bounds = array<i64: 64, 640>}, {pipeline_mode = #tpu.pipeline_mode<synchronous>, transform_indices = @transform_1, window_bounds = array<i64: 640, 128>}, {pipeline_mode = #tpu.pipeline_mode<synchronous>, transform_indices = @transform_2, window_bounds = array<i64: 1, 128>}, {transform_indices = @transform_3, window_bounds = array<i64: 64, 128>}]} {
    %c0 = arith.constant 0 : index
    %c0_0 = arith.constant 0 : index
    %0 = vector.load %arg1[%c0, %c0_0] : memref<64x640xbf16, #tpu.memory_space<vmem>>, vector<64x640xbf16>
    %c0_1 = arith.constant 0 : index
    %c0_2 = arith.constant 0 : index
    %1 = vector.load %arg2[%c0_1, %c0_2] : memref<640x128xbf16, #tpu.memory_space<vmem>>, vector<640x128xbf16>
    %cst = arith.constant dense<0.000000e+00> : vector<64x128xf32>
    %2 = tpu.matmul %0, %1, %cst {dimension_numbers = #tpu.dot_dimension_numbers<[1], [0], [0], [1], [0, 0, 1, 1], [], []>} : vector<64x640xbf16>, vector<640x128xbf16>, vector<64x128xf32> -> vector<64x128xf32>
    %c0_3 = arith.constant 0 : index
    %c0_4 = arith.constant 0 : index
    %3 = vector.load %arg3[%c0_3, %c0_4] : memref<1x128xf32, #tpu.memory_space<vmem>>, vector<1x128xf32>
    %4 = vector.broadcast %3 : vector<1x128xf32> to vector<64x128xf32>
    %5 = arith.addf %2, %4 : vector<64x128xf32>
    %cst_5 = arith.constant 0.000000e+00 : f32
    %6 = vector.broadcast %cst_5 : f32 to vector<64x128xf32>
    %7 = arith.maximumf %5, %6 : vector<64x128xf32>
    %8 = arith.truncf %7 : vector<64x128xf32> to vector<64x128xbf16>
    %c0_6 = arith.constant 0 : index
    %c0_7 = arith.constant 0 : index
    %9 = vector.load %arg4[%c0_6, %c0_7] : memref<64x128xbf16, #tpu.memory_space<vmem>>, vector<64x128xbf16>
    tpu.vector_store %arg4[%c0_6, %c0_7], %8 {strides = array<i32>} : memref<64x128xbf16, #tpu.memory_space<vmem>>, vector<64x128xbf16>,
    return
  }
  func.func @transform_0(%arg0: i32) -> (i32, i32) {
    %c0_i32 = arith.constant 0 : i32
    %c0_i32_0 = arith.constant 0 : i32
    return %arg0, %c0_i32 : i32, i32
  }
  func.func @transform_1(%arg0: i32) -> (i32, i32) {
    %c0_i32 = arith.constant 0 : i32
    %c0_i32_0 = arith.constant 0 : i32
    %c0_i32_1 = arith.constant 0 : i32
    return %c0_i32, %c0_i32_0 : i32, i32
  }
  func.func @transform_2(%arg0: i32) -> (i32, i32) {
    %c0_i32 = arith.constant 0 : i32
    %c0_i32_0 = arith.constant 0 : i32
    %c0_i32_1 = arith.constant 0 : i32
    return %c0_i32, %c0_i32_0 : i32, i32
  }
  func.func @transform_3(%arg0: i32) -> (i32, i32) {
    %c0_i32 = arith.constant 0 : i32
    %c0_i32_0 = arith.constant 0 : i32
    return %arg0, %c0_i32 : i32, i32
  }
}

module attributes {stable_mosaic.version = 11 : i64} {
  func.func @_tail_kernel(%arg0: i32, %arg1: memref<16x3200xbf16, #tpu.memory_space<vmem>>, %arg2: memref<16x128xbf16, #tpu.memory_space<vmem>>, %arg3: memref<128x256xbf16, #tpu.memory_space<vmem>>, %arg4: memref<1x256xf32, #tpu.memory_space<vmem>>, %arg5: memref<3200x512xbf16, #tpu.memory_space<vmem>>, %arg6: memref<256x512xbf16, #tpu.memory_space<vmem>>, %arg7: memref<1x512xf32, #tpu.memory_space<vmem>>, %arg8: memref<512x128xbf16, #tpu.memory_space<vmem>>, %arg9: memref<1x128xf32, #tpu.memory_space<vmem>>, %arg10: memref<16x128xf32, #tpu.memory_space<vmem>>) attributes {dimension_semantics = [#tpu.dimension_semantics<parallel>], iteration_bounds = array<i64: 1>, scalar_prefetch = 0 : i64, scratch_operands = 0 : i64, tpu.core_type = #tpu.core_type<tc>, window_params = [{transform_indices = @transform_0, window_bounds = array<i64: 16, 3200>}, {transform_indices = @transform_1, window_bounds = array<i64: 16, 128>}, {pipeline_mode = #tpu.pipeline_mode<synchronous>, transform_indices = @transform_2, window_bounds = array<i64: 128, 256>}, {pipeline_mode = #tpu.pipeline_mode<synchronous>, transform_indices = @transform_3, window_bounds = array<i64: 1, 256>}, {pipeline_mode = #tpu.pipeline_mode<synchronous>, transform_indices = @transform_4, window_bounds = array<i64: 3200, 512>}, {pipeline_mode = #tpu.pipeline_mode<synchronous>, transform_indices = @transform_5, window_bounds = array<i64: 256, 512>}, {pipeline_mode = #tpu.pipeline_mode<synchronous>, transform_indices = @transform_6, window_bounds = array<i64: 1, 512>}, {pipeline_mode = #tpu.pipeline_mode<synchronous>, transform_indices = @transform_7, window_bounds = array<i64: 512, 128>}, {pipeline_mode = #tpu.pipeline_mode<synchronous>, transform_indices = @transform_8, window_bounds = array<i64: 1, 128>}, {transform_indices = @transform_9, window_bounds = array<i64: 16, 128>}]} {
    %c0 = arith.constant 0 : index
    %c0_0 = arith.constant 0 : index
    %0 = vector.load %arg2[%c0, %c0_0] : memref<16x128xbf16, #tpu.memory_space<vmem>>, vector<16x128xbf16>
    %c0_1 = arith.constant 0 : index
    %c0_2 = arith.constant 0 : index
    %1 = vector.load %arg3[%c0_1, %c0_2] : memref<128x256xbf16, #tpu.memory_space<vmem>>, vector<128x256xbf16>
    %cst = arith.constant dense<0.000000e+00> : vector<16x256xf32>
    %2 = tpu.matmul %0, %1, %cst {dimension_numbers = #tpu.dot_dimension_numbers<[1], [0], [0], [1], [0, 0, 1, 1], [], []>} : vector<16x128xbf16>, vector<128x256xbf16>, vector<16x256xf32> -> vector<16x256xf32>
    %c0_3 = arith.constant 0 : index
    %c0_4 = arith.constant 0 : index
    %3 = vector.load %arg4[%c0_3, %c0_4] : memref<1x256xf32, #tpu.memory_space<vmem>>, vector<1x256xf32>
    %4 = vector.broadcast %3 : vector<1x256xf32> to vector<16x256xf32>
    %5 = arith.addf %2, %4 : vector<16x256xf32>
    %cst_5 = arith.constant 0.000000e+00 : f32
    %6 = vector.broadcast %cst_5 : f32 to vector<16x256xf32>
    %7 = arith.maximumf %5, %6 : vector<16x256xf32>
    %c0_6 = arith.constant 0 : index
    %c0_7 = arith.constant 0 : index
    %8 = vector.load %arg1[%c0_6, %c0_7] : memref<16x3200xbf16, #tpu.memory_space<vmem>>, vector<16x3200xbf16>
    %c0_8 = arith.constant 0 : index
    %c0_9 = arith.constant 0 : index
    %9 = vector.load %arg5[%c0_8, %c0_9] : memref<3200x512xbf16, #tpu.memory_space<vmem>>, vector<3200x512xbf16>
    %cst_10 = arith.constant dense<0.000000e+00> : vector<16x512xf32>
    %10 = tpu.matmul %8, %9, %cst_10 {dimension_numbers = #tpu.dot_dimension_numbers<[1], [0], [0], [1], [0, 0, 1, 1], [], []>} : vector<16x3200xbf16>, vector<3200x512xbf16>, vector<16x512xf32> -> vector<16x512xf32>
    %11 = arith.truncf %7 : vector<16x256xf32> to vector<16x256xbf16>
    %c0_11 = arith.constant 0 : index
    %c0_12 = arith.constant 0 : index
    %12 = vector.load %arg6[%c0_11, %c0_12] : memref<256x512xbf16, #tpu.memory_space<vmem>>, vector<256x512xbf16>
    %cst_13 = arith.constant dense<0.000000e+00> : vector<16x512xf32>
    %13 = tpu.matmul %11, %12, %cst_13 {dimension_numbers = #tpu.dot_dimension_numbers<[1], [0], [0], [1], [0, 0, 1, 1], [], []>} : vector<16x256xbf16>, vector<256x512xbf16>, vector<16x512xf32> -> vector<16x512xf32>
    %14 = arith.addf %10, %13 : vector<16x512xf32>
    %c0_14 = arith.constant 0 : index
    %c0_15 = arith.constant 0 : index
    %15 = vector.load %arg7[%c0_14, %c0_15] : memref<1x512xf32, #tpu.memory_space<vmem>>, vector<1x512xf32>
    %16 = vector.broadcast %15 : vector<1x512xf32> to vector<16x512xf32>
    %17 = arith.addf %14, %16 : vector<16x512xf32>
    %cst_16 = arith.constant 0.000000e+00 : f32
    %18 = vector.broadcast %cst_16 : f32 to vector<16x512xf32>
    %19 = arith.maximumf %17, %18 : vector<16x512xf32>
    %20 = arith.truncf %19 : vector<16x512xf32> to vector<16x512xbf16>
    %c0_17 = arith.constant 0 : index
    %c0_18 = arith.constant 0 : index
    %21 = vector.load %arg8[%c0_17, %c0_18] : memref<512x128xbf16, #tpu.memory_space<vmem>>, vector<512x128xbf16>
    %cst_19 = arith.constant dense<0.000000e+00> : vector<16x128xf32>
    %22 = tpu.matmul %20, %21, %cst_19 {dimension_numbers = #tpu.dot_dimension_numbers<[1], [0], [0], [1], [0, 0, 1, 1], [], []>} : vector<16x512xbf16>, vector<512x128xbf16>, vector<16x128xf32> -> vector<16x128xf32>
    %c0_20 = arith.constant 0 : index
    %c0_21 = arith.constant 0 : index
    %23 = vector.load %arg9[%c0_20, %c0_21] : memref<1x128xf32, #tpu.memory_space<vmem>>, vector<1x128xf32>
    %24 = vector.broadcast %23 : vector<1x128xf32> to vector<16x128xf32>
    %25 = arith.addf %22, %24 : vector<16x128xf32>
    %c0_22 = arith.constant 0 : index
    %c0_23 = arith.constant 0 : index
    %26 = vector.load %arg10[%c0_22, %c0_23] : memref<16x128xf32, #tpu.memory_space<vmem>>, vector<16x128xf32>
    tpu.vector_store %arg10[%c0_22, %c0_23], %25 {strides = array<i32>} : memref<16x128xf32, #tpu.memory_space<vmem>>, vector<16x128xf32>,
    return
  }
  func.func @transform_0(%arg0: i32) -> (i32, i32) {
    %c0_i32 = arith.constant 0 : i32
    %c0_i32_0 = arith.constant 0 : i32
    return %arg0, %c0_i32 : i32, i32
  }
  func.func @transform_1(%arg0: i32) -> (i32, i32) {
    %c0_i32 = arith.constant 0 : i32
    %c0_i32_0 = arith.constant 0 : i32
    return %arg0, %c0_i32 : i32, i32
  }
  func.func @transform_2(%arg0: i32) -> (i32, i32) {
    %c0_i32 = arith.constant 0 : i32
    %c0_i32_0 = arith.constant 0 : i32
    %c0_i32_1 = arith.constant 0 : i32
    return %c0_i32, %c0_i32_0 : i32, i32
  }
  func.func @transform_3(%arg0: i32) -> (i32, i32) {
    %c0_i32 = arith.constant 0 : i32
    %c0_i32_0 = arith.constant 0 : i32
    %c0_i32_1 = arith.constant 0 : i32
    return %c0_i32, %c0_i32_0 : i32, i32
  }
  func.func @transform_4(%arg0: i32) -> (i32, i32) {
    %c0_i32 = arith.constant 0 : i32
    %c0_i32_0 = arith.constant 0 : i32
    %c0_i32_1 = arith.constant 0 : i32
    return %c0_i32, %c0_i32_0 : i32, i32
  }
  func.func @transform_5(%arg0: i32) -> (i32, i32) {
    %c0_i32 = arith.constant 0 : i32
    %c0_i32_0 = arith.constant 0 : i32
    %c0_i32_1 = arith.constant 0 : i32
    return %c0_i32, %c0_i32_0 : i32, i32
  }
  func.func @transform_6(%arg0: i32) -> (i32, i32) {
    %c0_i32 = arith.constant 0 : i32
    %c0_i32_0 = arith.constant 0 : i32
    %c0_i32_1 = arith.constant 0 : i32
    return %c0_i32, %c0_i32_0 : i32, i32
  }
  func.func @transform_7(%arg0: i32) -> (i32, i32) {
    %c0_i32 = arith.constant 0 : i32
    %c0_i32_0 = arith.constant 0 : i32
    %c0_i32_1 = arith.constant 0 : i32
    return %c0_i32, %c0_i32_0 : i32, i32
  }
  func.func @transform_8(%arg0: i32) -> (i32, i32) {
    %c0_i32 = arith.constant 0 : i32
    %c0_i32_0 = arith.constant 0 : i32
    %c0_i32_1 = arith.constant 0 : i32
    return %c0_i32, %c0_i32_0 : i32, i32
  }
  func.func @transform_9(%arg0: i32) -> (i32, i32) {
    %c0_i32 = arith.constant 0 : i32
    %c0_i32_0 = arith.constant 0 : i32
    return %arg0, %c0_i32 : i32, i32
  }
}

</mosaic_0001>

<bundles_post_ra>
// kernel: mugicha_forward.4
= control target key start
LH: loop header
LB: loop body
LE: loop exit
PB: predicated region body
PF: predicated region fallthrough
CT: control target
= control target key end

     0   :  { %s1690_s12 = smov 0   ;;  %s1925_s0 = inlined_call_operand.vmem [shape: bf16[800,256], index: 0, kind: input, shape index: {}]   ;;  %s1926_s1 = inlined_call_operand.vmem [shape: bf16[256,128], index: 1, kind: input, shape index: {}]   ;;  %s1927_s2 = inlined_call_operand.vmem [shape: f32[1,128], index: 2, kind: input, shape index: {}]   ;;  %s1928_s3 = inlined_call_operand.vmem [shape: bf16[800,128], index: 3, kind: output, shape index: {}]  }
   0x1 LB: > { %s1202_s13 = sadd.s32 4294967295, %s1667_s12   ;;  %p1206_p0 = scmp.ge.s32.totalorder %s1667_s12, 1  ;;  %s1667_s12 = sphi %s1690_s12, %s13_s12  }
   0x2   : > { %p139_p1 = scmp.lt.s32.totalorder %s1667_s12, 3 }
   0x4   : > { %p140_p2 = pnand %p1206_p0, %p139_p1 }
   0x5   : > { %v1570_v0 = vld [vmem:[%s1926_s1] sm:$0xff] (!%p140_p2)   ;;  %v1669_v1 = vmov (!%p140_p2), 0   ;;  %s164_s16 = smul.u32 (!%p140_p2), 50, %s1202_s13  ;;  %v1571_v2 = vld [vmem:[%s1926_s1 + $0x8] sm:$0xff] (!%p140_p2)   ;;  %v1572_v3 = vld [vmem:[%s1926_s1 + $0x10] sm:$0xff] (!%p140_p2)  }
   0x6   : > { %143 = sbr.rel (%p140_p2) target bundleno = 387 (0x183), region = 32  ;;  %613 = vmatprep.subr.bf16.mxu0 (!%p140_p2), %v1669_v1  ;;  %1529 = vmatprep.subr.bf16.mxu1 (!%p140_p2), %v1669_v1  ;;  %v1573_v4 = vld [vmem:[%s1926_s1 + $0x18] sm:$0xff] (!%p140_p2)   ;;  %v1574_v5 = vld [vmem:[%s1926_s1 + $0x20] sm:$0xff] (!%p140_p2)   ;;  %v1575_v7 = vld [vmem:[%s1926_s1 + $0x28] sm:$0xff] (!%p140_p2)  }
   0x7   : > { %614 = vmatpush1.bf16.msra.mxu0 (!%p140_p2), %v1570_v0  ;;  %1545 = vmatpush1.bf16.msra.mxu1 (!%p140_p2), %v1570_v0  ;;  %p165_p3 = scmp.lt.s32.totalorder (!%p140_p2), %s164_s16, 99  ;;  %v1576_v9 = vld [vmem:[%s1926_s1 + $0x30] sm:$0xff] (!%p140_p2)   ;;  %v1577_v10 = vld [vmem:[%s1926_s1 + $0x38] sm:$0xff] (!%p140_p2)   ;;  %v1578_v11 = vld [vmem:[%s1926_s1 + $0x40] sm:$0xff] (!%p140_p2)  }
   0x8   : > { %615 = vmatprep.subr.bf16.mxu0 (!%p140_p2), %v1669_v1  ;;  %1530 = vmatprep.subr.bf16.mxu1 (!%p140_p2), %v1669_v1  ;;  %v1579_v12 = vld [vmem:[%s1926_s1 + $0x48] sm:$0xff] (!%p140_p2)   ;;  %v1580_v13 = vld [vmem:[%s1926_s1 + $0x50] sm:$0xff] (!%p140_p2)   ;;  %v1581_v14 = vld [vmem:[%s1926_s1 + $0x58] sm:$0xff] (!%p140_p2)  }
   0x9   : > { %v1582_v15 = vld [vmem:[%s1926_s1 + $0x60] sm:$0xff] (!%p140_p2)   ;;  %v1583_v16 = vld [vmem:[%s1926_s1 + $0x68] sm:$0xff] (!%p140_p2)   ;;  %v1584_v17 = vld [vmem:[%s1926_s1 + $0x70] sm:$0xff] (!%p140_p2)  }
   0xa   : > { %v1585_v18 = vld [vmem:[%s1926_s1 + $0x78] sm:$0xff] (!%p140_p2)  }
   0xb   : > { %616 = vmatpush1.bf16.msra.mxu0 (!%p140_p2), %v1571_v2  ;;  %1546 = vmatpush1.bf16.msra.mxu1 (!%p140_p2), %v1571_v2 }
   0xc   : > { %617 = vmatprep.subr.bf16.mxu0 (!%p140_p2), %v1669_v1  ;;  %1531 = vmatprep.subr.bf16.mxu1 (!%p140_p2), %v1669_v1 }
   0xd   : > { %s1930_s16 = smov (!%p165_p3, %s164_s16), 99 }
   0xe   : > { %s1329_s23 = sshll.u32 %s1930_s16, 3  ;;  %s1209_s29 = sshll.u32 %s1930_s16, 2 }
   0xf   : > { %618 = vmatpush1.bf16.msra.mxu0 %v1572_v3  ;;  %1547 = vmatpush1.bf16.msra.mxu1 %v1572_v3  ;;  %s1727_s28 = scalar_lea.vmem %s1925_s0, %s1329_s23  ;;  %v1839_v3 = vld [vmem:[%s1927_s2] ss:$0 sm:$0xff]  ;;  %s1849_s4 = scalar_lea.vmem %s1928_s3, %s1209_s29 }
  0x10   : > { %619 = vmatprep.subr.bf16.mxu0 %v1669_v1  ;;  %1532 = vmatprep.subr.bf16.mxu1 %v1669_v1  ;;  %v1588_v6 = vld [vmem:[%s1727_s28 + $0x4] ss:$8 sps:$4 sm:$0xff]   ;;  %v1591_v8 = vld [vmem:[%s1727_s28 + $0xd4] ss:$8 sps:$4 sm:$0xff]   ;;  %v1586_v19 = vld [vmem:[%s1727_s28] ss:$8 sps:$4 sm:$0xff]  }
  0x11   : > { %645 = vmatprep.mubr.bf16.mxu0 %v1588_v6  ;;  %749 = vmatprep.mubr.bf16.mxu1 %v1591_v8  ;;  %v1589_v20 = vld [vmem:[%s1727_s28 + $0xd0] ss:$8 sps:$4 sm:$0xff]   ;;  %v1592_v21 = vld [vmem:[%s1727_s28 + $0x14] ss:$8 sps:$4 sm:$0xff]   ;;  %v1595_v22 = vld [vmem:[%s1727_s28 + $0xe4] ss:$8 sps:$4 sm:$0xff]  }
  0x12   : > { %v1594_v23 = vld [vmem:[%s1727_s28 + $0x10] ss:$8 sps:$4 sm:$0xff]   ;;  %v1597_v24 = vld [vmem:[%s1727_s28 + $0xe0] ss:$8 sps:$4 sm:$0xff]   ;;  %v1598_v25 = vld [vmem:[%s1727_s28 + $0x24] ss:$8 sps:$4 sm:$0xff]  }
  0x13   : > { %620 = vmatpush1.bf16.msra.mxu0 %v1573_v4  ;;  %1548 = vmatpush1.bf16.msra.mxu1 %v1573_v4  ;;  %v1601_v26 = vld [vmem:[%s1727_s28 + $0xf4] ss:$8 sps:$4 sm:$0xff]   ;;  %v1600_v27 = vld [vmem:[%s1727_s28 + $0x20] ss:$8 sps:$4 sm:$0xff]   ;;  %v1603_v28 = vld [vmem:[%s1727_s28 + $0xf0] ss:$8 sps:$4 sm:$0xff]  }
  0x14   : > { %621 = vmatprep.subr.bf16.mxu0 %v1669_v1  ;;  %1533 = vmatprep.subr.bf16.mxu1 %v1669_v1  ;;  %v1604_v29 = vld [vmem:[%s1727_s28 + $0x34] ss:$8 sps:$4 sm:$0xff]   ;;  %v1607_v30 = vld [vmem:[%s1727_s28 + $0x104] ss:$8 sps:$4 sm:$0xff]   ;;  %v1606_v31 = vld [vmem:[%s1727_s28 + $0x30] ss:$8 sps:$4 sm:$0xff]  }
  0x15   : > { %v1609_v32 = vld [vmem:[%s1727_s28 + $0x100] ss:$8 sps:$4 sm:$0xff]   ;;  %v1610_v33 = vld [vmem:[%s1727_s28 + $0x44] ss:$8 sps:$4 sm:$0xff]   ;;  %v1613_v34 = vld [vmem:[%s1727_s28 + $0x114] ss:$8 sps:$4 sm:$0xff]  }
  0x16   : > { %v1612_v35 = vld [vmem:[%s1727_s28 + $0x40] ss:$8 sps:$4 sm:$0xff]   ;;  %v1615_v36 = vld [vmem:[%s1727_s28 + $0x110] ss:$8 sps:$4 sm:$0xff]   ;;  %v1616_v37 = vld [vmem:[%s1727_s28 + $0x54] ss:$8 sps:$4 sm:$0xff]  }
  0x17   : > { %622 = vmatpush1.bf16.msra.mxu0 %v1574_v5  ;;  %1549 = vmatpush1.bf16.msra.mxu1 %v1574_v5  ;;  %v1619_v38 = vld [vmem:[%s1727_s28 + $0x124] ss:$8 sps:$4 sm:$0xff]   ;;  %v1618_v39 = vld [vmem:[%s1727_s28 + $0x50] ss:$8 sps:$4 sm:$0xff]   ;;  %v1621_v40 = vld [vmem:[%s1727_s28 + $0x120] ss:$8 sps:$4 sm:$0xff]  }
  0x18   : > { %623 = vmatprep.subr.bf16.mxu0 %v1669_v1  ;;  %1534 = vmatprep.subr.bf16.mxu1 %v1669_v1  ;;  %v1622_v41 = vld [vmem:[%s1727_s28 + $0x64] ss:$8 sps:$4 sm:$0xff]   ;;  %v1625_v42 = vld [vmem:[%s1727_s28 + $0x134] ss:$8 sps:$4 sm:$0xff]   ;;  %v1624_v43 = vld [vmem:[%s1727_s28 + $0x60] ss:$8 sps:$4 sm:$0xff]  }
  0x19   : > { %v1627_v44 = vld [vmem:[%s1727_s28 + $0x130] ss:$8 sps:$4 sm:$0xff]   ;;  %v1628_v45 = vld [vmem:[%s1727_s28 + $0x74] ss:$8 sps:$4 sm:$0xff]   ;;  %v1631_v46 = vld [vmem:[%s1727_s28 + $0x144] ss:$8 sps:$4 sm:$0xff]  }
  0x1a   : > { %v1630_v47 = vld [vmem:[%s1727_s28 + $0x70] ss:$8 sps:$4 sm:$0xff]   ;;  %v1633_v48 = vld [vmem:[%s1727_s28 + $0x140] ss:$8 sps:$4 sm:$0xff]   ;;  %v1634_v49 = vld [vmem:[%s1727_s28 + $0x84] ss:$8 sps:$4 sm:$0xff]  }
  0x1b   : > { %624 = vmatpush1.bf16.msra.mxu0 %v1575_v7  ;;  %1550 = vmatpush1.bf16.msra.mxu1 %v1575_v7  ;;  %v1637_v50 = vld [vmem:[%s1727_s28 + $0x154] ss:$8 sps:$4 sm:$0xff]   ;;  %v1636_v51 = vld [vmem:[%s1727_s28 + $0x80] ss:$8 sps:$4 sm:$0xff]   ;;  %v1639_v52 = vld [vmem:[%s1727_s28 + $0x150] ss:$8 sps:$4 sm:$0xff]  }
  0x1c   : > { %625 = vmatprep.subr.bf16.mxu0 %v1669_v1  ;;  %1535 = vmatprep.subr.bf16.mxu1 %v1669_v1  ;;  %v1640_v53 = vld [vmem:[%s1727_s28 + $0x94] ss:$8 sps:$4 sm:$0xff]   ;;  %v1643_v54 = vld [vmem:[%s1727_s28 + $0x164] ss:$8 sps:$4 sm:$0xff]   ;;  %v1642_v55 = vld [vmem:[%s1727_s28 + $0x90] ss:$8 sps:$4 sm:$0xff]  }
  0x1d   : > { %v1645_v56 = vld [vmem:[%s1727_s28 + $0x160] ss:$8 sps:$4 sm:$0xff]   ;;  %v1646_v57 = vld [vmem:[%s1727_s28 + $0xa4] ss:$8 sps:$4 sm:$0xff]   ;;  %v1649_v58 = vld [vmem:[%s1727_s28 + $0x174] ss:$8 sps:$4 sm:$0xff]  }
  0x1e   : > { %v1648_v59 = vld [vmem:[%s1727_s28 + $0xa0] ss:$8 sps:$4 sm:$0xff]   ;;  %v1651_v60 = vld [vmem:[%s1727_s28 + $0x170] ss:$8 sps:$4 sm:$0xff]   ;;  %v1652_v61 = vld [vmem:[%s1727_s28 + $0xb4] ss:$8 sps:$4 sm:$0xff]  }
  0x1f   : > { %626 = vmatpush1.bf16.msra.mxu0 %v1576_v9  ;;  %1551 = vmatpush1.bf16.msra.mxu1 %v1576_v9  ;;  %v1655_v62 = vld [vmem:[%s1727_s28 + $0x184] ss:$8 sps:$4 sm:$0xff]   ;;  %v1654_v63 = vld [vmem:[%s1727_s28 + $0xb0] ss:$8 sps:$4 sm:$0xff]   ;;  %v1657_v0 = vld [vmem:[%s1727_s28 + $0x180] ss:$8 sps:$4 sm:$0xff]  }
  0x20   : > { %627 = vmatprep.subr.bf16.mxu0 %v1669_v1  ;;  %1536 = vmatprep.subr.bf16.mxu1 %v1669_v1  ;;  %v1660_v2 = vld [vmem:[%s1727_s28 + $0xc0] ss:$8 sps:$4 sm:$0xff]  }
  0x23   : > { %628 = vmatpush1.bf16.msra.mxu0 %v1577_v10  ;;  %1552 = vmatpush1.bf16.msra.mxu1 %v1577_v10 }
  0x24   : > { %629 = vmatprep.subr.bf16.mxu0 %v1669_v1  ;;  %1537 = vmatprep.subr.bf16.mxu1 %v1669_v1 }
  0x27   : > { %630 = vmatpush1.bf16.msra.mxu0 %v1578_v11  ;;  %1553 = vmatpush1.bf16.msra.mxu1 %v1578_v11 }
  0x28   : > { %631 = vmatprep.subr.bf16.mxu0 %v1669_v1  ;;  %1538 = vmatprep.subr.bf16.mxu1 %v1669_v1 }
  0x2b   : > { %632 = vmatpush1.bf16.msra.mxu0 %v1579_v12  ;;  %1554 = vmatpush1.bf16.msra.mxu1 %v1579_v12 }
  0x2c   : > { %633 = vmatprep.subr.bf16.mxu0 %v1669_v1  ;;  %1539 = vmatprep.subr.bf16.mxu1 %v1669_v1 }
  0x2f   : > { %634 = vmatpush1.bf16.msra.mxu0 %v1580_v13  ;;  %1555 = vmatpush1.bf16.msra.mxu1 %v1580_v13 }
  0x30   : > { %635 = vmatprep.subr.bf16.mxu0 %v1669_v1  ;;  %1540 = vmatprep.subr.bf16.mxu1 %v1669_v1 }
  0x33   : > { %636 = vmatpush1.bf16.msra.mxu0 %v1581_v14  ;;  %1556 = vmatpush1.bf16.msra.mxu1 %v1581_v14 }
  0x34   : > { %637 = vmatprep.subr.bf16.mxu0 %v1669_v1  ;;  %1541 = vmatprep.subr.bf16.mxu1 %v1669_v1 }
  0x37   : > { %638 = vmatpush1.bf16.msra.mxu0 %v1582_v15  ;;  %1557 = vmatpush1.bf16.msra.mxu1 %v1582_v15 }
  0x38   : > { %639 = vmatprep.subr.bf16.mxu0 %v1669_v1  ;;  %1542 = vmatprep.subr.bf16.mxu1 %v1669_v1 }
  0x3b   : > { %640 = vmatpush1.bf16.msra.mxu0 %v1583_v16  ;;  %1558 = vmatpush1.bf16.msra.mxu1 %v1583_v16 }
  0x3c   : > { %641 = vmatprep.subr.bf16.mxu0 %v1669_v1  ;;  %1543 = vmatprep.subr.bf16.mxu1 %v1669_v1 }
  0x3f   : > { %642 = vmatpush1.bf16.msra.mxu0 %v1584_v17  ;;  %1559 = vmatpush1.bf16.msra.mxu1 %v1584_v17 }
  0x40   : > { %643 = vmatprep.subr.bf16.mxu0 %v1669_v1  ;;  %1544 = vmatprep.subr.bf16.mxu1 %v1669_v1  ;;  %v1658_v1 = vld [vmem:[%s1727_s28 + $0xc4] ss:$8 sps:$4 sm:$0xff]  }
  0x43   : > { %644 = vmatpush1.bf16.msra.mxu0 %v1585_v18  ;;  %1560 = vmatpush1.bf16.msra.mxu1 %v1585_v18 }
  0x46   : > { %646 = vmatmul.mubr.bf16.vlgmr.msra.gmra.mrb[0].mxu0 %v1586_v19  ;;  %750 = vmatmul.mubr.bf16.vlgmr.msra.gmra.mrb[0].mxu1 %v1589_v20 }
  0x47   : > { %653 = vmatprep.mubr.bf16.mxu0 %v1592_v21  ;;  %757 = vmatprep.mubr.bf16.mxu1 %v1595_v22 }
  0x4e   : > { %654 = vmatmul.mubr.bf16.gmra.mrb[4].mxu0 %v1594_v23  ;;  %758 = vmatmul.mubr.bf16.gmra.mrb[4].mxu1 %v1597_v24 }
  0x4f   : > { %661 = vmatprep.mubr.bf16.mxu0 %v1598_v25  ;;  %765 = vmatprep.mubr.bf16.mxu1 %v1601_v26 }
  0x56   : > { %662 = vmatmul.mubr.bf16.gmra.mrb[8].mxu0 %v1600_v27  ;;  %766 = vmatmul.mubr.bf16.gmra.mrb[8].mxu1 %v1603_v28 }
  0x57   : > { %669 = vmatprep.mubr.bf16.mxu0 %v1604_v29  ;;  %773 = vmatprep.mubr.bf16.mxu1 %v1607_v30 }
  0x5e   : > { %670 = vmatmul.mubr.bf16.gmra.mrb[12].mxu0 %v1606_v31  ;;  %774 = vmatmul.mubr.bf16.gmra.mrb[12].mxu1 %v1609_v32 }
  0x5f   : > { %677 = vmatprep.mubr.bf16.mxu0 %v1610_v33  ;;  %781 = vmatprep.mubr.bf16.mxu1 %v1613_v34 }
  0x66   : > { %678 = vmatmul.mubr.bf16.gmra.mrb[16].mxu0 %v1612_v35  ;;  %782 = vmatmul.mubr.bf16.gmra.mrb[16].mxu1 %v1615_v36 }
  0x67   : > { %685 = vmatprep.mubr.bf16.mxu0 %v1616_v37  ;;  %789 = vmatprep.mubr.bf16.mxu1 %v1619_v38 }
  0x6e   : > { %686 = vmatmul.mubr.bf16.gmra.mrb[20].mxu0 %v1618_v39  ;;  %790 = vmatmul.mubr.bf16.gmra.mrb[20].mxu1 %v1621_v40 }
  0x6f   : > { %693 = vmatprep.mubr.bf16.mxu0 %v1622_v41  ;;  %797 = vmatprep.mubr.bf16.mxu1 %v1625_v42 }
  0x76   : > { %694 = vmatmul.mubr.bf16.gmra.mrb[24].mxu0 %v1624_v43  ;;  %798 = vmatmul.mubr.bf16.gmra.mrb[24].mxu1 %v1627_v44 }
  0x77   : > { %701 = vmatprep.mubr.bf16.mxu0 %v1628_v45  ;;  %805 = vmatprep.mubr.bf16.mxu1 %v1631_v46 }
  0x7e   : > { %702 = vmatmul.mubr.bf16.gmra.mrb[28].mxu0 %v1630_v47  ;;  %806 = vmatmul.mubr.bf16.gmra.mrb[28].mxu1 %v1633_v48 }
  0x7f   : > { %709 = vmatprep.mubr.bf16.mxu0 %v1634_v49  ;;  %813 = vmatprep.mubr.bf16.mxu1 %v1637_v50 }
  0x86   : > { %710 = vmatmul.mubr.bf16.gmra.mrb[32].mxu0 %v1636_v51  ;;  %814 = vmatmul.mubr.bf16.gmra.mrb[32].mxu1 %v1639_v52 }
  0x87   : > { %717 = vmatprep.mubr.bf16.mxu0 %v1640_v53  ;;  %821 = vmatprep.mubr.bf16.mxu1 %v1643_v54 }
  0x8e   : > { %718 = vmatmul.mubr.bf16.gmra.mrb[36].mxu0 %v1642_v55  ;;  %822 = vmatmul.mubr.bf16.gmra.mrb[36].mxu1 %v1645_v56 }
  0x8f   : > { %725 = vmatprep.mubr.bf16.mxu0 %v1646_v57  ;;  %829 = vmatprep.mubr.bf16.mxu1 %v1649_v58 }
  0x96   : > { %726 = vmatmul.mubr.bf16.gmra.mrb[40].mxu0 %v1648_v59  ;;  %830 = vmatmul.mubr.bf16.gmra.mrb[40].mxu1 %v1651_v60 }
  0x97   : > { %733 = vmatprep.mubr.bf16.mxu0 %v1652_v61  ;;  %837 = vmatprep.mubr.bf16.mxu1 %v1655_v62 }
  0x9e   : > { %734 = vmatmul.mubr.bf16.gmra.mrb[44].mxu0 %v1654_v63  ;;  %838 = vmatmul.mubr.bf16.gmra.mrb[44].mxu1 %v1657_v0 }
  0x9f   : > { %741 = vmatprep.mubr.bf16.mxu0 %v1658_v1 }
  0xa6   : > { %742 = vmatmul.mubr.bf16.gmra.mrb[48].mxu0 %v1660_v2 }
 0x119   : > { %v647_v4 = vpop.f32.mrb[0].mxu0  ;;  %v751_v5 = vpop.f32.mrb[0].mxu1 }
 0x11a   : > { %v648_v6 = vadd.f32 %v1839_v3, %v647_v4  ;;  %v649_v7 = vpop.f32.mrb[1].mxu0  ;;  %v752_v8 = vadd.f32 %v1839_v3, %v751_v5  ;;  %v753_v9 = vpop.f32.mrb[1].mxu1 }
 0x11b   : > { %v650_v10 = vpop.f32.mrb[2].mxu0  ;;  %v754_v11 = vpop.f32.mrb[2].mxu1 }
 0x11c   : > { %v651_v12 = vadd.f32 %v1839_v3, %v650_v10  ;;  %v652_v13 = vpop.f32.mrb[3].mxu0  ;;  %v872_v14 = vmax.f32 %v752_v8, 0.0  ;;  %v755_v15 = vadd.f32 %v1839_v3, %v754_v11  ;;  %v756_v16 = vpop.f32.mrb[3].mxu1  ;;  %v846_v17 = vmax.f32 %v648_v6, 0.0 }
 0x11e   : > { %v847_v18 = vmax.f32 %v651_v12, 0.0  ;;  %v873_v19 = vmax.f32 %v755_v15, 0.0 }
 0x120   : > { %v1383_v20 = vpack.c.bf16 %v847_v18, %v846_v17  ;;  %v1448_v21 = vpack.c.bf16 %v873_v19, %v872_v14 }
 0x121   : > { %v655_v22 = vpop.f32.mrb[4].mxu0  ;;  %v759_v23 = vpop.f32.mrb[4].mxu1 }
 0x122   : > { %1384 = vst [vmem:[%s1849_s4] sm:$0xff] %v1383_v20   ;;  %1517 = vst [vmem:[%s1849_s4 + $0x68] sm:$0xff] %v1448_v21   ;;  %v656_v24 = vadd.f32 %v1839_v3, %v655_v22  ;;  %v657_v25 = vpop.f32.mrb[5].mxu0  ;;  %v760_v26 = vadd.f32 %v1839_v3, %v759_v23  ;;  %v761_v27 = vpop.f32.mrb[5].mxu1 }
 0x123   : > { %v658_v28 = vpop.f32.mrb[6].mxu0  ;;  %v762_v29 = vpop.f32.mrb[6].mxu1 }
 0x124   : > { %v659_v30 = vadd.f32 %v1839_v3, %v658_v28  ;;  %v660_v31 = vpop.f32.mrb[7].mxu0  ;;  %v874_v32 = vmax.f32 %v760_v26, 0.0  ;;  %v763_v33 = vadd.f32 %v1839_v3, %v762_v29  ;;  %v764_v34 = vpop.f32.mrb[7].mxu1  ;;  %v848_v35 = vmax.f32 %v656_v24, 0.0 }
 0x126   : > { %v849_v36 = vmax.f32 %v659_v30, 0.0  ;;  %v875_v37 = vmax.f32 %v763_v33, 0.0 }
 0x128   : > { %v1388_v38 = vpack.c.bf16 %v849_v36, %v848_v35  ;;  %v1453_v39 = vpack.c.bf16 %v875_v37, %v874_v32 }
 0x129   : > { %v663_v40 = vpop.f32.mrb[8].mxu0  ;;  %v767_v41 = vpop.f32.mrb[8].mxu1 }
 0x12a   : > { %1505 = vst [vmem:[%s1849_s4 + $0x8] sm:$0xff] %v1388_v38   ;;  %1518 = vst [vmem:[%s1849_s4 + $0x70] sm:$0xff] %v1453_v39   ;;  %v664_v42 = vadd.f32 %v1839_v3, %v663_v40  ;;  %v665_v43 = vpop.f32.mrb[9].mxu0  ;;  %v768_v44 = vadd.f32 %v1839_v3, %v767_v41  ;;  %v769_v45 = vpop.f32.mrb[9].mxu1 }
 0x12b   : > { %v666_v46 = vpop.f32.mrb[10].mxu0  ;;  %v770_v47 = vpop.f32.mrb[10].mxu1 }
 0x12c   : > { %v667_v48 = vadd.f32 %v1839_v3, %v666_v46  ;;  %v668_v49 = vpop.f32.mrb[11].mxu0  ;;  %v876_v50 = vmax.f32 %v768_v44, 0.0  ;;  %v771_v51 = vadd.f32 %v1839_v3, %v770_v47  ;;  %v772_v52 = vpop.f32.mrb[11].mxu1  ;;  %v850_v53 = vmax.f32 %v664_v42, 0.0 }
 0x12e   : > { %v851_v54 = vmax.f32 %v667_v48, 0.0  ;;  %v877_v55 = vmax.f32 %v771_v51, 0.0 }
 0x130   : > { %v1393_v56 = vpack.c.bf16 %v851_v54, %v850_v53  ;;  %v1458_v57 = vpack.c.bf16 %v877_v55, %v876_v50 }
 0x131   : > { %v671_v58 = vpop.f32.mrb[12].mxu0  ;;  %v775_v59 = vpop.f32.mrb[12].mxu1 }
 0x132   : > { %1506 = vst [vmem:[%s1849_s4 + $0x10] sm:$0xff] %v1393_v56   ;;  %1519 = vst [vmem:[%s1849_s4 + $0x78] sm:$0xff] %v1458_v57   ;;  %v672_v60 = vadd.f32 %v1839_v3, %v671_v58  ;;  %v673_v61 = vpop.f32.mrb[13].mxu0  ;;  %v776_v62 = vadd.f32 %v1839_v3, %v775_v59  ;;  %v777_v63 = vpop.f32.mrb[13].mxu1 }
 0x133   : > { %v674_v0 = vpop.f32.mrb[14].mxu0  ;;  %v778_v1 = vpop.f32.mrb[14].mxu1 }
 0x134   : > { %v675_v2 = vadd.f32 %v1839_v3, %v674_v0  ;;  %v676_v4 = vpop.f32.mrb[15].mxu0  ;;  %v878_v5 = vmax.f32 %v776_v62, 0.0  ;;  %v779_v6 = vadd.f32 %v1839_v3, %v778_v1  ;;  %v780_v7 = vpop.f32.mrb[15].mxu1  ;;  %v852_v8 = vmax.f32 %v672_v60, 0.0 }
 0x136   : > { %v853_v9 = vmax.f32 %v675_v2, 0.0  ;;  %v879_v10 = vmax.f32 %v779_v6, 0.0 }
 0x138   : > { %v1398_v11 = vpack.c.bf16 %v853_v9, %v852_v8  ;;  %v1463_v12 = vpack.c.bf16 %v879_v10, %v878_v5 }
 0x139   : > { %v679_v13 = vpop.f32.mrb[16].mxu0  ;;  %v783_v14 = vpop.f32.mrb[16].mxu1 }
 0x13a   : > { %1507 = vst [vmem:[%s1849_s4 + $0x18] sm:$0xff] %v1398_v11   ;;  %1520 = vst [vmem:[%s1849_s4 + $0x80] sm:$0xff] %v1463_v12   ;;  %v680_v15 = vadd.f32 %v1839_v3, %v679_v13  ;;  %v681_v16 = vpop.f32.mrb[17].mxu0  ;;  %v784_v17 = vadd.f32 %v1839_v3, %v783_v14  ;;  %v785_v18 = vpop.f32.mrb[17].mxu1 }
 0x13b   : > { %v682_v19 = vpop.f32.mrb[18].mxu0  ;;  %v786_v20 = vpop.f32.mrb[18].mxu1 }
 0x13c   : > { %v683_v21 = vadd.f32 %v1839_v3, %v682_v19  ;;  %v684_v22 = vpop.f32.mrb[19].mxu0  ;;  %v880_v23 = vmax.f32 %v784_v17, 0.0  ;;  %v787_v24 = vadd.f32 %v1839_v3, %v786_v20  ;;  %v788_v25 = vpop.f32.mrb[19].mxu1  ;;  %v854_v26 = vmax.f32 %v680_v15, 0.0 }
 0x13e   : > { %v855_v27 = vmax.f32 %v683_v21, 0.0  ;;  %v881_v28 = vmax.f32 %v787_v24, 0.0 }
 0x140   : > { %v1403_v29 = vpack.c.bf16 %v855_v27, %v854_v26  ;;  %v1468_v30 = vpack.c.bf16 %v881_v28, %v880_v23 }
 0x141   : > { %v687_v31 = vpop.f32.mrb[20].mxu0  ;;  %v791_v32 = vpop.f32.mrb[20].mxu1 }
 0x142   : > { %1508 = vst [vmem:[%s1849_s4 + $0x20] sm:$0xff] %v1403_v29   ;;  %1521 = vst [vmem:[%s1849_s4 + $0x88] sm:$0xff] %v1468_v30   ;;  %v688_v33 = vadd.f32 %v1839_v3, %v687_v31  ;;  %v689_v34 = vpop.f32.mrb[21].mxu0  ;;  %v792_v35 = vadd.f32 %v1839_v3, %v791_v32  ;;  %v793_v36 = vpop.f32.mrb[21].mxu1 }
 0x143   : > { %v690_v37 = vpop.f32.mrb[22].mxu0  ;;  %v794_v38 = vpop.f32.mrb[22].mxu1 }
 0x144   : > { %v691_v39 = vadd.f32 %v1839_v3, %v690_v37  ;;  %v692_v40 = vpop.f32.mrb[23].mxu0  ;;  %v882_v41 = vmax.f32 %v792_v35, 0.0  ;;  %v795_v42 = vadd.f32 %v1839_v3, %v794_v38  ;;  %v796_v43 = vpop.f32.mrb[23].mxu1  ;;  %v856_v44 = vmax.f32 %v688_v33, 0.0 }
 0x146   : > { %v857_v45 = vmax.f32 %v691_v39, 0.0  ;;  %v883_v46 = vmax.f32 %v795_v42, 0.0 }
 0x148   : > { %v1408_v47 = vpack.c.bf16 %v857_v45, %v856_v44  ;;  %v1473_v48 = vpack.c.bf16 %v883_v46, %v882_v41 }
 0x149   : > { %v695_v49 = vpop.f32.mrb[24].mxu0  ;;  %v799_v50 = vpop.f32.mrb[24].mxu1 }
 0x14a   : > { %1509 = vst [vmem:[%s1849_s4 + $0x28] sm:$0xff] %v1408_v47   ;;  %1522 = vst [vmem:[%s1849_s4 + $0x90] sm:$0xff] %v1473_v48   ;;  %v696_v51 = vadd.f32 %v1839_v3, %v695_v49  ;;  %v697_v52 = vpop.f32.mrb[25].mxu0  ;;  %v800_v53 = vadd.f32 %v1839_v3, %v799_v50  ;;  %v801_v54 = vpop.f32.mrb[25].mxu1 }
 0x14b   : > { %v698_v55 = vpop.f32.mrb[26].mxu0  ;;  %v802_v56 = vpop.f32.mrb[26].mxu1 }
 0x14c   : > { %v699_v57 = vadd.f32 %v1839_v3, %v698_v55  ;;  %v700_v58 = vpop.f32.mrb[27].mxu0  ;;  %v884_v59 = vmax.f32 %v800_v53, 0.0  ;;  %v803_v60 = vadd.f32 %v1839_v3, %v802_v56  ;;  %v804_v61 = vpop.f32.mrb[27].mxu1  ;;  %v858_v62 = vmax.f32 %v696_v51, 0.0 }
 0x14e   : > { %v859_v63 = vmax.f32 %v699_v57, 0.0  ;;  %v885_v0 = vmax.f32 %v803_v60, 0.0 }
 0x150   : > { %v1413_v1 = vpack.c.bf16 %v859_v63, %v858_v62  ;;  %v1478_v2 = vpack.c.bf16 %v885_v0, %v884_v59 }
 0x151   : > { %v703_v4 = vpop.f32.mrb[28].mxu0  ;;  %v807_v5 = vpop.f32.mrb[28].mxu1 }
 0x152   : > { %1510 = vst [vmem:[%s1849_s4 + $0x30] sm:$0xff] %v1413_v1   ;;  %1523 = vst [vmem:[%s1849_s4 + $0x98] sm:$0xff] %v1478_v2   ;;  %v704_v6 = vadd.f32 %v1839_v3, %v703_v4  ;;  %v705_v7 = vpop.f32.mrb[29].mxu0  ;;  %v808_v8 = vadd.f32 %v1839_v3, %v807_v5  ;;  %v809_v9 = vpop.f32.mrb[29].mxu1 }
 0x153   : > { %v706_v10 = vpop.f32.mrb[30].mxu0  ;;  %v810_v11 = vpop.f32.mrb[30].mxu1 }
 0x154   : > { %v707_v12 = vadd.f32 %v1839_v3, %v706_v10  ;;  %v708_v13 = vpop.f32.mrb[31].mxu0  ;;  %v886_v14 = vmax.f32 %v808_v8, 0.0  ;;  %v811_v15 = vadd.f32 %v1839_v3, %v810_v11  ;;  %v812_v16 = vpop.f32.mrb[31].mxu1  ;;  %v860_v17 = vmax.f32 %v704_v6, 0.0 }
 0x156   : > { %v861_v18 = vmax.f32 %v707_v12, 0.0  ;;  %v887_v19 = vmax.f32 %v811_v15, 0.0 }
 0x158   : > { %v1418_v20 = vpack.c.bf16 %v861_v18, %v860_v17  ;;  %v1483_v21 = vpack.c.bf16 %v887_v19, %v886_v14 }
 0x159   : > { %v711_v22 = vpop.f32.mrb[32].mxu0  ;;  %v815_v23 = vpop.f32.mrb[32].mxu1 }
 0x15a   : > { %1511 = vst [vmem:[%s1849_s4 + $0x38] sm:$0xff] %v1418_v20   ;;  %1524 = vst [vmem:[%s1849_s4 + $0xa0] sm:$0xff] %v1483_v21   ;;  %v712_v24 = vadd.f32 %v1839_v3, %v711_v22  ;;  %v713_v25 = vpop.f32.mrb[33].mxu0  ;;  %v816_v26 = vadd.f32 %v1839_v3, %v815_v23  ;;  %v817_v27 = vpop.f32.mrb[33].mxu1 }
 0x15b   : > { %v714_v28 = vpop.f32.mrb[34].mxu0  ;;  %v818_v29 = vpop.f32.mrb[34].mxu1 }
 0x15c   : > { %v715_v30 = vadd.f32 %v1839_v3, %v714_v28  ;;  %v716_v31 = vpop.f32.mrb[35].mxu0  ;;  %v888_v32 = vmax.f32 %v816_v26, 0.0  ;;  %v819_v33 = vadd.f32 %v1839_v3, %v818_v29  ;;  %v820_v34 = vpop.f32.mrb[35].mxu1  ;;  %v862_v35 = vmax.f32 %v712_v24, 0.0 }
 0x15e   : > { %v863_v36 = vmax.f32 %v715_v30, 0.0  ;;  %v889_v37 = vmax.f32 %v819_v33, 0.0 }
 0x160   : > { %v1423_v38 = vpack.c.bf16 %v863_v36, %v862_v35  ;;  %v1488_v39 = vpack.c.bf16 %v889_v37, %v888_v32 }
 0x161   : > { %v719_v40 = vpop.f32.mrb[36].mxu0  ;;  %v823_v41 = vpop.f32.mrb[36].mxu1 }
 0x162   : > { %1512 = vst [vmem:[%s1849_s4 + $0x40] sm:$0xff] %v1423_v38   ;;  %1525 = vst [vmem:[%s1849_s4 + $0xa8] sm:$0xff] %v1488_v39   ;;  %v720_v42 = vadd.f32 %v1839_v3, %v719_v40  ;;  %v721_v43 = vpop.f32.mrb[37].mxu0  ;;  %v824_v44 = vadd.f32 %v1839_v3, %v823_v41  ;;  %v825_v45 = vpop.f32.mrb[37].mxu1 }
 0x163   : > { %v722_v46 = vpop.f32.mrb[38].mxu0  ;;  %v826_v47 = vpop.f32.mrb[38].mxu1 }
 0x164   : > { %v723_v48 = vadd.f32 %v1839_v3, %v722_v46  ;;  %v724_v49 = vpop.f32.mrb[39].mxu0  ;;  %v890_v50 = vmax.f32 %v824_v44, 0.0  ;;  %v827_v51 = vadd.f32 %v1839_v3, %v826_v47  ;;  %v828_v52 = vpop.f32.mrb[39].mxu1  ;;  %v864_v53 = vmax.f32 %v720_v42, 0.0 }
 0x166   : > { %v865_v54 = vmax.f32 %v723_v48, 0.0  ;;  %v891_v55 = vmax.f32 %v827_v51, 0.0 }
 0x168   : > { %v1428_v56 = vpack.c.bf16 %v865_v54, %v864_v53  ;;  %v1493_v57 = vpack.c.bf16 %v891_v55, %v890_v50 }
 0x169   : > { %v727_v58 = vpop.f32.mrb[40].mxu0  ;;  %v831_v59 = vpop.f32.mrb[40].mxu1 }
 0x16a   : > { %1513 = vst [vmem:[%s1849_s4 + $0x48] sm:$0xff] %v1428_v56   ;;  %1526 = vst [vmem:[%s1849_s4 + $0xb0] sm:$0xff] %v1493_v57   ;;  %v728_v60 = vadd.f32 %v1839_v3, %v727_v58  ;;  %v729_v61 = vpop.f32.mrb[41].mxu0  ;;  %v832_v62 = vadd.f32 %v1839_v3, %v831_v59  ;;  %v833_v63 = vpop.f32.mrb[41].mxu1 }
 0x16b   : > { %v730_v0 = vpop.f32.mrb[42].mxu0  ;;  %v834_v1 = vpop.f32.mrb[42].mxu1 }
 0x16c   : > { %v731_v2 = vadd.f32 %v1839_v3, %v730_v0  ;;  %v732_v4 = vpop.f32.mrb[43].mxu0  ;;  %v892_v5 = vmax.f32 %v832_v62, 0.0  ;;  %v835_v6 = vadd.f32 %v1839_v3, %v834_v1  ;;  %v836_v7 = vpop.f32.mrb[43].mxu1  ;;  %v866_v8 = vmax.f32 %v728_v60, 0.0 }
 0x16e   : > { %v867_v9 = vmax.f32 %v731_v2, 0.0  ;;  %v893_v10 = vmax.f32 %v835_v6, 0.0 }
 0x170   : > { %v1433_v11 = vpack.c.bf16 %v867_v9, %v866_v8  ;;  %v1498_v12 = vpack.c.bf16 %v893_v10, %v892_v5 }
 0x171   : > { %v735_v13 = vpop.f32.mrb[44].mxu0  ;;  %v839_v14 = vpop.f32.mrb[44].mxu1 }
 0x172   : > { %1514 = vst [vmem:[%s1849_s4 + $0x50] sm:$0xff] %v1433_v11   ;;  %1527 = vst [vmem:[%s1849_s4 + $0xb8] sm:$0xff] %v1498_v12   ;;  %v736_v15 = vadd.f32 %v1839_v3, %v735_v13  ;;  %v737_v16 = vpop.f32.mrb[45].mxu0  ;;  %v840_v17 = vadd.f32 %v1839_v3, %v839_v14  ;;  %v841_v18 = vpop.f32.mrb[45].mxu1 }
 0x173   : > { %v738_v19 = vpop.f32.mrb[46].mxu0  ;;  %v842_v20 = vpop.f32.mrb[46].mxu1 }
 0x174   : > { %v739_v21 = vadd.f32 %v1839_v3, %v738_v19  ;;  %v740_v22 = vpop.f32.mrb[47].mxu0  ;;  %v894_v23 = vmax.f32 %v840_v17, 0.0  ;;  %v843_v24 = vadd.f32 %v1839_v3, %v842_v20  ;;  %v844_v25 = vpop.f32.mrb[47].mxu1  ;;  %v868_v26 = vmax.f32 %v736_v15, 0.0 }
 0x176   : > { %v869_v27 = vmax.f32 %v739_v21, 0.0  ;;  %v895_v28 = vmax.f32 %v843_v24, 0.0 }
 0x178   : > { %v1438_v29 = vpack.c.bf16 %v869_v27, %v868_v26  ;;  %v1503_v30 = vpack.c.bf16 %v895_v28, %v894_v23 }
 0x179   : > { %v743_v31 = vpop.f32.mrb[48].mxu0 }
 0x17a   : > { %1515 = vst [vmem:[%s1849_s4 + $0x58] sm:$0xff] %v1438_v29   ;;  %1528 = vst [vmem:[%s1849_s4 + $0xc0] sm:$0xff] %v1503_v30   ;;  %v744_v32 = vadd.f32 %v1839_v3, %v743_v31  ;;  %v745_v33 = vpop.f32.mrb[49].mxu0 }
 0x17b   : > { %v746_v34 = vpop.f32.mrb[50].mxu0 }
 0x17c   : > { %v747_v35 = vadd.f32 %v1839_v3, %v746_v34  ;;  %v748_v36 = vpop.f32.mrb[51].mxu0  ;;  %v870_v37 = vmax.f32 %v744_v32, 0.0 }
 0x17e   : > { %v871_v38 = vmax.f32 %v747_v35, 0.0 }
 0x180   : > { %v1443_v39 = vpack.c.bf16 %v871_v38, %v870_v37 }
 0x182   : > { %1516 = vst [vmem:[%s1849_s4 + $0x60] sm:$0xff] %v1443_v39  }
 0x183 PF: > { %s13_s12 = sadd.s32 1, %s1667_s12  }
 0x184   : > { %p10_p4 = scmp.ge.s32.totalorder %s13_s12, 4  }
 0x186   :  { %12 = sbr.rel (!%p10_p4) target bundleno = 1 (0x1), region = 62 }

// kernel: mugicha_forward.5
= control target key start
LH: loop header
LB: loop body
LE: loop exit
PB: predicated region body
PF: predicated region fallthrough
CT: control target
= control target key end

     0   :  { %s1210_s12 = smov 0   ;;  %s1380_s0 = inlined_call_operand.vmem [shape: bf16[192,512], index: 0, kind: input, shape index: {}]   ;;  %s1381_s1 = inlined_call_operand.vmem [shape: bf16[512,128], index: 1, kind: input, shape index: {}]   ;;  %s1382_s2 = inlined_call_operand.vmem [shape: f32[1,128], index: 2, kind: input, shape index: {}]   ;;  %s1383_s3 = inlined_call_operand.vmem [shape: bf16[192,128], index: 3, kind: output, shape index: {}]  }
   0x1 LB: > { %s875_s13 = sadd.s32 4294967295, %s1188_s12   ;;  %p879_p0 = scmp.ge.s32.totalorder %s1188_s12, 1  ;;  %s1188_s12 = sphi %s1210_s12, %s13_s12  }
   0x2   : > { %p139_p1 = scmp.lt.s32.totalorder %s1188_s12, 3 }
   0x4   : > { %p140_p2 = pnand %p879_p0, %p139_p1 }
   0x5   : > { %v1114_v0 = vld [vmem:[%s1381_s1 + $0x40] sm:$0xff] (!%p140_p2)   ;;  %v1118_v4 = vld [vmem:[%s1381_s1 + $0x48] sm:$0xff] (!%p140_p2)   ;;  %v1122_v8 = vld [vmem:[%s1381_s1 + $0x50] sm:$0xff] (!%p140_p2)   ;;  %s164_s19 = smul.u32 (!%p140_p2), 12, %s875_s13 }
   0x6   : > { %143 = sbr.rel (%p140_p2) target bundleno = 305 (0x131), region = 32  ;;  %v1115_v1 = vld [vmem:[%s1381_s1 + $0xc0] sm:$0xff] (!%p140_p2)   ;;  %1002 = vmatprep.subr.bf16.mxu0 (!%p140_p2), %v1114_v0  ;;  %v1119_v5 = vld [vmem:[%s1381_s1 + $0xc8] sm:$0xff] (!%p140_p2)   ;;  %v1123_v9 = vld [vmem:[%s1381_s1 + $0xd0] sm:$0xff] (!%p140_p2)  }
   0x7   : > { %v1116_v2 = vld [vmem:[%s1381_s1] sm:$0xff] (!%p140_p2)   ;;  %1054 = vmatprep.subr.bf16.mxu1 (!%p140_p2), %v1115_v1  ;;  %v1120_v6 = vld [vmem:[%s1381_s1 + $0x8] sm:$0xff] (!%p140_p2)   ;;  %v1124_v10 = vld [vmem:[%s1381_s1 + $0x10] sm:$0xff] (!%p140_p2)   ;;  %p165_p3 = scmp.lt.s32.totalorder (!%p140_p2), %s164_s19, 23 }
   0x8   : > { %v1117_v3 = vld [vmem:[%s1381_s1 + $0x80] sm:$0xff] (!%p140_p2)   ;;  %1003 = vmatpush3.bf16.msra.mxu0 (!%p140_p2), %v1116_v2  ;;  %v1121_v7 = vld [vmem:[%s1381_s1 + $0x88] sm:$0xff] (!%p140_p2)   ;;  %v1125_v11 = vld [vmem:[%s1381_s1 + $0x90] sm:$0xff] (!%p140_p2)  }
   0x9   : > { %1055 = vmatpush3.bf16.msra.mxu1 (!%p140_p2), %v1117_v3  ;;  %1004 = vmatprep.subr.bf16.mxu0 (!%p140_p2), %v1118_v4  ;;  %v1126_v12 = vld [vmem:[%s1381_s1 + $0x58] sm:$0xff] (!%p140_p2)   ;;  %v1130_v16 = vld [vmem:[%s1381_s1 + $0x60] sm:$0xff] (!%p140_p2)   ;;  %v1134_v20 = vld [vmem:[%s1381_s1 + $0x68] sm:$0xff] (!%p140_p2)  }
   0xa   : > { %1056 = vmatprep.subr.bf16.mxu1 (!%p140_p2), %v1119_v5  ;;  %v1127_v13 = vld [vmem:[%s1381_s1 + $0xd8] sm:$0xff] (!%p140_p2)   ;;  %v1131_v17 = vld [vmem:[%s1381_s1 + $0xe0] sm:$0xff] (!%p140_p2)   ;;  %v1135_v21 = vld [vmem:[%s1381_s1 + $0xe8] sm:$0xff] (!%p140_p2)  }
   0xb   : > { %v1128_v14 = vld [vmem:[%s1381_s1 + $0x18] sm:$0xff] (!%p140_p2)   ;;  %v1132_v18 = vld [vmem:[%s1381_s1 + $0x20] sm:$0xff] (!%p140_p2)   ;;  %v1136_v22 = vld [vmem:[%s1381_s1 + $0x28] sm:$0xff] (!%p140_p2)  }
   0xc   : > { %1005 = vmatpush3.bf16.msra.mxu0 (!%p140_p2), %v1120_v6  ;;  %v1129_v15 = vld [vmem:[%s1381_s1 + $0x98] sm:$0xff] (!%p140_p2)   ;;  %v1133_v19 = vld [vmem:[%s1381_s1 + $0xa0] sm:$0xff] (!%p140_p2)   ;;  %v1137_v23 = vld [vmem:[%s1381_s1 + $0xa8] sm:$0xff] (!%p140_p2)  }
   0xd   : > { %1057 = vmatpush3.bf16.msra.mxu1 %v1121_v7  ;;  %1006 = vmatprep.subr.bf16.mxu0 %v1122_v8  ;;  %s1385_s19 = smov (!%p165_p3, %s164_s19), 23  ;;  %v1138_v24 = vld [vmem:[%s1381_s1 + $0x70] sm:$0xff]   ;;  %v1142_v28 = vld [vmem:[%s1381_s1 + $0x78] sm:$0xff]   ;;  %v1351_v58 = vld [vmem:[%s1382_s2] ss:$0 sm:$0xff] }
   0xe   : > { %1058 = vmatprep.subr.bf16.mxu1 %v1123_v9  ;;  %v1139_v25 = vld [vmem:[%s1381_s1 + $0xf0] sm:$0xff]   ;;  %s954_s18 = sshll.u32 %s1385_s19, 4  ;;  %v1143_v29 = vld [vmem:[%s1381_s1 + $0xf8] sm:$0xff]   ;;  %s882_s7 = sshll.u32 %s1385_s19, 2 }
   0xf   : > { %v1140_v26 = vld [vmem:[%s1381_s1 + $0x30] sm:$0xff]   ;;  %s1316_s13 = scalar_lea.vmem %s1380_s0, %s954_s18  ;;  %v1144_v30 = vld [vmem:[%s1381_s1 + $0x38] sm:$0xff]   ;;  %s1359_s10 = scalar_lea.vmem %s1383_s3, %s882_s7 }
  0x10   : > { %1007 = vmatpush3.bf16.msra.mxu0 %v1124_v10  ;;  %v1141_v27 = vld [vmem:[%s1381_s1 + $0xb0] sm:$0xff]   ;;  %v1145_v31 = vld [vmem:[%s1381_s1 + $0xb8] sm:$0xff]  }
  0x11   : > { %1059 = vmatpush3.bf16.msra.mxu1 %v1125_v11  ;;  %1008 = vmatprep.subr.bf16.mxu0 %v1126_v12  ;;  %v1146_v32 = vld [vmem:[%s1316_s13] ss:$16 sps:$4 sm:$0xff]   ;;  %v1148_v33 = vld [vmem:[%s1316_s13 + $0x4] ss:$16 sps:$4 sm:$0xff]   ;;  %v1149_v34 = vld [vmem:[%s1316_s13 + $0x8] ss:$16 sps:$4 sm:$0xff]  }
  0x12   : > { %1060 = vmatprep.subr.bf16.mxu1 %v1127_v13  ;;  %v1151_v35 = vld [vmem:[%s1316_s13 + $0xc] ss:$16 sps:$4 sm:$0xff]   ;;  %617 = vmatprep.mubr.bf16.mxu0 %v1148_v33  ;;  %v1152_v36 = vld [vmem:[%s1316_s13 + $0x24] ss:$16 sps:$4 sm:$0xff]   ;;  %v1156_v38 = vld [vmem:[%s1316_s13 + $0x20] ss:$16 sps:$4 sm:$0xff]  }
  0x13   : > { %698 = vmatprep.mubr.bf16.mxu1 %v1151_v35  ;;  %v1154_v37 = vld [vmem:[%s1316_s13 + $0x2c] ss:$16 sps:$4 sm:$0xff]   ;;  %v1157_v39 = vld [vmem:[%s1316_s13 + $0x28] ss:$16 sps:$4 sm:$0xff]   ;;  %v1158_v40 = vld [vmem:[%s1316_s13 + $0x44] ss:$16 sps:$4 sm:$0xff]  }
  0x14   : > { %1009 = vmatpush3.bf16.msra.mxu0 %v1128_v14  ;;  %v1160_v41 = vld [vmem:[%s1316_s13 + $0x4c] ss:$16 sps:$4 sm:$0xff]   ;;  %v1162_v42 = vld [vmem:[%s1316_s13 + $0x40] ss:$16 sps:$4 sm:$0xff]   ;;  %v1163_v43 = vld [vmem:[%s1316_s13 + $0x48] ss:$16 sps:$4 sm:$0xff]  }
  0x15   : > { %1061 = vmatpush3.bf16.msra.mxu1 %v1129_v15  ;;  %1010 = vmatprep.subr.bf16.mxu0 %v1130_v16  ;;  %v1164_v44 = vld [vmem:[%s1316_s13 + $0x64] ss:$16 sps:$4 sm:$0xff]   ;;  %v1166_v45 = vld [vmem:[%s1316_s13 + $0x6c] ss:$16 sps:$4 sm:$0xff]   ;;  %v1168_v46 = vld [vmem:[%s1316_s13 + $0x60] ss:$16 sps:$4 sm:$0xff]  }
  0x16   : > { %1062 = vmatprep.subr.bf16.mxu1 %v1131_v17  ;;  %v1169_v47 = vld [vmem:[%s1316_s13 + $0x68] ss:$16 sps:$4 sm:$0xff]   ;;  %v1170_v48 = vld [vmem:[%s1316_s13 + $0x84] ss:$16 sps:$4 sm:$0xff]   ;;  %v1172_v49 = vld [vmem:[%s1316_s13 + $0x8c] ss:$16 sps:$4 sm:$0xff]  }
  0x17   : > { %v1174_v50 = vld [vmem:[%s1316_s13 + $0x80] ss:$16 sps:$4 sm:$0xff]   ;;  %v1175_v51 = vld [vmem:[%s1316_s13 + $0x88] ss:$16 sps:$4 sm:$0xff]   ;;  %v1176_v52 = vld [vmem:[%s1316_s13 + $0xa4] ss:$16 sps:$4 sm:$0xff]  }
  0x18   : > { %1011 = vmatpush3.bf16.msra.mxu0 %v1132_v18  ;;  %v1178_v53 = vld [vmem:[%s1316_s13 + $0xac] ss:$16 sps:$4 sm:$0xff]   ;;  %v1180_v54 = vld [vmem:[%s1316_s13 + $0xa0] ss:$16 sps:$4 sm:$0xff]   ;;  %v1181_v55 = vld [vmem:[%s1316_s13 + $0xa8] ss:$16 sps:$4 sm:$0xff]  }
  0x19   : > { %1063 = vmatpush3.bf16.msra.mxu1 %v1133_v19  ;;  %1012 = vmatprep.subr.bf16.mxu0 %v1134_v20 }
  0x1a   : > { %1064 = vmatprep.subr.bf16.mxu1 %v1135_v21 }
  0x1c   : > { %1013 = vmatpush3.bf16.msra.mxu0 %v1136_v22 }
  0x1d   : > { %1065 = vmatpush3.bf16.msra.mxu1 %v1137_v23  ;;  %1014 = vmatprep.subr.bf16.mxu0 %v1138_v24 }
  0x1e   : > { %1066 = vmatprep.subr.bf16.mxu1 %v1139_v25 }
  0x20   : > { %1015 = vmatpush3.bf16.msra.mxu0 %v1140_v26 }
  0x21   : > { %1067 = vmatpush3.bf16.msra.mxu1 %v1141_v27  ;;  %1016 = vmatprep.subr.bf16.mxu0 %v1142_v28 }
  0x22   : > { %1068 = vmatprep.subr.bf16.mxu1 %v1143_v29 }
  0x24   : > { %1017 = vmatpush3.bf16.msra.mxu0 %v1144_v30 }
  0x25   : > { %1069 = vmatpush3.bf16.msra.mxu1 %v1145_v31 }
  0x27   : > { %618 = vmatmul.mubr.bf16.vlgmr.msra.gmra.mrb[0].mxu0 %v1146_v32 }
  0x28   : > { %699 = vmatmul.mubr.bf16.vlgmr.msra.gmra.mrb[0].mxu1 %v1149_v34  ;;  %625 = vmatprep.mubr.bf16.mxu0 %v1152_v36 }
  0x29   : > { %706 = vmatprep.mubr.bf16.mxu1 %v1154_v37 }
  0x2f   : > { %626 = vmatmul.mubr.bf16.gmra.mrb[4].mxu0 %v1156_v38 }
  0x30   : > { %707 = vmatmul.mubr.bf16.gmra.mrb[4].mxu1 %v1157_v39  ;;  %633 = vmatprep.mubr.bf16.mxu0 %v1158_v40 }
  0x31   : > { %714 = vmatprep.mubr.bf16.mxu1 %v1160_v41 }
  0x37   : > { %634 = vmatmul.mubr.bf16.gmra.mrb[8].mxu0 %v1162_v42 }
  0x38   : > { %715 = vmatmul.mubr.bf16.gmra.mrb[8].mxu1 %v1163_v43  ;;  %641 = vmatprep.mubr.bf16.mxu0 %v1164_v44 }
  0x39   : > { %722 = vmatprep.mubr.bf16.mxu1 %v1166_v45 }
  0x3f   : > { %642 = vmatmul.mubr.bf16.gmra.mrb[12].mxu0 %v1168_v46 }
  0x40   : > { %723 = vmatmul.mubr.bf16.gmra.mrb[12].mxu1 %v1169_v47  ;;  %649 = vmatprep.mubr.bf16.mxu0 %v1170_v48 }
  0x41   : > { %730 = vmatprep.mubr.bf16.mxu1 %v1172_v49 }
  0x47   : > { %650 = vmatmul.mubr.bf16.gmra.mrb[16].mxu0 %v1174_v50 }
  0x48   : > { %731 = vmatmul.mubr.bf16.gmra.mrb[16].mxu1 %v1175_v51  ;;  %657 = vmatprep.mubr.bf16.mxu0 %v1176_v52 }
  0x49   : > { %738 = vmatprep.mubr.bf16.mxu1 %v1178_v53 }
  0x4f   : > { %658 = vmatmul.mubr.bf16.gmra.mrb[20].mxu0 %v1180_v54 }
  0x50   : > { %739 = vmatmul.mubr.bf16.gmra.mrb[20].mxu1 %v1181_v55 }
  0xfa   : > { %v1018_v56 = vpop.f32.mrb[0].mxu0 }
  0xfb   : > { %v1070_v57 = vpop.f32.mrb[0].mxu1  ;;  %v1019_v59 = vpop.f32.mrb[1].mxu0 }
  0xfc   : > { %v1020_v60 = vadd.f32 %v1019_v59, %v1018_v56  ;;  %v1071_v61 = vpop.f32.mrb[1].mxu1  ;;  %v1021_v62 = vpop.f32.mrb[2].mxu0 }
  0xfd   : > { %v1072_v63 = vadd.f32 %v1071_v61, %v1070_v57  ;;  %v1073_v0 = vpop.f32.mrb[2].mxu1  ;;  %v1022_v1 = vpop.f32.mrb[3].mxu0 }
  0xfe   : > { %v620_v2 = vadd.f32 %v1020_v60, %v1351_v58  ;;  %v1023_v3 = vadd.f32 %v1022_v1, %v1021_v62  ;;  %v1074_v4 = vpop.f32.mrb[3].mxu1 }
  0xff   : > { %v1075_v5 = vadd.f32 %v1074_v4, %v1073_v0 }
 0x100   : > { %v701_v6 = vadd.f32 %v1072_v63, %v620_v2  ;;  %v623_v7 = vadd.f32 %v1023_v3, %v1351_v58 }
 0x102   : > { %v704_v8 = vadd.f32 %v1075_v5, %v623_v7  ;;  %v1024_v9 = vpop.f32.mrb[4].mxu0  ;;  %v747_v12 = vmax.f32 %v701_v6, 0.0 }
 0x103   : > { %v1076_v10 = vpop.f32.mrb[4].mxu1  ;;  %v1025_v11 = vpop.f32.mrb[5].mxu0 }
 0x104   : > { %v748_v13 = vmax.f32 %v704_v8, 0.0  ;;  %v1026_v14 = vadd.f32 %v1025_v11, %v1024_v9  ;;  %v1077_v15 = vpop.f32.mrb[5].mxu1  ;;  %v1027_v16 = vpop.f32.mrb[6].mxu0 }
 0x105   : > { %v1078_v17 = vadd.f32 %v1077_v15, %v1076_v10  ;;  %v1079_v18 = vpop.f32.mrb[6].mxu1  ;;  %v1028_v19 = vpop.f32.mrb[7].mxu0 }
 0x106   : > { %v970_v20 = vpack.c.bf16 %v748_v13, %v747_v12  ;;  %v628_v21 = vadd.f32 %v1026_v14, %v1351_v58  ;;  %v1029_v22 = vadd.f32 %v1028_v19, %v1027_v16  ;;  %v1080_v23 = vpop.f32.mrb[7].mxu1 }
 0x107   : > { %v1081_v24 = vadd.f32 %v1080_v23, %v1079_v18 }
 0x108   : > { %971 = vst [vmem:[%s1359_s10] sm:$0xff] %v970_v20   ;;  %v709_v25 = vadd.f32 %v1078_v17, %v628_v21  ;;  %v631_v26 = vadd.f32 %v1029_v22, %v1351_v58 }
 0x10a   : > { %v712_v27 = vadd.f32 %v1081_v24, %v631_v26  ;;  %v1030_v28 = vpop.f32.mrb[8].mxu0  ;;  %v749_v31 = vmax.f32 %v709_v25, 0.0 }
 0x10b   : > { %v1082_v29 = vpop.f32.mrb[8].mxu1  ;;  %v1031_v30 = vpop.f32.mrb[9].mxu0 }
 0x10c   : > { %v750_v32 = vmax.f32 %v712_v27, 0.0  ;;  %v1032_v33 = vadd.f32 %v1031_v30, %v1030_v28  ;;  %v1083_v34 = vpop.f32.mrb[9].mxu1  ;;  %v1033_v35 = vpop.f32.mrb[10].mxu0 }
 0x10d   : > { %v1084_v36 = vadd.f32 %v1083_v34, %v1082_v29  ;;  %v1085_v37 = vpop.f32.mrb[10].mxu1  ;;  %v1034_v38 = vpop.f32.mrb[11].mxu0 }
 0x10e   : > { %v975_v39 = vpack.c.bf16 %v750_v32, %v749_v31  ;;  %v636_v40 = vadd.f32 %v1032_v33, %v1351_v58  ;;  %v1035_v41 = vadd.f32 %v1034_v38, %v1033_v35  ;;  %v1086_v42 = vpop.f32.mrb[11].mxu1 }
 0x10f   : > { %v1087_v43 = vadd.f32 %v1086_v42, %v1085_v37 }
 0x110   : > { %997 = vst [vmem:[%s1359_s10 + $0x8] sm:$0xff] %v975_v39   ;;  %v717_v44 = vadd.f32 %v1084_v36, %v636_v40  ;;  %v639_v45 = vadd.f32 %v1035_v41, %v1351_v58 }
 0x112   : > { %v720_v46 = vadd.f32 %v1087_v43, %v639_v45  ;;  %v1036_v47 = vpop.f32.mrb[12].mxu0  ;;  %v751_v50 = vmax.f32 %v717_v44, 0.0 }
 0x113   : > { %v1088_v48 = vpop.f32.mrb[12].mxu1  ;;  %v1037_v49 = vpop.f32.mrb[13].mxu0 }
 0x114   : > { %v752_v51 = vmax.f32 %v720_v46, 0.0  ;;  %v1038_v52 = vadd.f32 %v1037_v49, %v1036_v47  ;;  %v1089_v53 = vpop.f32.mrb[13].mxu1  ;;  %v1039_v54 = vpop.f32.mrb[14].mxu0 }
 0x115   : > { %v1090_v55 = vadd.f32 %v1089_v53, %v1088_v48  ;;  %v1091_v56 = vpop.f32.mrb[14].mxu1  ;;  %v1040_v57 = vpop.f32.mrb[15].mxu0 }
 0x116   : > { %v980_v59 = vpack.c.bf16 %v752_v51, %v751_v50  ;;  %v644_v60 = vadd.f32 %v1038_v52, %v1351_v58  ;;  %v1041_v61 = vadd.f32 %v1040_v57, %v1039_v54  ;;  %v1092_v62 = vpop.f32.mrb[15].mxu1 }
 0x117   : > { %v1093_v63 = vadd.f32 %v1092_v62, %v1091_v56 }
 0x118   : > { %998 = vst [vmem:[%s1359_s10 + $0x10] sm:$0xff] %v980_v59   ;;  %v725_v0 = vadd.f32 %v1090_v55, %v644_v60  ;;  %v647_v1 = vadd.f32 %v1041_v61, %v1351_v58 }
 0x11a   : > { %v728_v2 = vadd.f32 %v1093_v63, %v647_v1  ;;  %v1042_v3 = vpop.f32.mrb[16].mxu0  ;;  %v753_v6 = vmax.f32 %v725_v0, 0.0 }
 0x11b   : > { %v1094_v4 = vpop.f32.mrb[16].mxu1  ;;  %v1043_v5 = vpop.f32.mrb[17].mxu0 }
 0x11c   : > { %v754_v7 = vmax.f32 %v728_v2, 0.0  ;;  %v1044_v8 = vadd.f32 %v1043_v5, %v1042_v3  ;;  %v1095_v9 = vpop.f32.mrb[17].mxu1  ;;  %v1045_v10 = vpop.f32.mrb[18].mxu0 }
 0x11d   : > { %v1096_v11 = vadd.f32 %v1095_v9, %v1094_v4  ;;  %v1097_v12 = vpop.f32.mrb[18].mxu1  ;;  %v1046_v13 = vpop.f32.mrb[19].mxu0 }
 0x11e   : > { %v985_v14 = vpack.c.bf16 %v754_v7, %v753_v6  ;;  %v652_v15 = vadd.f32 %v1044_v8, %v1351_v58  ;;  %v1047_v16 = vadd.f32 %v1046_v13, %v1045_v10  ;;  %v1098_v17 = vpop.f32.mrb[19].mxu1 }
 0x11f   : > { %v1099_v18 = vadd.f32 %v1098_v17, %v1097_v12 }
 0x120   : > { %999 = vst [vmem:[%s1359_s10 + $0x18] sm:$0xff] %v985_v14   ;;  %v733_v19 = vadd.f32 %v1096_v11, %v652_v15  ;;  %v655_v20 = vadd.f32 %v1047_v16, %v1351_v58 }
 0x122   : > { %v736_v21 = vadd.f32 %v1099_v18, %v655_v20  ;;  %v1048_v22 = vpop.f32.mrb[20].mxu0  ;;  %v755_v25 = vmax.f32 %v733_v19, 0.0 }
 0x123   : > { %v1100_v23 = vpop.f32.mrb[20].mxu1  ;;  %v1049_v24 = vpop.f32.mrb[21].mxu0 }
 0x124   : > { %v756_v26 = vmax.f32 %v736_v21, 0.0  ;;  %v1050_v27 = vadd.f32 %v1049_v24, %v1048_v22  ;;  %v1101_v28 = vpop.f32.mrb[21].mxu1  ;;  %v1051_v29 = vpop.f32.mrb[22].mxu0 }
 0x125   : > { %v1102_v30 = vadd.f32 %v1101_v28, %v1100_v23  ;;  %v1103_v31 = vpop.f32.mrb[22].mxu1  ;;  %v1052_v32 = vpop.f32.mrb[23].mxu0 }
 0x126   : > { %v990_v33 = vpack.c.bf16 %v756_v26, %v755_v25  ;;  %v660_v34 = vadd.f32 %v1050_v27, %v1351_v58  ;;  %v1053_v35 = vadd.f32 %v1052_v32, %v1051_v29  ;;  %v1104_v36 = vpop.f32.mrb[23].mxu1 }
 0x127   : > { %v1105_v37 = vadd.f32 %v1104_v36, %v1103_v31 }
 0x128   : > { %1000 = vst [vmem:[%s1359_s10 + $0x20] sm:$0xff] %v990_v33   ;;  %v741_v38 = vadd.f32 %v1102_v30, %v660_v34  ;;  %v663_v39 = vadd.f32 %v1053_v35, %v1351_v58 }
 0x12a   : > { %v744_v40 = vadd.f32 %v1105_v37, %v663_v39  ;;  %v757_v41 = vmax.f32 %v741_v38, 0.0 }
 0x12c   : > { %v758_v42 = vmax.f32 %v744_v40, 0.0 }
 0x12e   : > { %v995_v43 = vpack.c.bf16 %v758_v42, %v757_v41 }
 0x130   : > { %1001 = vst [vmem:[%s1359_s10 + $0x28] sm:$0xff] %v995_v43  }
 0x131 PF: > { %s13_s12 = sadd.s32 1, %s1188_s12  }
 0x132   : > { %p10_p4 = scmp.ge.s32.totalorder %s13_s12, 4  }
 0x134   :  { %12 = sbr.rel (!%p10_p4) target bundleno = 1 (0x1), region = 62 }

// kernel: mugicha_forward.6
= control target key start
LH: loop header
LB: loop body
LE: loop exit
PB: predicated region body
PF: predicated region fallthrough
CT: control target
= control target key end

     0   :  { %s1280_s12 = smov 0   ;;  %s1448_s0 = inlined_call_operand.vmem [shape: bf16[128,640], index: 0, kind: input, shape index: {}]   ;;  %s1449_s1 = inlined_call_operand.vmem [shape: bf16[640,128], index: 1, kind: input, shape index: {}]   ;;  %s1450_s2 = inlined_call_operand.vmem [shape: f32[1,128], index: 2, kind: input, shape index: {}]   ;;  %s1451_s3 = inlined_call_operand.vmem [shape: bf16[128,128], index: 3, kind: output, shape index: {}]  }
   0x1 LB: > { %s932_s13 = sadd.s32 4294967295, %s1258_s12   ;;  %p936_p0 = scmp.ge.s32.totalorder %s1258_s12, 1  ;;  %s1258_s12 = sphi %s1280_s12, %s13_s12  }
   0x2   : > { %p139_p1 = scmp.lt.s32.totalorder %s1258_s12, 3 }
   0x4   : > { %p140_p2 = pnand %p936_p0, %p139_p1 }
   0x5   : > { %v1184_v0 = vld [vmem:[%s1449_s1 + $0x40] sm:$0xff] (!%p140_p2)   ;;  %v1188_v4 = vld [vmem:[%s1449_s1 + $0x48] sm:$0xff] (!%p140_p2)   ;;  %v1192_v8 = vld [vmem:[%s1449_s1 + $0x50] sm:$0xff] (!%p140_p2)   ;;  %s937_s19 = sshll.u32 (!%p140_p2), %s932_s13, 3 }
   0x6   : > { %143 = sbr.rel (%p140_p2) target bundleno = 295 (0x127), region = 32  ;;  %v1185_v1 = vld [vmem:[%s1449_s1 + $0xc0] sm:$0xff] (!%p140_p2)   ;;  %1043 = vmatprep.subr.bf16.mxu0 (!%p140_p2), %v1184_v0  ;;  %v1189_v5 = vld [vmem:[%s1449_s1 + $0xc8] sm:$0xff] (!%p140_p2)   ;;  %v1193_v9 = vld [vmem:[%s1449_s1 + $0xd0] sm:$0xff] (!%p140_p2)   ;;  %p165_p3 = scmp.lt.s32.totalorder (!%p140_p2), %s937_s19, 15 }
   0x7   : > { %v1186_v2 = vld [vmem:[%s1449_s1] sm:$0xff] (!%p140_p2)   ;;  %1083 = vmatprep.subr.bf16.mxu1 (!%p140_p2), %v1185_v1  ;;  %v1190_v6 = vld [vmem:[%s1449_s1 + $0x8] sm:$0xff] (!%p140_p2)   ;;  %v1194_v10 = vld [vmem:[%s1449_s1 + $0x10] sm:$0xff] (!%p140_p2)  }
   0x8   : > { %v1187_v3 = vld [vmem:[%s1449_s1 + $0x80] sm:$0xff] (!%p140_p2)   ;;  %1044 = vmatpush3.bf16.msra.mxu0 (!%p140_p2), %v1186_v2  ;;  %v1191_v7 = vld [vmem:[%s1449_s1 + $0x88] sm:$0xff] (!%p140_p2)   ;;  %v1195_v11 = vld [vmem:[%s1449_s1 + $0x90] sm:$0xff] (!%p140_p2)  }
   0x9   : > { %1084 = vmatpush3.bf16.msra.mxu1 (!%p140_p2), %v1187_v3  ;;  %1045 = vmatprep.subr.bf16.mxu0 (!%p140_p2), %v1188_v4  ;;  %v1196_v12 = vld [vmem:[%s1449_s1 + $0x58] sm:$0xff] (!%p140_p2)   ;;  %v1200_v16 = vld [vmem:[%s1449_s1 + $0x60] sm:$0xff] (!%p140_p2)   ;;  %v1204_v20 = vld [vmem:[%s1449_s1 + $0x68] sm:$0xff] (!%p140_p2)  }
   0xa   : > { %1085 = vmatprep.subr.bf16.mxu1 (!%p140_p2), %v1189_v5  ;;  %v1197_v13 = vld [vmem:[%s1449_s1 + $0xd8] sm:$0xff] (!%p140_p2)   ;;  %v1201_v17 = vld [vmem:[%s1449_s1 + $0xe0] sm:$0xff] (!%p140_p2)   ;;  %v1205_v21 = vld [vmem:[%s1449_s1 + $0xe8] sm:$0xff] (!%p140_p2)  }
   0xb   : > { %v1198_v14 = vld [vmem:[%s1449_s1 + $0x18] sm:$0xff] (!%p140_p2)   ;;  %v1202_v18 = vld [vmem:[%s1449_s1 + $0x20] sm:$0xff] (!%p140_p2)   ;;  %v1206_v22 = vld [vmem:[%s1449_s1 + $0x28] sm:$0xff] (!%p140_p2)  }
   0xc   : > { %1046 = vmatpush3.bf16.msra.mxu0 (!%p140_p2), %v1190_v6  ;;  %v1199_v15 = vld [vmem:[%s1449_s1 + $0x98] sm:$0xff] (!%p140_p2)   ;;  %v1203_v19 = vld [vmem:[%s1449_s1 + $0xa0] sm:$0xff] (!%p140_p2)   ;;  %v1207_v23 = vld [vmem:[%s1449_s1 + $0xa8] sm:$0xff] (!%p140_p2)  }
   0xd   : > { %1086 = vmatpush3.bf16.msra.mxu1 %v1191_v7  ;;  %1047 = vmatprep.subr.bf16.mxu0 %v1192_v8  ;;  %s1453_s19 = smov (!%p165_p3, %s937_s19), 15  ;;  %v1208_v24 = vld [vmem:[%s1449_s1 + $0x70] sm:$0xff]   ;;  %v1212_v28 = vld [vmem:[%s1449_s1 + $0x78] sm:$0xff]   ;;  %v1222_v36 = vld [vmem:[%s1449_s1 + $0x100] sm:$0xff]  }
   0xe   : > { %1087 = vmatprep.subr.bf16.mxu1 %v1193_v9  ;;  %v1209_v25 = vld [vmem:[%s1449_s1 + $0xf0] sm:$0xff]   ;;  %s1175_s16 = smul.u32 20, %s1453_s19  ;;  %v1213_v29 = vld [vmem:[%s1449_s1 + $0xf8] sm:$0xff]   ;;  %v1223_v37 = vld [vmem:[%s1449_s1 + $0x108] sm:$0xff]   ;;  %s940_s26 = sshll.u32 %s1453_s19, 2 }
   0xf   : > { %v1210_v26 = vld [vmem:[%s1449_s1 + $0x30] sm:$0xff]   ;;  %v1214_v30 = vld [vmem:[%s1449_s1 + $0x38] sm:$0xff]   ;;  %v1238_v46 = vld [vmem:[%s1449_s1 + $0x120] sm:$0xff]   ;;  %s175_s28 = scalar_lea.vmem %s1451_s3, %s940_s26 }
  0x10   : > { %1048 = vmatpush3.bf16.msra.mxu0 %v1194_v10  ;;  %v1211_v27 = vld [vmem:[%s1449_s1 + $0xb0] sm:$0xff]   ;;  %s1386_s13 = scalar_lea.vmem %s1448_s0, %s1175_s16  ;;  %v1215_v31 = vld [vmem:[%s1449_s1 + $0xb8] sm:$0xff]   ;;  %v1239_v51 = vld [vmem:[%s1449_s1 + $0x128] sm:$0xff]  }
  0x11   : > { %1088 = vmatpush3.bf16.msra.mxu1 %v1195_v11  ;;  %1049 = vmatprep.subr.bf16.mxu0 %v1196_v12  ;;  %v1216_v32 = vld [vmem:[%s1386_s13] ss:$20 sps:$4 sm:$0xff]   ;;  %v1218_v33 = vld [vmem:[%s1386_s13 + $0x4] ss:$20 sps:$4 sm:$0xff]   ;;  %v1219_v34 = vld [vmem:[%s1386_s13 + $0x8] ss:$20 sps:$4 sm:$0xff]  }
  0x12   : > { %1089 = vmatprep.subr.bf16.mxu1 %v1197_v13  ;;  %v1221_v35 = vld [vmem:[%s1386_s13 + $0xc] ss:$20 sps:$4 sm:$0xff]   ;;  %665 = vmatprep.mubr.bf16.mxu0 %v1218_v33  ;;  %v1226_v39 = vld [vmem:[%s1386_s13 + $0x34] ss:$20 sps:$4 sm:$0xff]   ;;  %v1229_v42 = vld [vmem:[%s1386_s13 + $0x30] ss:$20 sps:$4 sm:$0xff]  }
  0x13   : > { %730 = vmatprep.mubr.bf16.mxu1 %v1221_v35  ;;  %v1224_v38 = vld [vmem:[%s1386_s13 + $0x2c] ss:$20 sps:$4 sm:$0xff]   ;;  %v1228_v40 = vld [vmem:[%s1386_s13 + $0x28] ss:$20 sps:$4 sm:$0xff]   ;;  %v1230_v41 = vld [vmem:[%s1449_s1 + $0x110] sm:$0xff]  }
  0x14   : > { %1050 = vmatpush3.bf16.msra.mxu0 %v1198_v14  ;;  %v1232_v43 = vld [vmem:[%s1386_s13 + $0x54] ss:$20 sps:$4 sm:$0xff]   ;;  %v1231_v44 = vld [vmem:[%s1449_s1 + $0x118] sm:$0xff]   ;;  %v1236_v47 = vld [vmem:[%s1386_s13 + $0x50] ss:$20 sps:$4 sm:$0xff]  }
  0x15   : > { %1090 = vmatpush3.bf16.msra.mxu1 %v1199_v15  ;;  %1051 = vmatprep.subr.bf16.mxu0 %v1200_v16  ;;  %v1234_v45 = vld [vmem:[%s1386_s13 + $0x5c] ss:$20 sps:$4 sm:$0xff]   ;;  %v1237_v48 = vld [vmem:[%s1386_s13 + $0x58] ss:$20 sps:$4 sm:$0xff]   ;;  %v1245_v54 = vld [vmem:[%s1386_s13 + $0x80] ss:$20 sps:$4 sm:$0xff]  }
  0x16   : > { %1091 = vmatprep.subr.bf16.mxu1 %v1201_v17  ;;  %v1240_v49 = vld [vmem:[%s1386_s13 + $0x7c] ss:$20 sps:$4 sm:$0xff]   ;;  %v1242_v50 = vld [vmem:[%s1386_s13 + $0x84] ss:$20 sps:$4 sm:$0xff]   ;;  %v1249_v56 = vld [vmem:[%s1386_s13 + $0x60] ss:$20 sps:$4 sm:$0xff]  }
  0x17   : > { %v1246_v52 = vld [vmem:[%s1449_s1 + $0x130] sm:$0xff]   ;;  %v1244_v53 = vld [vmem:[%s1386_s13 + $0x78] ss:$20 sps:$4 sm:$0xff]   ;;  %v1251_v59 = vld [vmem:[%s1386_s13 + $0x88] ss:$20 sps:$4 sm:$0xff]  }
  0x18   : > { %1052 = vmatpush3.bf16.msra.mxu0 %v1202_v18  ;;  %v1248_v55 = vld [vmem:[%s1386_s13 + $0x10] ss:$20 sps:$4 sm:$0xff]   ;;  %v1247_v57 = vld [vmem:[%s1449_s1 + $0x138] sm:$0xff]   ;;  %v941_v62 = vld [vmem:[%s1450_s2] ss:$0 sm:$0xff] }
  0x19   : > { %1092 = vmatpush3.bf16.msra.mxu1 %v1203_v19  ;;  %1053 = vmatprep.subr.bf16.mxu0 %v1204_v20  ;;  %v1250_v58 = vld [vmem:[%s1386_s13 + $0x38] ss:$20 sps:$4 sm:$0xff]  }
  0x1a   : > { %1093 = vmatprep.subr.bf16.mxu1 %v1205_v21 }
  0x1c   : > { %1054 = vmatpush3.bf16.msra.mxu0 %v1206_v22 }
  0x1d   : > { %1094 = vmatpush3.bf16.msra.mxu1 %v1207_v23  ;;  %1055 = vmatprep.subr.bf16.mxu0 %v1208_v24 }
  0x1e   : > { %1095 = vmatprep.subr.bf16.mxu1 %v1209_v25 }
  0x20   : > { %1056 = vmatpush3.bf16.msra.mxu0 %v1210_v26 }
  0x21   : > { %1096 = vmatpush3.bf16.msra.mxu1 %v1211_v27  ;;  %1057 = vmatprep.subr.bf16.mxu0 %v1212_v28 }
  0x22   : > { %1097 = vmatprep.subr.bf16.mxu1 %v1213_v29 }
  0x24   : > { %1058 = vmatpush3.bf16.msra.mxu0 %v1214_v30 }
  0x25   : > { %1098 = vmatpush3.bf16.msra.mxu1 %v1215_v31  ;;  %1135 = vmatprep.subr.bf16.mxu0 %v1222_v36 }
  0x26   : > { %1159 = vmatprep.subr.bf16.mxu1 %v1222_v36 }
  0x27   : > { %666 = vmatmul.mubr.bf16.vlgmr.msra.gmra.mrb[0].mxu0 %v1216_v32 }
  0x28   : > { %731 = vmatmul.mubr.bf16.vlgmr.msra.gmra.mrb[0].mxu1 %v1219_v34  ;;  %1136 = vmatpush3.bf16.msra.mxu0 %v1222_v36 }
  0x29   : > { %1167 = vmatpush3.bf16.msra.mxu1 %v1222_v36  ;;  %1137 = vmatprep.subr.bf16.mxu0 %v1223_v37 }
  0x2a   : > { %1160 = vmatprep.subr.bf16.mxu1 %v1223_v37  ;;  %673 = vmatprep.mubr.bf16.mxu0 %v1224_v38 }
  0x2b   : > { %738 = vmatprep.mubr.bf16.mxu1 %v1226_v39 }
  0x2c   : > { %1138 = vmatpush3.bf16.msra.mxu0 %v1223_v37 }
  0x2d   : > { %1168 = vmatpush3.bf16.msra.mxu1 %v1223_v37  ;;  %1139 = vmatprep.subr.bf16.mxu0 %v1230_v41 }
  0x2e   : > { %1161 = vmatprep.subr.bf16.mxu1 %v1230_v41 }
  0x2f   : > { %674 = vmatmul.mubr.bf16.gmra.mrb[4].mxu0 %v1228_v40 }
  0x30   : > { %739 = vmatmul.mubr.bf16.gmra.mrb[4].mxu1 %v1229_v42  ;;  %681 = vmatprep.mubr.bf16.mxu0 %v1232_v43 }
  0x31   : > { %1140 = vmatpush3.bf16.msra.mxu0 %v1230_v41  ;;  %746 = vmatprep.mubr.bf16.mxu1 %v1234_v45 }
  0x32   : > { %1169 = vmatpush3.bf16.msra.mxu1 %v1230_v41  ;;  %1141 = vmatprep.subr.bf16.mxu0 %v1231_v44 }
  0x33   : > { %1162 = vmatprep.subr.bf16.mxu1 %v1231_v44 }
  0x35   : > { %1142 = vmatpush3.bf16.msra.mxu0 %v1231_v44 }
  0x36   : > { %1170 = vmatpush3.bf16.msra.mxu1 %v1231_v44  ;;  %1143 = vmatprep.subr.bf16.mxu0 %v1238_v46 }
  0x37   : > { %682 = vmatmul.mubr.bf16.gmra.mrb[8].mxu0 %v1236_v47  ;;  %1163 = vmatprep.subr.bf16.mxu1 %v1238_v46 }
  0x38   : > { %747 = vmatmul.mubr.bf16.gmra.mrb[8].mxu1 %v1237_v48  ;;  %689 = vmatprep.mubr.bf16.mxu0 %v1240_v49 }
  0x39   : > { %1144 = vmatpush3.bf16.msra.mxu0 %v1238_v46  ;;  %754 = vmatprep.mubr.bf16.mxu1 %v1242_v50 }
  0x3a   : > { %1171 = vmatpush3.bf16.msra.mxu1 %v1238_v46  ;;  %1145 = vmatprep.subr.bf16.mxu0 %v1239_v51 }
  0x3b   : > { %1164 = vmatprep.subr.bf16.mxu1 %v1239_v51 }
  0x3d   : > { %1146 = vmatpush3.bf16.msra.mxu0 %v1239_v51 }
  0x3e   : > { %1172 = vmatpush3.bf16.msra.mxu1 %v1239_v51  ;;  %1147 = vmatprep.subr.bf16.mxu0 %v1246_v52 }
  0x3f   : > { %690 = vmatmul.mubr.bf16.gmra.mrb[12].mxu0 %v1244_v53  ;;  %1165 = vmatprep.subr.bf16.mxu1 %v1246_v52 }
  0x40   : > { %755 = vmatmul.mubr.bf16.gmra.mrb[12].mxu1 %v1245_v54  ;;  %1151 = vmatprep.mubr.bf16.mxu0 %v1248_v55 }
  0x41   : > { %1148 = vmatpush3.bf16.msra.mxu0 %v1246_v52  ;;  %1155 = vmatprep.mubr.bf16.mxu1 %v1249_v56 }
  0x42   : > { %1173 = vmatpush3.bf16.msra.mxu1 %v1246_v52  ;;  %1149 = vmatprep.subr.bf16.mxu0 %v1247_v57 }
  0x43   : > { %1166 = vmatprep.subr.bf16.mxu1 %v1247_v57 }
  0x45   : > { %1150 = vmatpush3.bf16.msra.mxu0 %v1247_v57 }
  0x46   : > { %1174 = vmatpush3.bf16.msra.mxu1 %v1247_v57 }
  0x48   : > { %1152 = vmatmul.mubr.bf16.vlgmr.msra.gmra.mrb[16].mxu0 %v1250_v58 }
  0x49   : > { %1156 = vmatmul.mubr.bf16.vlgmr.msra.gmra.mrb[16].mxu1 %v1251_v59 }
  0xfa   : > { %v1059_v60 = vpop.f32.mrb[0].mxu0 }
  0xfb   : > { %v1099_v61 = vpop.f32.mrb[0].mxu1  ;;  %v1060_v63 = vpop.f32.mrb[1].mxu0 }
  0xfc   : > { %v1061_v0 = vadd.f32 %v1060_v63, %v1059_v60  ;;  %v1100_v1 = vpop.f32.mrb[1].mxu1  ;;  %v1062_v2 = vpop.f32.mrb[2].mxu0 }
  0xfd   : > { %v1101_v3 = vadd.f32 %v1100_v1, %v1099_v61  ;;  %v1102_v4 = vpop.f32.mrb[2].mxu1  ;;  %v1063_v5 = vpop.f32.mrb[3].mxu0 }
  0xfe   : > { %v668_v6 = vadd.f32 %v1061_v0, %v941_v62  ;;  %v1064_v7 = vadd.f32 %v1063_v5, %v1062_v2  ;;  %v1103_v8 = vpop.f32.mrb[3].mxu1 }
  0xff   : > { %v1104_v9 = vadd.f32 %v1103_v8, %v1102_v4 }
 0x100   : > { %v671_v10 = vadd.f32 %v1064_v7, %v941_v62  ;;  %v733_v11 = vadd.f32 %v1101_v3, %v668_v6 }
 0x102   : > { %v1065_v12 = vpop.f32.mrb[4].mxu0  ;;  %v736_v13 = vadd.f32 %v1104_v9, %v671_v10 }
 0x103   : > { %v1105_v14 = vpop.f32.mrb[4].mxu1  ;;  %v1066_v15 = vpop.f32.mrb[5].mxu0 }
 0x104   : > { %v1067_v16 = vadd.f32 %v1066_v15, %v1065_v12  ;;  %v1106_v17 = vpop.f32.mrb[5].mxu1  ;;  %v1068_v18 = vpop.f32.mrb[6].mxu0 }
 0x105   : > { %v1107_v19 = vadd.f32 %v1106_v17, %v1105_v14  ;;  %v1108_v20 = vpop.f32.mrb[6].mxu1  ;;  %v1069_v21 = vpop.f32.mrb[7].mxu0 }
 0x106   : > { %v676_v22 = vadd.f32 %v1067_v16, %v941_v62  ;;  %v1070_v23 = vadd.f32 %v1069_v21, %v1068_v18  ;;  %v1109_v24 = vpop.f32.mrb[7].mxu1 }
 0x107   : > { %v1110_v25 = vadd.f32 %v1109_v24, %v1108_v20 }
 0x108   : > { %v679_v26 = vadd.f32 %v1070_v23, %v941_v62  ;;  %v741_v27 = vadd.f32 %v1107_v19, %v676_v22 }
 0x10a   : > { %v1071_v28 = vpop.f32.mrb[8].mxu0  ;;  %v744_v29 = vadd.f32 %v1110_v25, %v679_v26 }
 0x10b   : > { %v1111_v30 = vpop.f32.mrb[8].mxu1  ;;  %v1072_v31 = vpop.f32.mrb[9].mxu0 }
 0x10c   : > { %v1073_v32 = vadd.f32 %v1072_v31, %v1071_v28  ;;  %v1112_v33 = vpop.f32.mrb[9].mxu1  ;;  %v1074_v34 = vpop.f32.mrb[10].mxu0 }
 0x10d   : > { %v1113_v35 = vadd.f32 %v1112_v33, %v1111_v30  ;;  %v1114_v36 = vpop.f32.mrb[10].mxu1  ;;  %v1075_v37 = vpop.f32.mrb[11].mxu0 }
 0x10e   : > { %v684_v38 = vadd.f32 %v1073_v32, %v941_v62  ;;  %v1076_v39 = vadd.f32 %v1075_v37, %v1074_v34  ;;  %v1115_v40 = vpop.f32.mrb[11].mxu1 }
 0x10f   : > { %v1116_v41 = vadd.f32 %v1115_v40, %v1114_v36 }
 0x110   : > { %v687_v42 = vadd.f32 %v1076_v39, %v941_v62  ;;  %v749_v43 = vadd.f32 %v1113_v35, %v684_v38 }
 0x112   : > { %v1077_v44 = vpop.f32.mrb[12].mxu0  ;;  %v752_v45 = vadd.f32 %v1116_v41, %v687_v42 }
 0x113   : > { %v1117_v46 = vpop.f32.mrb[12].mxu1  ;;  %v1078_v47 = vpop.f32.mrb[13].mxu0 }
 0x114   : > { %v1079_v48 = vadd.f32 %v1078_v47, %v1077_v44  ;;  %v1118_v49 = vpop.f32.mrb[13].mxu1  ;;  %v1080_v50 = vpop.f32.mrb[14].mxu0 }
 0x115   : > { %v1119_v51 = vadd.f32 %v1118_v49, %v1117_v46  ;;  %v1120_v52 = vpop.f32.mrb[14].mxu1  ;;  %v1081_v53 = vpop.f32.mrb[15].mxu0 }
 0x116   : > { %v692_v54 = vadd.f32 %v1079_v48, %v941_v62  ;;  %v1082_v55 = vadd.f32 %v1081_v53, %v1080_v50  ;;  %v1121_v56 = vpop.f32.mrb[15].mxu1 }
 0x117   : > { %v1122_v57 = vadd.f32 %v1121_v56, %v1120_v52 }
 0x118   : > { %v695_v58 = vadd.f32 %v1082_v55, %v941_v62  ;;  %v757_v59 = vadd.f32 %v1119_v51, %v692_v54 }
 0x11a   : > { %v760_v60 = vadd.f32 %v1122_v57, %v695_v58 }
 0x11b   : > { %v1153_v61 = vpop.f32.mrb[16].mxu0 }
 0x11c   : > { %v806_v63 = vadd.f32 %v1153_v61, %v741_v27  ;;  %v1157_v0 = vpop.f32.mrb[16].mxu1  ;;  %v797_v1 = vpop.f32.mrb[17].mxu0 }
 0x11d   : > { %v822_v2 = vadd.f32 %v1157_v0, %v757_v59  ;;  %v798_v3 = vadd.f32 %v797_v1, %v733_v11  ;;  %v813_v4 = vpop.f32.mrb[17].mxu1  ;;  %v1154_v5 = vpop.f32.mrb[18].mxu0 }
 0x11e   : > { %v814_v6 = vadd.f32 %v813_v4, %v749_v43  ;;  %v809_v7 = vadd.f32 %v1154_v5, %v744_v29  ;;  %v1158_v8 = vpop.f32.mrb[18].mxu1  ;;  %v800_v9 = vpop.f32.mrb[19].mxu0  ;;  %v830_v15 = vmax.f32 %v806_v63, 0.0 }
 0x11f   : > { %v825_v10 = vadd.f32 %v1158_v8, %v760_v60  ;;  %v801_v12 = vadd.f32 %v800_v9, %v736_v13  ;;  %v816_v14 = vpop.f32.mrb[19].mxu1  ;;  %v834_v17 = vmax.f32 %v822_v2, 0.0  ;;  %v828_v18 = vmax.f32 %v798_v3, 0.0 }
 0x120   : > { %v831_v62 = vmax.f32 %v809_v7, 0.0  ;;  %v817_v16 = vadd.f32 %v816_v14, %v752_v45  ;;  %v832_v20 = vmax.f32 %v814_v6, 0.0 }
 0x121   : > { %v835_v11 = vmax.f32 %v825_v10, 0.0  ;;  %v829_v19 = vmax.f32 %v801_v12, 0.0 }
 0x122   : > { %v1028_v21 = vpack.c.bf16 %v831_v62, %v830_v15  ;;  %v833_v22 = vmax.f32 %v817_v16, 0.0 }
 0x123   : > { %v1038_v23 = vpack.c.bf16 %v835_v11, %v834_v17  ;;  %v1023_v24 = vpack.c.bf16 %v829_v19, %v828_v18 }
 0x124   : > { %1040 = vst [vmem:[%s175_s28 + $0x8] sm:$0xff] %v1028_v21   ;;  %v1033_v25 = vpack.c.bf16 %v833_v22, %v832_v20 }
 0x125   : > { %1042 = vst [vmem:[%s175_s28 + $0x18] sm:$0xff] %v1038_v23   ;;  %1024 = vst [vmem:[%s175_s28] sm:$0xff] %v1023_v24  }
 0x126   : > { %1041 = vst [vmem:[%s175_s28 + $0x10] sm:$0xff] %v1033_v25  }
 0x127 PF: > { %s13_s12 = sadd.s32 1, %s1258_s12  }
 0x128   : > { %p10_p4 = scmp.ge.s32.totalorder %s13_s12, 4  }
 0x12a   :  { %12 = sbr.rel (!%p10_p4) target bundleno = 1 (0x1), region = 62 }

// kernel: mugicha_forward.7
= control target key start
LH: loop header
LB: loop body
LE: loop exit
PB: predicated region body
PF: predicated region fallthrough
CT: control target
= control target key end

     0   :  { %v9609_v1 = vmov 0   ;;  %s12506_s2 = inlined_call_operand.vmem [shape: bf16[128,256], index: 2, kind: input, shape index: {}]   ;;  %s12507_s1 = inlined_call_operand.vmem [shape: bf16[16,128], index: 1, kind: input, shape index: {}]   ;;  %s12508_s5 = inlined_call_operand.vmem [shape: bf16[256,512], index: 5, kind: input, shape index: {}]   ;;  %s12509_s4 = inlined_call_operand.vmem [shape: bf16[3200,512], index: 4, kind: input, shape index: {}]   ;;  %s12510_s0 = inlined_call_operand.vmem [shape: bf16[16,3200], index: 0, kind: input, shape index: {}]   ;;  %s12511_s3 = inlined_call_operand.vmem [shape: f32[1,256], index: 3, kind: input, shape index: {}]   ;;  %s12512_s7 = inlined_call_operand.vmem [shape: bf16[512,128], index: 7, kind: input, shape index: {}]   ;;  %s12513_s6 = inlined_call_operand.vmem [shape: f32[1,512], index: 6, kind: input, shape index: {}]   ;;  %s12514_s8 = inlined_call_operand.vmem [shape: f32[1,128], index: 8, kind: input, shape index: {}]   ;;  %s12515_s9 = inlined_call_operand.vmem [shape: f32[16,128], index: 9, kind: output, shape index: {}]  }
   0x1   :  { %v8219_v0 = vld [vmem:[%s12506_s2 + $0x4] ss:$8 sps:$4 sm:$0xff]   ;;  %181 = vmatprep.mubr.bf16.mxu0 %v9609_v1  ;;  %v8221_v2 = vld [vmem:[%s12506_s2] ss:$8 sps:$4 sm:$0xff]   ;;  %v8222_v3 = vld [vmem:[%s12506_s2 + $0x14] ss:$8 sps:$4 sm:$0xff]  }
   0x2   :  { %149 = vmatprep.subr.bf16.mxu0 %v8219_v0  ;;  %v8224_v4 = vld [vmem:[%s12506_s2 + $0x10] ss:$8 sps:$4 sm:$0xff]   ;;  %v8225_v5 = vld [vmem:[%s12506_s2 + $0x24] ss:$8 sps:$4 sm:$0xff]   ;;  %v8227_v6 = vld [vmem:[%s12506_s2 + $0x20] ss:$8 sps:$4 sm:$0xff]  }
   0x3   :  { %150 = vmatpush1.bf16.msra.mxu0 %v8221_v2  ;;  %v8228_v7 = vld [vmem:[%s12506_s2 + $0x34] ss:$8 sps:$4 sm:$0xff]   ;;  %v8230_v8 = vld [vmem:[%s12506_s2 + $0x30] ss:$8 sps:$4 sm:$0xff]   ;;  %v8231_v9 = vld [vmem:[%s12506_s2 + $0x44] ss:$8 sps:$4 sm:$0xff]  }
   0x4   :  { %151 = vmatprep.subr.bf16.mxu0 %v8222_v3  ;;  %v8244_v10 = vld [vmem:[%s12508_s5 + $0x4] ss:$16 sps:$4 sm:$0xff]   ;;  %v8233_v11 = vld [vmem:[%s12506_s2 + $0x40] ss:$8 sps:$4 sm:$0xff]   ;;  %v8236_v17 = vld [vmem:[%s12506_s2 + $0x50] ss:$8 sps:$4 sm:$0xff]  }
   0x5   :  { %1408 = vmatprep.subr.bf16.mxu1 %v8244_v10  ;;  %v8249_v12 = vld [vmem:[%s12508_s5] ss:$16 sps:$4 sm:$0xff]   ;;  %v8250_v13 = vld [vmem:[%s12508_s5 + $0x24] ss:$16 sps:$4 sm:$0xff]   ;;  %v8248_v26 = vld [vmem:[%s12508_s5 + $0xc] ss:$16 sps:$4 sm:$0xff]  }
   0x6   :  { %v8234_v14 = vld [vmem:[%s12506_s2 + $0x54] ss:$8 sps:$4 sm:$0xff]   ;;  %1409 = vmatpush1.bf16.msra.mxu1 %v8249_v12  ;;  %v8255_v15 = vld [vmem:[%s12508_s5 + $0x20] ss:$16 sps:$4 sm:$0xff]   ;;  %v8237_v18 = vld [vmem:[%s12506_s2 + $0x64] ss:$8 sps:$4 sm:$0xff]  }
   0x7   :  { %152 = vmatpush1.bf16.msra.mxu0 %v8224_v4  ;;  %1410 = vmatprep.subr.bf16.mxu1 %v8250_v13  ;;  %v8256_v16 = vld [vmem:[%s12508_s5 + $0x44] ss:$16 sps:$4 sm:$0xff]   ;;  %v8261_v19 = vld [vmem:[%s12508_s5 + $0x40] ss:$16 sps:$4 sm:$0xff]   ;;  %v8246_v30 = vld [vmem:[%s12508_s5 + $0x8] ss:$16 sps:$4 sm:$0xff]  }
   0x8   :  { %153 = vmatprep.subr.bf16.mxu0 %v8225_v5  ;;  %v8262_v20 = vld [vmem:[%s12508_s5 + $0x64] ss:$16 sps:$4 sm:$0xff]   ;;  %v8239_v21 = vld [vmem:[%s12506_s2 + $0x60] ss:$8 sps:$4 sm:$0xff]   ;;  %v8242_v25 = vld [vmem:[%s12506_s2 + $0x70] ss:$8 sps:$4 sm:$0xff]  }
   0x9   :  { %v8240_v22 = vld [vmem:[%s12506_s2 + $0x74] ss:$8 sps:$4 sm:$0xff]   ;;  %v8267_v23 = vld [vmem:[%s12508_s5 + $0x60] ss:$16 sps:$4 sm:$0xff]   ;;  %v8252_v34 = vld [vmem:[%s12508_s5 + $0x28] ss:$16 sps:$4 sm:$0xff]  }
   0xa   :  { %1411 = vmatpush1.bf16.msra.mxu1 %v8255_v15  ;;  %v8268_v24 = vld [vmem:[%s12508_s5 + $0x84] ss:$16 sps:$4 sm:$0xff]   ;;  %v8273_v27 = vld [vmem:[%s12508_s5 + $0x80] ss:$16 sps:$4 sm:$0xff]   ;;  %v8254_v31 = vld [vmem:[%s12508_s5 + $0x2c] ss:$16 sps:$4 sm:$0xff]  }
   0xb   :  { %154 = vmatpush1.bf16.msra.mxu0 %v8227_v6  ;;  %1412 = vmatprep.subr.bf16.mxu1 %v8256_v16  ;;  %v8274_v28 = vld [vmem:[%s12508_s5 + $0xa4] ss:$16 sps:$4 sm:$0xff]   ;;  %v8279_v32 = vld [vmem:[%s12508_s5 + $0xa0] ss:$16 sps:$4 sm:$0xff]   ;;  %v8260_v35 = vld [vmem:[%s12508_s5 + $0x4c] ss:$16 sps:$4 sm:$0xff]  }
   0xc   :  { %155 = vmatprep.subr.bf16.mxu0 %v8228_v7  ;;  %v8243_v29 = vld [vmem:[%s12507_s1] sm:$0xff]   ;;  %v8258_v38 = vld [vmem:[%s12508_s5 + $0x48] ss:$16 sps:$4 sm:$0xff]   ;;  %v8266_v39 = vld [vmem:[%s12508_s5 + $0x6c] ss:$16 sps:$4 sm:$0xff]  }
   0xd   :  { %v8280_v33 = vld [vmem:[%s12508_s5 + $0xc4] ss:$16 sps:$4 sm:$0xff]   ;;  %v8285_v36 = vld [vmem:[%s12508_s5 + $0xc0] ss:$16 sps:$4 sm:$0xff]   ;;  %v8264_v42 = vld [vmem:[%s12508_s5 + $0x68] ss:$16 sps:$4 sm:$0xff]  }
   0xe   :  { %1413 = vmatpush1.bf16.msra.mxu1 %v8261_v19  ;;  %v8286_v37 = vld [vmem:[%s12508_s5 + $0xe4] ss:$16 sps:$4 sm:$0xff]   ;;  %v8291_v40 = vld [vmem:[%s12508_s5 + $0xe0] ss:$16 sps:$4 sm:$0xff]   ;;  %v8272_v43 = vld [vmem:[%s12508_s5 + $0x8c] ss:$16 sps:$4 sm:$0xff]  }
   0xf   :  { %156 = vmatpush1.bf16.msra.mxu0 %v8230_v8  ;;  %1414 = vmatprep.subr.bf16.mxu1 %v8262_v20  ;;  %v8292_v41 = vld [vmem:[%s12508_s5 + $0x104] ss:$16 sps:$4 sm:$0xff]   ;;  %v8297_v44 = vld [vmem:[%s12508_s5 + $0x100] ss:$16 sps:$4 sm:$0xff]   ;;  %v8270_v46 = vld [vmem:[%s12508_s5 + $0x88] ss:$16 sps:$4 sm:$0xff]  }
  0x10   :  { %157 = vmatprep.subr.bf16.mxu0 %v8231_v9  ;;  %v8298_v45 = vld [vmem:[%s12508_s5 + $0x124] ss:$16 sps:$4 sm:$0xff]   ;;  %v8278_v47 = vld [vmem:[%s12508_s5 + $0xac] ss:$16 sps:$4 sm:$0xff]   ;;  %v8303_v48 = vld [vmem:[%s12508_s5 + $0x120] ss:$16 sps:$4 sm:$0xff]  }
  0x11   :  { %v8276_v49 = vld [vmem:[%s12508_s5 + $0xa8] ss:$16 sps:$4 sm:$0xff]   ;;  %v8304_v50 = vld [vmem:[%s12508_s5 + $0x144] ss:$16 sps:$4 sm:$0xff]   ;;  %v8284_v51 = vld [vmem:[%s12508_s5 + $0xcc] ss:$16 sps:$4 sm:$0xff]  }
  0x12   :  { %1415 = vmatpush1.bf16.msra.mxu1 %v8267_v23  ;;  %v8309_v52 = vld [vmem:[%s12508_s5 + $0x140] ss:$16 sps:$4 sm:$0xff]   ;;  %v8310_v53 = vld [vmem:[%s12508_s5 + $0x164] ss:$16 sps:$4 sm:$0xff]   ;;  %v8282_v54 = vld [vmem:[%s12508_s5 + $0xc8] ss:$16 sps:$4 sm:$0xff]  }
  0x13   :  { %158 = vmatpush1.bf16.msra.mxu0 %v8233_v11  ;;  %1416 = vmatprep.subr.bf16.mxu1 %v8268_v24  ;;  %v8290_v55 = vld [vmem:[%s12508_s5 + $0xec] ss:$16 sps:$4 sm:$0xff]   ;;  %v8315_v56 = vld [vmem:[%s12508_s5 + $0x160] ss:$16 sps:$4 sm:$0xff]   ;;  %v8316_v57 = vld [vmem:[%s12508_s5 + $0x184] ss:$16 sps:$4 sm:$0xff]  }
  0x14   :  { %159 = vmatprep.subr.bf16.mxu0 %v8234_v14  ;;  %v8288_v58 = vld [vmem:[%s12508_s5 + $0xe8] ss:$16 sps:$4 sm:$0xff]   ;;  %v8296_v59 = vld [vmem:[%s12508_s5 + $0x10c] ss:$16 sps:$4 sm:$0xff]   ;;  %v8321_v60 = vld [vmem:[%s12508_s5 + $0x180] ss:$16 sps:$4 sm:$0xff]  }
  0x15   :  { %v8322_v61 = vld [vmem:[%s12508_s5 + $0x1a4] ss:$16 sps:$4 sm:$0xff]   ;;  %v8294_v62 = vld [vmem:[%s12508_s5 + $0x108] ss:$16 sps:$4 sm:$0xff]   ;;  %v8302_v63 = vld [vmem:[%s12508_s5 + $0x12c] ss:$16 sps:$4 sm:$0xff]  }
  0x16   :  { %1417 = vmatpush1.bf16.msra.mxu1 %v8273_v27  ;;  %v8327_v0 = vld [vmem:[%s12508_s5 + $0x1a0] ss:$16 sps:$4 sm:$0xff]   ;;  %v8300_v2 = vld [vmem:[%s12508_s5 + $0x128] ss:$16 sps:$4 sm:$0xff]   ;;  %v8308_v3 = vld [vmem:[%s12508_s5 + $0x14c] ss:$16 sps:$4 sm:$0xff]  }
  0x17   :  { %160 = vmatpush1.bf16.msra.mxu0 %v8236_v17  ;;  %1418 = vmatprep.subr.bf16.mxu1 %v8274_v28  ;;  %v8306_v4 = vld [vmem:[%s12508_s5 + $0x148] ss:$16 sps:$4 sm:$0xff]   ;;  %v8314_v5 = vld [vmem:[%s12508_s5 + $0x16c] ss:$16 sps:$4 sm:$0xff]   ;;  %v8328_v11 = vld [vmem:[%s12508_s5 + $0x1c4] ss:$16 sps:$4 sm:$0xff]  }
  0x18   :  { %161 = vmatprep.subr.bf16.mxu0 %v8237_v18  ;;  %v8312_v6 = vld [vmem:[%s12508_s5 + $0x168] ss:$16 sps:$4 sm:$0xff]   ;;  %v8320_v7 = vld [vmem:[%s12508_s5 + $0x18c] ss:$16 sps:$4 sm:$0xff]   ;;  %v8333_v14 = vld [vmem:[%s12508_s5 + $0x1c0] ss:$16 sps:$4 sm:$0xff]  }
  0x19   :  { %v8318_v8 = vld [vmem:[%s12508_s5 + $0x188] ss:$16 sps:$4 sm:$0xff]   ;;  %v8326_v9 = vld [vmem:[%s12508_s5 + $0x1ac] ss:$16 sps:$4 sm:$0xff]   ;;  %v8334_v15 = vld [vmem:[%s12508_s5 + $0x1e4] ss:$16 sps:$4 sm:$0xff]  }
  0x1a   :  { %1419 = vmatpush1.bf16.msra.mxu1 %v8279_v32  ;;  %v8324_v10 = vld [vmem:[%s12508_s5 + $0x1a8] ss:$16 sps:$4 sm:$0xff]   ;;  %v8332_v12 = vld [vmem:[%s12508_s5 + $0x1cc] ss:$16 sps:$4 sm:$0xff]   ;;  %v8339_v18 = vld [vmem:[%s12508_s5 + $0x1e0] ss:$16 sps:$4 sm:$0xff]  }
  0x1b   :  { %162 = vmatpush1.bf16.msra.mxu0 %v8239_v21  ;;  %1420 = vmatprep.subr.bf16.mxu1 %v8280_v33  ;;  %v8330_v13 = vld [vmem:[%s12508_s5 + $0x1c8] ss:$16 sps:$4 sm:$0xff]   ;;  %v8338_v16 = vld [vmem:[%s12508_s5 + $0x1ec] ss:$16 sps:$4 sm:$0xff]   ;;  %v8342_v19 = vld [vmem:[%s12509_s4 + $0x4] ss:$16 sps:$4 sm:$0xff]   ;;  %v53_v21 = vlaneseq }
  0x1c   :  { %163 = vmatprep.subr.bf16.mxu0 %v8240_v22  ;;  %v8336_v17 = vld [vmem:[%s12508_s5 + $0x1e8] ss:$16 sps:$4 sm:$0xff]   ;;  %v8345_v20 = vld [vmem:[%s12509_s4 + $0xc] ss:$16 sps:$4 sm:$0xff]   ;;  %v51_v23 = vld [vmem:[%s12511_s3] sm:$0x3] }
  0x1d   :  { %v9910_v22 = vshrl.u32 %v53_v21, 7  ;;  %v8403_v21 = vld [vmem:[%s12509_s4 + $0x148] ss:$16 sps:$4 sm:$0xff]  }
  0x1e   :  { %1421 = vmatpush1.bf16.msra.mxu1 %v8285_v36 }
  0x1f   :  { %164 = vmatpush1.bf16.msra.mxu0 %v8242_v25  ;;  %1422 = vmatprep.subr.bf16.mxu1 %v8286_v37  ;;  %v55_v24 = vsub.s32 0, %v9910_v22  ;;  %v59_v25 = vsub.s32 1, %v9910_v22 }
  0x20   :  { %1451 = vmatprep.subr.bf16.mxu0 %v8248_v26 }
  0x21   :  { %v56_v26 = vrot.slane %v51_v23, %v55_v24  ;;  %v60_v27 = vrot.slane %v51_v23, %v59_v25  ;;  %v8408_v23 = vld [vmem:[%s12509_s4 + $0x164] ss:$16 sps:$4 sm:$0xff]  }
  0x22   :  { %182 = vmatmul.mubr.bf16.vlgmr.msra.gmra.mrb[0].mxu0 %v8243_v29  ;;  %1423 = vmatpush1.bf16.msra.mxu1 %v8291_v40 }
  0x23   :  { %1452 = vmatpush1.bf16.msra.mxu0 %v8246_v30  ;;  %1424 = vmatprep.subr.bf16.mxu1 %v8292_v41 }
  0x24   :  { %1453 = vmatprep.subr.bf16.mxu0 %v8254_v31 }
  0x26   :  { %1425 = vmatpush1.bf16.msra.mxu1 %v8297_v44  ;;  %v8348_v44 = vld [vmem:[%s12509_s4 + $0x24] ss:$16 sps:$4 sm:$0xff]  }
  0x27   :  { %1454 = vmatpush1.bf16.msra.mxu0 %v8252_v34  ;;  %1426 = vmatprep.subr.bf16.mxu1 %v8298_v45  ;;  %v8351_v45 = vld [vmem:[%s12509_s4 + $0x2c] ss:$16 sps:$4 sm:$0xff]  }
  0x28   :  { %1455 = vmatprep.subr.bf16.mxu0 %v8260_v35 }
  0x2a   :  { %1427 = vmatpush1.bf16.msra.mxu1 %v8303_v48  ;;  %v8349_v48 = vld [vmem:[%s12509_s4 + $0x28] ss:$16 sps:$4 sm:$0xff]  }
  0x2b   :  { %1456 = vmatpush1.bf16.msra.mxu0 %v8258_v38  ;;  %1428 = vmatprep.subr.bf16.mxu1 %v8304_v50  ;;  %v8357_v50 = vld [vmem:[%s12509_s4 + $0x4c] ss:$16 sps:$4 sm:$0xff]  }
  0x2c   :  { %1457 = vmatprep.subr.bf16.mxu0 %v8266_v39 }
  0x2e   :  { %1429 = vmatpush1.bf16.msra.mxu1 %v8309_v52  ;;  %v8355_v52 = vld [vmem:[%s12509_s4 + $0x48] ss:$16 sps:$4 sm:$0xff]  }
  0x2f   :  { %1458 = vmatpush1.bf16.msra.mxu0 %v8264_v42  ;;  %1430 = vmatprep.subr.bf16.mxu1 %v8310_v53  ;;  %v8340_v42 = vld [vmem:[%s12509_s4] ss:$16 sps:$4 sm:$0xff]   ;;  %v8360_v53 = vld [vmem:[%s12509_s4 + $0x64] ss:$16 sps:$4 sm:$0xff]  }
  0x30   :  { %1459 = vmatprep.subr.bf16.mxu0 %v8272_v43  ;;  %v8343_v43 = vld [vmem:[%s12509_s4 + $0x8] ss:$16 sps:$4 sm:$0xff]  }
  0x32   :  { %1431 = vmatpush1.bf16.msra.mxu1 %v8315_v56  ;;  %v8361_v56 = vld [vmem:[%s12509_s4 + $0x68] ss:$16 sps:$4 sm:$0xff]  }
  0x33   :  { %1460 = vmatpush1.bf16.msra.mxu0 %v8270_v46  ;;  %1432 = vmatprep.subr.bf16.mxu1 %v8316_v57  ;;  %v8438_v46 = vld [vmem:[%s12510_s0 + $0x4] ss:$100 sps:$4 sm:$0xff]  }
  0x34   :  { %1461 = vmatprep.subr.bf16.mxu0 %v8278_v47  ;;  %v8346_v47 = vld [vmem:[%s12509_s4 + $0x20] ss:$16 sps:$4 sm:$0xff]   ;;  %v8366_v57 = vld [vmem:[%s12509_s4 + $0x84] ss:$16 sps:$4 sm:$0xff]  }
  0x36   :  { %1433 = vmatpush1.bf16.msra.mxu1 %v8321_v60  ;;  %v8367_v60 = vld [vmem:[%s12509_s4 + $0x88] ss:$16 sps:$4 sm:$0xff]  }
  0x37   :  { %1462 = vmatpush1.bf16.msra.mxu0 %v8276_v49  ;;  %1434 = vmatprep.subr.bf16.mxu1 %v8322_v61  ;;  %v8354_v49 = vld [vmem:[%s12509_s4 + $0x44] ss:$16 sps:$4 sm:$0xff]  }
  0x38   :  { %1463 = vmatprep.subr.bf16.mxu0 %v8284_v51  ;;  %v8352_v51 = vld [vmem:[%s12509_s4 + $0x40] ss:$16 sps:$4 sm:$0xff]   ;;  %v8372_v61 = vld [vmem:[%s12509_s4 + $0xa4] ss:$16 sps:$4 sm:$0xff]  }
  0x3a   :  { %1435 = vmatpush1.bf16.msra.mxu1 %v8327_v0  ;;  %v8373_v0 = vld [vmem:[%s12509_s4 + $0xa8] ss:$16 sps:$4 sm:$0xff]  }
  0x3b   :  { %1464 = vmatpush1.bf16.msra.mxu0 %v8282_v54  ;;  %1436 = vmatprep.subr.bf16.mxu1 %v8328_v11  ;;  %v8363_v54 = vld [vmem:[%s12509_s4 + $0x6c] ss:$16 sps:$4 sm:$0xff]  }
  0x3c   :  { %1465 = vmatprep.subr.bf16.mxu0 %v8290_v55  ;;  %v8358_v55 = vld [vmem:[%s12509_s4 + $0x60] ss:$16 sps:$4 sm:$0xff]   ;;  %v8393_v11 = vld [vmem:[%s12509_s4 + $0x10c] ss:$16 sps:$4 sm:$0xff]  }
  0x3e   :  { %1437 = vmatpush1.bf16.msra.mxu1 %v8333_v14  ;;  %v8396_v14 = vld [vmem:[%s12509_s4 + $0x124] ss:$16 sps:$4 sm:$0xff]  }
  0x3f   :  { %1466 = vmatpush1.bf16.msra.mxu0 %v8288_v58  ;;  %1438 = vmatprep.subr.bf16.mxu1 %v8334_v15  ;;  %v8369_v58 = vld [vmem:[%s12509_s4 + $0x8c] ss:$16 sps:$4 sm:$0xff]  }
  0x40   :  { %1467 = vmatprep.subr.bf16.mxu0 %v8296_v59  ;;  %v8364_v59 = vld [vmem:[%s12509_s4 + $0x80] ss:$16 sps:$4 sm:$0xff]   ;;  %v8399_v15 = vld [vmem:[%s12509_s4 + $0x12c] ss:$16 sps:$4 sm:$0xff]  }
  0x42   :  { %1439 = vmatpush1.bf16.msra.mxu1 %v8339_v18  ;;  %v8402_v18 = vld [vmem:[%s12509_s4 + $0x144] ss:$16 sps:$4 sm:$0xff]  }
  0x43   :  { %1468 = vmatpush1.bf16.msra.mxu0 %v8294_v62  ;;  %5620 = vmatprep.subr.bf16.mxu1 %v8342_v19  ;;  %v8375_v62 = vld [vmem:[%s12509_s4 + $0xac] ss:$16 sps:$4 sm:$0xff]  }
  0x44   :  { %1469 = vmatprep.subr.bf16.mxu0 %v8302_v63  ;;  %v8370_v63 = vld [vmem:[%s12509_s4 + $0xa0] ss:$16 sps:$4 sm:$0xff]   ;;  %v8405_v19 = vld [vmem:[%s12509_s4 + $0x14c] ss:$16 sps:$4 sm:$0xff]  }
  0x47   :  { %1470 = vmatpush1.bf16.msra.mxu0 %v8300_v2  ;;  %v8378_v2 = vld [vmem:[%s12509_s4 + $0xc4] ss:$16 sps:$4 sm:$0xff]  }
  0x48   :  { %1471 = vmatprep.subr.bf16.mxu0 %v8308_v3  ;;  %v8381_v3 = vld [vmem:[%s12509_s4 + $0xcc] ss:$16 sps:$4 sm:$0xff]  }
  0x4b   :  { %1472 = vmatpush1.bf16.msra.mxu0 %v8306_v4  ;;  %v8376_v4 = vld [vmem:[%s12509_s4 + $0xc0] ss:$16 sps:$4 sm:$0xff]  }
  0x4c   :  { %1473 = vmatprep.subr.bf16.mxu0 %v8314_v5  ;;  %v8379_v5 = vld [vmem:[%s12509_s4 + $0xc8] ss:$16 sps:$4 sm:$0xff]  }
  0x4f   :  { %1474 = vmatpush1.bf16.msra.mxu0 %v8312_v6  ;;  %v8384_v6 = vld [vmem:[%s12509_s4 + $0xe4] ss:$16 sps:$4 sm:$0xff]  }
  0x50   :  { %1475 = vmatprep.subr.bf16.mxu0 %v8320_v7  ;;  %v8387_v7 = vld [vmem:[%s12509_s4 + $0xec] ss:$16 sps:$4 sm:$0xff]  }
  0x53   :  { %1476 = vmatpush1.bf16.msra.mxu0 %v8318_v8  ;;  %v8382_v8 = vld [vmem:[%s12509_s4 + $0xe0] ss:$16 sps:$4 sm:$0xff]  }
  0x54   :  { %1477 = vmatprep.subr.bf16.mxu0 %v8326_v9  ;;  %v8385_v9 = vld [vmem:[%s12509_s4 + $0xe8] ss:$16 sps:$4 sm:$0xff]  }
  0x57   :  { %1478 = vmatpush1.bf16.msra.mxu0 %v8324_v10  ;;  %v8390_v10 = vld [vmem:[%s12509_s4 + $0x104] ss:$16 sps:$4 sm:$0xff]  }
  0x58   :  { %1479 = vmatprep.subr.bf16.mxu0 %v8332_v12  ;;  %v8388_v12 = vld [vmem:[%s12509_s4 + $0x100] ss:$16 sps:$4 sm:$0xff]  }
  0x5b   :  { %1480 = vmatpush1.bf16.msra.mxu0 %v8330_v13  ;;  %v8391_v13 = vld [vmem:[%s12509_s4 + $0x108] ss:$16 sps:$4 sm:$0xff]  }
  0x5c   :  { %1481 = vmatprep.subr.bf16.mxu0 %v8338_v16  ;;  %v8394_v16 = vld [vmem:[%s12509_s4 + $0x120] ss:$16 sps:$4 sm:$0xff]  }
  0x5f   :  { %1482 = vmatpush1.bf16.msra.mxu0 %v8336_v17  ;;  %v8397_v17 = vld [vmem:[%s12509_s4 + $0x128] ss:$16 sps:$4 sm:$0xff]  }
  0x60   :  { %6179 = vmatprep.subr.bf16.mxu0 %v8345_v20  ;;  %v8400_v20 = vld [vmem:[%s12509_s4 + $0x140] ss:$16 sps:$4 sm:$0xff]  }
  0xf5   :  { %v183_v28 = vpop.f32.mrb[0].mxu0 }
  0xf6   :  { %v184_v29 = vadd.f32 %v183_v28, %v56_v26  ;;  %v185_v30 = vpop.f32.mrb[1].mxu0  ;;  %v8409_v28 = vld [vmem:[%s12509_s4 + $0x168] ss:$16 sps:$4 sm:$0xff]  }
  0xf7   :  { %v186_v31 = vadd.f32 %v185_v30, %v60_v27  ;;  %v187_v32 = vpop.f32.mrb[2].mxu0  ;;  %v8417_v30 = vld [vmem:[%s12509_s4 + $0x18c] ss:$16 sps:$4 sm:$0xff]  }
  0xf8   :  { %v188_v33 = vadd.f32 %v187_v32, %v56_v26  ;;  %v189_v34 = vpop.f32.mrb[3].mxu0  ;;  %v192_v36 = vmax.f32 %v184_v29, 0.0  ;;  %v8411_v26 = vld [vmem:[%s12509_s4 + $0x16c] ss:$16 sps:$4 sm:$0xff]   ;;  %v8414_v29 = vld [vmem:[%s12509_s4 + $0x184] ss:$16 sps:$4 sm:$0xff]  }
  0xf9   :  { %v190_v35 = vadd.f32 %v189_v34, %v60_v27  ;;  %v193_v38 = vmax.f32 %v186_v31, 0.0  ;;  %v8406_v27 = vld [vmem:[%s12509_s4 + $0x160] ss:$16 sps:$4 sm:$0xff]   ;;  %v8415_v32 = vld [vmem:[%s12509_s4 + $0x188] ss:$16 sps:$4 sm:$0xff]  }
  0xfa   :  { %v194_v37 = vmax.f32 %v188_v33, 0.0  ;;  %v8412_v31 = vld [vmem:[%s12509_s4 + $0x180] ss:$16 sps:$4 sm:$0xff]   ;;  %v8420_v33 = vld [vmem:[%s12509_s4 + $0x1a4] ss:$16 sps:$4 sm:$0xff]  }
  0xfb   :  { %v195_v39 = vmax.f32 %v190_v35, 0.0  ;;  %v8423_v34 = vld [vmem:[%s12509_s4 + $0x1ac] ss:$16 sps:$4 sm:$0xff]   ;;  %v8418_v35 = vld [vmem:[%s12509_s4 + $0x1a0] ss:$16 sps:$4 sm:$0xff]  }
  0xfc   :  { %v1022_v40 = vpack.c.bf16 %v194_v37, %v192_v36  ;;  %v8421_v36 = vld [vmem:[%s12509_s4 + $0x1a8] ss:$16 sps:$4 sm:$0xff]   ;;  %v8426_v37 = vld [vmem:[%s12509_s4 + $0x1c4] ss:$16 sps:$4 sm:$0xff]  }
  0xfd   :  { %v1023_v41 = vpack.c.bf16 %v195_v39, %v193_v38  ;;  %v8429_v38 = vld [vmem:[%s12509_s4 + $0x1cc] ss:$16 sps:$4 sm:$0xff]   ;;  %v8424_v39 = vld [vmem:[%s12509_s4 + $0x1c0] ss:$16 sps:$4 sm:$0xff]  }
  0xff   :  { %1440 = vmatprep.mubr.bf16.mxu1 %v1023_v41  ;;  %1483 = vmatprep.mubr.bf16.mxu0 %v1023_v41  ;;  %v8432_v41 = vld [vmem:[%s12509_s4 + $0x1e4] ss:$16 sps:$4 sm:$0xff]  }
 0x100   :  { %1441 = vmatmul.mubr.bf16.vlgmr.msra.gmra.mrb[0].mxu1 %v1022_v40  ;;  %1484 = vmatmul.mubr.bf16.vlgmr.msra.gmra.mrb[4].mxu0 %v1022_v40  ;;  %v8427_v40 = vld [vmem:[%s12509_s4 + $0x1c8] ss:$16 sps:$4 sm:$0xff]  }
 0x101   :  { %5621 = vmatpush1.bf16.msra.mxu1 %v8340_v42  ;;  %6180 = vmatpush1.bf16.msra.mxu0 %v8343_v43  ;;  %v8435_v42 = vld [vmem:[%s12509_s4 + $0x1ec] ss:$16 sps:$4 sm:$0xff]   ;;  %v8430_v43 = vld [vmem:[%s12509_s4 + $0x1e0] ss:$16 sps:$4 sm:$0xff]  }
 0x102   :  { %5622 = vmatprep.subr.bf16.mxu1 %v8348_v44  ;;  %6181 = vmatprep.subr.bf16.mxu0 %v8351_v45  ;;  %v8433_v44 = vld [vmem:[%s12509_s4 + $0x1e8] ss:$16 sps:$4 sm:$0xff]   ;;  %v8441_v45 = vld [vmem:[%s12509_s4 + $0x204] ss:$16 sps:$4 sm:$0xff]  }
 0x103   :  { %5652 = vmatprep.mubr.bf16.mxu1 %v8438_v46  ;;  %6211 = vmatprep.mubr.bf16.mxu0 %v8438_v46  ;;  %v8436_v46 = vld [vmem:[%s12510_s0] ss:$100 sps:$4 sm:$0xff]  }
 0x105   :  { %5623 = vmatpush1.bf16.msra.mxu1 %v8346_v47  ;;  %6182 = vmatpush1.bf16.msra.mxu0 %v8349_v48  ;;  %v8444_v47 = vld [vmem:[%s12509_s4 + $0x20c] ss:$16 sps:$4 sm:$0xff]   ;;  %v8439_v48 = vld [vmem:[%s12509_s4 + $0x200] ss:$16 sps:$4 sm:$0xff]  }
 0x106   :  { %5624 = vmatprep.subr.bf16.mxu1 %v8354_v49  ;;  %6183 = vmatprep.subr.bf16.mxu0 %v8357_v50  ;;  %v8442_v49 = vld [vmem:[%s12509_s4 + $0x208] ss:$16 sps:$4 sm:$0xff]   ;;  %v8447_v50 = vld [vmem:[%s12509_s4 + $0x224] ss:$16 sps:$4 sm:$0xff]  }
 0x109   :  { %5625 = vmatpush1.bf16.msra.mxu1 %v8352_v51  ;;  %6184 = vmatpush1.bf16.msra.mxu0 %v8355_v52  ;;  %v8450_v51 = vld [vmem:[%s12509_s4 + $0x22c] ss:$16 sps:$4 sm:$0xff]  }
 0x10a   :  { %5626 = vmatprep.subr.bf16.mxu1 %v8360_v53  ;;  %6185 = vmatprep.subr.bf16.mxu0 %v8363_v54  ;;  %v8537_v52 = vld [vmem:[%s12510_s0 + $0xc] ss:$100 sps:$4 sm:$0xff]   ;;  %v8448_v54 = vld [vmem:[%s12509_s4 + $0x228] ss:$16 sps:$4 sm:$0xff]  }
 0x10b   :  { %v8445_v53 = vld [vmem:[%s12509_s4 + $0x220] ss:$16 sps:$4 sm:$0xff]  }
 0x10d   :  { %5627 = vmatpush1.bf16.msra.mxu1 %v8358_v55  ;;  %6186 = vmatpush1.bf16.msra.mxu0 %v8361_v56  ;;  %v8453_v55 = vld [vmem:[%s12509_s4 + $0x244] ss:$16 sps:$4 sm:$0xff]   ;;  %v8456_v56 = vld [vmem:[%s12509_s4 + $0x24c] ss:$16 sps:$4 sm:$0xff]  }
 0x10e   :  { %5628 = vmatprep.subr.bf16.mxu1 %v8366_v57  ;;  %6187 = vmatprep.subr.bf16.mxu0 %v8369_v58  ;;  %v8451_v57 = vld [vmem:[%s12509_s4 + $0x240] ss:$16 sps:$4 sm:$0xff]   ;;  %v8454_v58 = vld [vmem:[%s12509_s4 + $0x248] ss:$16 sps:$4 sm:$0xff]  }
 0x111   :  { %5629 = vmatpush1.bf16.msra.mxu1 %v8364_v59  ;;  %6188 = vmatpush1.bf16.msra.mxu0 %v8367_v60  ;;  %v8459_v59 = vld [vmem:[%s12509_s4 + $0x264] ss:$16 sps:$4 sm:$0xff]   ;;  %v8462_v60 = vld [vmem:[%s12509_s4 + $0x26c] ss:$16 sps:$4 sm:$0xff]  }
 0x112   :  { %5630 = vmatprep.subr.bf16.mxu1 %v8372_v61  ;;  %6189 = vmatprep.subr.bf16.mxu0 %v8375_v62  ;;  %v8457_v61 = vld [vmem:[%s12509_s4 + $0x260] ss:$16 sps:$4 sm:$0xff]   ;;  %v8460_v62 = vld [vmem:[%s12509_s4 + $0x268] ss:$16 sps:$4 sm:$0xff]  }
 0x115   :  { %5631 = vmatpush1.bf16.msra.mxu1 %v8370_v63  ;;  %6190 = vmatpush1.bf16.msra.mxu0 %v8373_v0  ;;  %v8465_v63 = vld [vmem:[%s12509_s4 + $0x284] ss:$16 sps:$4 sm:$0xff]   ;;  %v8468_v0 = vld [vmem:[%s12509_s4 + $0x28c] ss:$16 sps:$4 sm:$0xff]  }
 0x116   :  { %5632 = vmatprep.subr.bf16.mxu1 %v8378_v2  ;;  %6191 = vmatprep.subr.bf16.mxu0 %v8381_v3  ;;  %v8463_v2 = vld [vmem:[%s12509_s4 + $0x280] ss:$16 sps:$4 sm:$0xff]   ;;  %v8466_v3 = vld [vmem:[%s12509_s4 + $0x288] ss:$16 sps:$4 sm:$0xff]  }
 0x119   :  { %5633 = vmatpush1.bf16.msra.mxu1 %v8376_v4  ;;  %6192 = vmatpush1.bf16.msra.mxu0 %v8379_v5  ;;  %v8471_v4 = vld [vmem:[%s12509_s4 + $0x2a4] ss:$16 sps:$4 sm:$0xff]   ;;  %v8474_v5 = vld [vmem:[%s12509_s4 + $0x2ac] ss:$16 sps:$4 sm:$0xff]  }
 0x11a   :  { %5634 = vmatprep.subr.bf16.mxu1 %v8384_v6  ;;  %6193 = vmatprep.subr.bf16.mxu0 %v8387_v7  ;;  %v8469_v6 = vld [vmem:[%s12509_s4 + $0x2a0] ss:$16 sps:$4 sm:$0xff]   ;;  %v8472_v7 = vld [vmem:[%s12509_s4 + $0x2a8] ss:$16 sps:$4 sm:$0xff]  }
 0x11d   :  { %5635 = vmatpush1.bf16.msra.mxu1 %v8382_v8  ;;  %6194 = vmatpush1.bf16.msra.mxu0 %v8385_v9  ;;  %v8477_v8 = vld [vmem:[%s12509_s4 + $0x2c4] ss:$16 sps:$4 sm:$0xff]   ;;  %v8480_v9 = vld [vmem:[%s12509_s4 + $0x2cc] ss:$16 sps:$4 sm:$0xff]  }
 0x11e   :  { %5636 = vmatprep.subr.bf16.mxu1 %v8390_v10  ;;  %6195 = vmatprep.subr.bf16.mxu0 %v8393_v11  ;;  %v8475_v10 = vld [vmem:[%s12509_s4 + $0x2c0] ss:$16 sps:$4 sm:$0xff]   ;;  %v8478_v11 = vld [vmem:[%s12509_s4 + $0x2c8] ss:$16 sps:$4 sm:$0xff]  }
 0x121   :  { %5637 = vmatpush1.bf16.msra.mxu1 %v8388_v12  ;;  %6196 = vmatpush1.bf16.msra.mxu0 %v8391_v13  ;;  %v8483_v12 = vld [vmem:[%s12509_s4 + $0x2e4] ss:$16 sps:$4 sm:$0xff]   ;;  %v8486_v13 = vld [vmem:[%s12509_s4 + $0x2ec] ss:$16 sps:$4 sm:$0xff]  }
 0x122   :  { %5638 = vmatprep.subr.bf16.mxu1 %v8396_v14  ;;  %6197 = vmatprep.subr.bf16.mxu0 %v8399_v15  ;;  %v8481_v14 = vld [vmem:[%s12509_s4 + $0x2e0] ss:$16 sps:$4 sm:$0xff]   ;;  %v8484_v15 = vld [vmem:[%s12509_s4 + $0x2e8] ss:$16 sps:$4 sm:$0xff]  }
 0x125   :  { %5639 = vmatpush1.bf16.msra.mxu1 %v8394_v16  ;;  %6198 = vmatpush1.bf16.msra.mxu0 %v8397_v17  ;;  %v8489_v16 = vld [vmem:[%s12509_s4 + $0x304] ss:$16 sps:$4 sm:$0xff]   ;;  %v8492_v17 = vld [vmem:[%s12509_s4 + $0x30c] ss:$16 sps:$4 sm:$0xff]  }
 0x126   :  { %5640 = vmatprep.subr.bf16.mxu1 %v8402_v18  ;;  %6199 = vmatprep.subr.bf16.mxu0 %v8405_v19  ;;  %v8487_v18 = vld [vmem:[%s12509_s4 + $0x300] ss:$16 sps:$4 sm:$0xff]   ;;  %v8490_v19 = vld [vmem:[%s12509_s4 + $0x308] ss:$16 sps:$4 sm:$0xff]  }
 0x129   :  { %5641 = vmatpush1.bf16.msra.mxu1 %v8400_v20  ;;  %6200 = vmatpush1.bf16.msra.mxu0 %v8403_v21  ;;  %v8495_v20 = vld [vmem:[%s12509_s4 + $0x324] ss:$16 sps:$4 sm:$0xff]   ;;  %v8498_v21 = vld [vmem:[%s12509_s4 + $0x32c] ss:$16 sps:$4 sm:$0xff]  }
 0x12a   :  { %5642 = vmatprep.subr.bf16.mxu1 %v8408_v23  ;;  %6201 = vmatprep.subr.bf16.mxu0 %v8411_v26  ;;  %v8493_v23 = vld [vmem:[%s12509_s4 + $0x320] ss:$16 sps:$4 sm:$0xff]   ;;  %v8496_v26 = vld [vmem:[%s12509_s4 + $0x328] ss:$16 sps:$4 sm:$0xff]  }
 0x12d   :  { %5643 = vmatpush1.bf16.msra.mxu1 %v8406_v27  ;;  %6202 = vmatpush1.bf16.msra.mxu0 %v8409_v28  ;;  %v8501_v27 = vld [vmem:[%s12509_s4 + $0x344] ss:$16 sps:$4 sm:$0xff]   ;;  %v8504_v28 = vld [vmem:[%s12509_s4 + $0x34c] ss:$16 sps:$4 sm:$0xff]  }
 0x12e   :  { %5644 = vmatprep.subr.bf16.mxu1 %v8414_v29  ;;  %6203 = vmatprep.subr.bf16.mxu0 %v8417_v30  ;;  %v8499_v29 = vld [vmem:[%s12509_s4 + $0x340] ss:$16 sps:$4 sm:$0xff]   ;;  %v8502_v30 = vld [vmem:[%s12509_s4 + $0x348] ss:$16 sps:$4 sm:$0xff]  }
 0x131   :  { %5645 = vmatpush1.bf16.msra.mxu1 %v8412_v31  ;;  %6204 = vmatpush1.bf16.msra.mxu0 %v8415_v32  ;;  %v8507_v31 = vld [vmem:[%s12509_s4 + $0x364] ss:$16 sps:$4 sm:$0xff]   ;;  %v8510_v32 = vld [vmem:[%s12509_s4 + $0x36c] ss:$16 sps:$4 sm:$0xff]  }
 0x132   :  { %5646 = vmatprep.subr.bf16.mxu1 %v8420_v33  ;;  %6205 = vmatprep.subr.bf16.mxu0 %v8423_v34  ;;  %v8505_v33 = vld [vmem:[%s12509_s4 + $0x360] ss:$16 sps:$4 sm:$0xff]   ;;  %v8508_v34 = vld [vmem:[%s12509_s4 + $0x368] ss:$16 sps:$4 sm:$0xff]  }
 0x135   :  { %5647 = vmatpush1.bf16.msra.mxu1 %v8418_v35  ;;  %6206 = vmatpush1.bf16.msra.mxu0 %v8421_v36  ;;  %v8513_v35 = vld [vmem:[%s12509_s4 + $0x384] ss:$16 sps:$4 sm:$0xff]   ;;  %v8516_v36 = vld [vmem:[%s12509_s4 + $0x38c] ss:$16 sps:$4 sm:$0xff]  }
 0x136   :  { %5648 = vmatprep.subr.bf16.mxu1 %v8426_v37  ;;  %6207 = vmatprep.subr.bf16.mxu0 %v8429_v38  ;;  %v8511_v37 = vld [vmem:[%s12509_s4 + $0x380] ss:$16 sps:$4 sm:$0xff]   ;;  %v8514_v38 = vld [vmem:[%s12509_s4 + $0x388] ss:$16 sps:$4 sm:$0xff]  }
 0x139   :  { %5649 = vmatpush1.bf16.msra.mxu1 %v8424_v39  ;;  %6208 = vmatpush1.bf16.msra.mxu0 %v8427_v40  ;;  %v8519_v39 = vld [vmem:[%s12509_s4 + $0x3a4] ss:$16 sps:$4 sm:$0xff]   ;;  %v8522_v40 = vld [vmem:[%s12509_s4 + $0x3ac] ss:$16 sps:$4 sm:$0xff]  }
 0x13a   :  { %5650 = vmatprep.subr.bf16.mxu1 %v8432_v41  ;;  %6209 = vmatprep.subr.bf16.mxu0 %v8435_v42  ;;  %v8517_v41 = vld [vmem:[%s12509_s4 + $0x3a0] ss:$16 sps:$4 sm:$0xff]   ;;  %v8520_v42 = vld [vmem:[%s12509_s4 + $0x3a8] ss:$16 sps:$4 sm:$0xff]  }
 0x13d   :  { %5651 = vmatpush1.bf16.msra.mxu1 %v8430_v43  ;;  %6210 = vmatpush1.bf16.msra.mxu0 %v8433_v44  ;;  %v8525_v43 = vld [vmem:[%s12509_s4 + $0x3c4] ss:$16 sps:$4 sm:$0xff]   ;;  %v8528_v44 = vld [vmem:[%s12509_s4 + $0x3cc] ss:$16 sps:$4 sm:$0xff]  }
 0x13e   :  { %5663 = vmatprep.subr.bf16.mxu1 %v8441_v45  ;;  %6222 = vmatprep.subr.bf16.mxu0 %v8444_v47  ;;  %v8523_v45 = vld [vmem:[%s12509_s4 + $0x3c0] ss:$16 sps:$4 sm:$0xff]   ;;  %v8531_v47 = vld [vmem:[%s12509_s4 + $0x3e4] ss:$16 sps:$4 sm:$0xff]  }
 0x140   :  { %5653 = vmatmul.mubr.bf16.vlgmr.msra.gmra.mrb[0].mxu1 %v8436_v46  ;;  %6212 = vmatmul.mubr.bf16.vlgmr.msra.gmra.mrb[4].mxu0 %v8436_v46  ;;  %v8526_v46 = vld [vmem:[%s12509_s4 + $0x3c8] ss:$16 sps:$4 sm:$0xff]  }
 0x141   :  { %5664 = vmatpush1.bf16.msra.mxu1 %v8439_v48  ;;  %6223 = vmatpush1.bf16.msra.mxu0 %v8442_v49  ;;  %v8534_v48 = vld [vmem:[%s12509_s4 + $0x3ec] ss:$16 sps:$4 sm:$0xff]   ;;  %v8529_v49 = vld [vmem:[%s12509_s4 + $0x3e0] ss:$16 sps:$4 sm:$0xff]  }
 0x142   :  { %5665 = vmatprep.subr.bf16.mxu1 %v8447_v50  ;;  %6224 = vmatprep.subr.bf16.mxu0 %v8450_v51  ;;  %v8532_v50 = vld [vmem:[%s12509_s4 + $0x3e8] ss:$16 sps:$4 sm:$0xff]  }
 0x143   :  { %5695 = vmatprep.mubr.bf16.mxu1 %v8537_v52  ;;  %6254 = vmatprep.mubr.bf16.mxu0 %v8537_v52  ;;  %v8535_v51 = vld [vmem:[%s12510_s0 + $0x8] ss:$100 sps:$4 sm:$0xff]   ;;  %v8540_v52 = vld [vmem:[%s12509_s4 + $0x404] ss:$16 sps:$4 sm:$0xff]  }
 0x145   :  { %5666 = vmatpush1.bf16.msra.mxu1 %v8445_v53  ;;  %6225 = vmatpush1.bf16.msra.mxu0 %v8448_v54  ;;  %v8543_v53 = vld [vmem:[%s12509_s4 + $0x40c] ss:$16 sps:$4 sm:$0xff]   ;;  %v8538_v54 = vld [vmem:[%s12509_s4 + $0x400] ss:$16 sps:$4 sm:$0xff]  }
 0x146   :  { %5667 = vmatprep.subr.bf16.mxu1 %v8453_v55  ;;  %6226 = vmatprep.subr.bf16.mxu0 %v8456_v56  ;;  %v8541_v55 = vld [vmem:[%s12509_s4 + $0x408] ss:$16 sps:$4 sm:$0xff]   ;;  %v8546_v56 = vld [vmem:[%s12509_s4 + $0x424] ss:$16 sps:$4 sm:$0xff]  }
 0x149   :  { %5668 = vmatpush1.bf16.msra.mxu1 %v8451_v57  ;;  %6227 = vmatpush1.bf16.msra.mxu0 %v8454_v58  ;;  %v8549_v57 = vld [vmem:[%s12509_s4 + $0x42c] ss:$16 sps:$4 sm:$0xff]   ;;  %v8636_v58 = vld [vmem:[%s12510_s0 + $0x14] ss:$100 sps:$4 sm:$0xff]  }
 0x14a   :  { %5669 = vmatprep.subr.bf16.mxu1 %v8459_v59  ;;  %6228 = vmatprep.subr.bf16.mxu0 %v8462_v60  ;;  %v8544_v59 = vld [vmem:[%s12509_s4 + $0x420] ss:$16 sps:$4 sm:$0xff]   ;;  %v8547_v60 = vld [vmem:[%s12509_s4 + $0x428] ss:$16 sps:$4 sm:$0xff]  }
 0x14d   :  { %5670 = vmatpush1.bf16.msra.mxu1 %v8457_v61  ;;  %6229 = vmatpush1.bf16.msra.mxu0 %v8460_v62  ;;  %v8552_v61 = vld [vmem:[%s12509_s4 + $0x444] ss:$16 sps:$4 sm:$0xff]   ;;  %v8555_v62 = vld [vmem:[%s12509_s4 + $0x44c] ss:$16 sps:$4 sm:$0xff]  }
 0x14e   :  { %5671 = vmatprep.subr.bf16.mxu1 %v8465_v63  ;;  %6230 = vmatprep.subr.bf16.mxu0 %v8468_v0  ;;  %v8550_v63 = vld [vmem:[%s12509_s4 + $0x440] ss:$16 sps:$4 sm:$0xff]   ;;  %v8553_v0 = vld [vmem:[%s12509_s4 + $0x448] ss:$16 sps:$4 sm:$0xff]  }
 0x151   :  { %5672 = vmatpush1.bf16.msra.mxu1 %v8463_v2  ;;  %6231 = vmatpush1.bf16.msra.mxu0 %v8466_v3  ;;  %v8558_v2 = vld [vmem:[%s12509_s4 + $0x464] ss:$16 sps:$4 sm:$0xff]   ;;  %v8561_v3 = vld [vmem:[%s12509_s4 + $0x46c] ss:$16 sps:$4 sm:$0xff]  }
 0x152   :  { %5673 = vmatprep.subr.bf16.mxu1 %v8471_v4  ;;  %6232 = vmatprep.subr.bf16.mxu0 %v8474_v5  ;;  %v8556_v4 = vld [vmem:[%s12509_s4 + $0x460] ss:$16 sps:$4 sm:$0xff]   ;;  %v8559_v5 = vld [vmem:[%s12509_s4 + $0x468] ss:$16 sps:$4 sm:$0xff]  }
 0x155   :  { %5674 = vmatpush1.bf16.msra.mxu1 %v8469_v6  ;;  %6233 = vmatpush1.bf16.msra.mxu0 %v8472_v7  ;;  %v8564_v6 = vld [vmem:[%s12509_s4 + $0x484] ss:$16 sps:$4 sm:$0xff]   ;;  %v8567_v7 = vld [vmem:[%s12509_s4 + $0x48c] ss:$16 sps:$4 sm:$0xff]  }
 0x156   :  { %5675 = vmatprep.subr.bf16.mxu1 %v8477_v8  ;;  %6234 = vmatprep.subr.bf16.mxu0 %v8480_v9  ;;  %v8562_v8 = vld [vmem:[%s12509_s4 + $0x480] ss:$16 sps:$4 sm:$0xff]   ;;  %v8565_v9 = vld [vmem:[%s12509_s4 + $0x488] ss:$16 sps:$4 sm:$0xff]  }
 0x159   :  { %5676 = vmatpush1.bf16.msra.mxu1 %v8475_v10  ;;  %6235 = vmatpush1.bf16.msra.mxu0 %v8478_v11  ;;  %v8570_v10 = vld [vmem:[%s12509_s4 + $0x4a4] ss:$16 sps:$4 sm:$0xff]   ;;  %v8573_v11 = vld [vmem:[%s12509_s4 + $0x4ac] ss:$16 sps:$4 sm:$0xff]  }
 0x15a   :  { %5677 = vmatprep.subr.bf16.mxu1 %v8483_v12  ;;  %6236 = vmatprep.subr.bf16.mxu0 %v8486_v13  ;;  %v8568_v12 = vld [vmem:[%s12509_s4 + $0x4a0] ss:$16 sps:$4 sm:$0xff]   ;;  %v8571_v13 = vld [vmem:[%s12509_s4 + $0x4a8] ss:$16 sps:$4 sm:$0xff]  }
 0x15d   :  { %5678 = vmatpush1.bf16.msra.mxu1 %v8481_v14  ;;  %6237 = vmatpush1.bf16.msra.mxu0 %v8484_v15  ;;  %v8576_v14 = vld [vmem:[%s12509_s4 + $0x4c4] ss:$16 sps:$4 sm:$0xff]   ;;  %v8579_v15 = vld [vmem:[%s12509_s4 + $0x4cc] ss:$16 sps:$4 sm:$0xff]  }
 0x15e   :  { %5679 = vmatprep.subr.bf16.mxu1 %v8489_v16  ;;  %6238 = vmatprep.subr.bf16.mxu0 %v8492_v17  ;;  %v8574_v16 = vld [vmem:[%s12509_s4 + $0x4c0] ss:$16 sps:$4 sm:$0xff]   ;;  %v8577_v17 = vld [vmem:[%s12509_s4 + $0x4c8] ss:$16 sps:$4 sm:$0xff]  }
 0x161   :  { %5680 = vmatpush1.bf16.msra.mxu1 %v8487_v18  ;;  %6239 = vmatpush1.bf16.msra.mxu0 %v8490_v19  ;;  %v8582_v18 = vld [vmem:[%s12509_s4 + $0x4e4] ss:$16 sps:$4 sm:$0xff]   ;;  %v8585_v19 = vld [vmem:[%s12509_s4 + $0x4ec] ss:$16 sps:$4 sm:$0xff]  }
 0x162   :  { %5681 = vmatprep.subr.bf16.mxu1 %v8495_v20  ;;  %6240 = vmatprep.subr.bf16.mxu0 %v8498_v21  ;;  %v8580_v20 = vld [vmem:[%s12509_s4 + $0x4e0] ss:$16 sps:$4 sm:$0xff]   ;;  %v8583_v21 = vld [vmem:[%s12509_s4 + $0x4e8] ss:$16 sps:$4 sm:$0xff]  }
 0x165   :  { %5682 = vmatpush1.bf16.msra.mxu1 %v8493_v23  ;;  %6241 = vmatpush1.bf16.msra.mxu0 %v8496_v26  ;;  %v8588_v23 = vld [vmem:[%s12509_s4 + $0x504] ss:$16 sps:$4 sm:$0xff]   ;;  %v8591_v26 = vld [vmem:[%s12509_s4 + $0x50c] ss:$16 sps:$4 sm:$0xff]  }
 0x166   :  { %5683 = vmatprep.subr.bf16.mxu1 %v8501_v27  ;;  %6242 = vmatprep.subr.bf16.mxu0 %v8504_v28  ;;  %v8586_v27 = vld [vmem:[%s12509_s4 + $0x500] ss:$16 sps:$4 sm:$0xff]   ;;  %v8589_v28 = vld [vmem:[%s12509_s4 + $0x508] ss:$16 sps:$4 sm:$0xff]  }
 0x169   :  { %5684 = vmatpush1.bf16.msra.mxu1 %v8499_v29  ;;  %6243 = vmatpush1.bf16.msra.mxu0 %v8502_v30  ;;  %v8594_v29 = vld [vmem:[%s12509_s4 + $0x524] ss:$16 sps:$4 sm:$0xff]   ;;  %v8597_v30 = vld [vmem:[%s12509_s4 + $0x52c] ss:$16 sps:$4 sm:$0xff]  }
 0x16a   :  { %5685 = vmatprep.subr.bf16.mxu1 %v8507_v31  ;;  %6244 = vmatprep.subr.bf16.mxu0 %v8510_v32  ;;  %v8592_v31 = vld [vmem:[%s12509_s4 + $0x520] ss:$16 sps:$4 sm:$0xff]   ;;  %v8595_v32 = vld [vmem:[%s12509_s4 + $0x528] ss:$16 sps:$4 sm:$0xff]  }
 0x16d   :  { %5686 = vmatpush1.bf16.msra.mxu1 %v8505_v33  ;;  %6245 = vmatpush1.bf16.msra.mxu0 %v8508_v34  ;;  %v8600_v33 = vld [vmem:[%s12509_s4 + $0x544] ss:$16 sps:$4 sm:$0xff]   ;;  %v8603_v34 = vld [vmem:[%s12509_s4 + $0x54c] ss:$16 sps:$4 sm:$0xff]  }
 0x16e   :  { %5687 = vmatprep.subr.bf16.mxu1 %v8513_v35  ;;  %6246 = vmatprep.subr.bf16.mxu0 %v8516_v36  ;;  %v8598_v35 = vld [vmem:[%s12509_s4 + $0x540] ss:$16 sps:$4 sm:$0xff]   ;;  %v8601_v36 = vld [vmem:[%s12509_s4 + $0x548] ss:$16 sps:$4 sm:$0xff]  }
 0x171   :  { %5688 = vmatpush1.bf16.msra.mxu1 %v8511_v37  ;;  %6247 = vmatpush1.bf16.msra.mxu0 %v8514_v38  ;;  %v8606_v37 = vld [vmem:[%s12509_s4 + $0x564] ss:$16 sps:$4 sm:$0xff]   ;;  %v8609_v38 = vld [vmem:[%s12509_s4 + $0x56c] ss:$16 sps:$4 sm:$0xff]  }
 0x172   :  { %5689 = vmatprep.subr.bf16.mxu1 %v8519_v39  ;;  %6248 = vmatprep.subr.bf16.mxu0 %v8522_v40  ;;  %v8604_v39 = vld [vmem:[%s12509_s4 + $0x560] ss:$16 sps:$4 sm:$0xff]   ;;  %v8607_v40 = vld [vmem:[%s12509_s4 + $0x568] ss:$16 sps:$4 sm:$0xff]  }
 0x175   :  { %5690 = vmatpush1.bf16.msra.mxu1 %v8517_v41  ;;  %6249 = vmatpush1.bf16.msra.mxu0 %v8520_v42  ;;  %v8612_v41 = vld [vmem:[%s12509_s4 + $0x584] ss:$16 sps:$4 sm:$0xff]   ;;  %v8615_v42 = vld [vmem:[%s12509_s4 + $0x58c] ss:$16 sps:$4 sm:$0xff]  }
 0x176   :  { %5691 = vmatprep.subr.bf16.mxu1 %v8525_v43  ;;  %6250 = vmatprep.subr.bf16.mxu0 %v8528_v44  ;;  %v8610_v43 = vld [vmem:[%s12509_s4 + $0x580] ss:$16 sps:$4 sm:$0xff]   ;;  %v8613_v44 = vld [vmem:[%s12509_s4 + $0x588] ss:$16 sps:$4 sm:$0xff]  }
 0x179   :  { %5692 = vmatpush1.bf16.msra.mxu1 %v8523_v45  ;;  %6251 = vmatpush1.bf16.msra.mxu0 %v8526_v46  ;;  %v8618_v45 = vld [vmem:[%s12509_s4 + $0x5a4] ss:$16 sps:$4 sm:$0xff]   ;;  %v8621_v46 = vld [vmem:[%s12509_s4 + $0x5ac] ss:$16 sps:$4 sm:$0xff]  }
 0x17a   :  { %5693 = vmatprep.subr.bf16.mxu1 %v8531_v47  ;;  %6252 = vmatprep.subr.bf16.mxu0 %v8534_v48  ;;  %v8616_v47 = vld [vmem:[%s12509_s4 + $0x5a0] ss:$16 sps:$4 sm:$0xff]   ;;  %v8619_v48 = vld [vmem:[%s12509_s4 + $0x5a8] ss:$16 sps:$4 sm:$0xff]  }
 0x17d   :  { %5694 = vmatpush1.bf16.msra.mxu1 %v8529_v49  ;;  %6253 = vmatpush1.bf16.msra.mxu0 %v8532_v50  ;;  %v8624_v49 = vld [vmem:[%s12509_s4 + $0x5c4] ss:$16 sps:$4 sm:$0xff]   ;;  %v8627_v50 = vld [vmem:[%s12509_s4 + $0x5cc] ss:$16 sps:$4 sm:$0xff]  }
 0x17e   :  { %5706 = vmatprep.subr.bf16.mxu1 %v8540_v52  ;;  %6265 = vmatprep.subr.bf16.mxu0 %v8543_v53  ;;  %v8625_v52 = vld [vmem:[%s12509_s4 + $0x5c8] ss:$16 sps:$4 sm:$0xff]   ;;  %v8630_v53 = vld [vmem:[%s12509_s4 + $0x5e4] ss:$16 sps:$4 sm:$0xff]  }
 0x180   :  { %5696 = vmatmul.mubr.bf16.vlgmr.msra.gmra.mrb[0].mxu1 %v8535_v51  ;;  %6255 = vmatmul.mubr.bf16.vlgmr.msra.gmra.mrb[4].mxu0 %v8535_v51  ;;  %v8622_v51 = vld [vmem:[%s12509_s4 + $0x5c0] ss:$16 sps:$4 sm:$0xff]  }
 0x181   :  { %5707 = vmatpush1.bf16.msra.mxu1 %v8538_v54  ;;  %6266 = vmatpush1.bf16.msra.mxu0 %v8541_v55  ;;  %v8633_v54 = vld [vmem:[%s12509_s4 + $0x5ec] ss:$16 sps:$4 sm:$0xff]   ;;  %v8628_v55 = vld [vmem:[%s12509_s4 + $0x5e0] ss:$16 sps:$4 sm:$0xff]  }
 0x182   :  { %5708 = vmatprep.subr.bf16.mxu1 %v8546_v56  ;;  %6267 = vmatprep.subr.bf16.mxu0 %v8549_v57  ;;  %v8631_v56 = vld [vmem:[%s12509_s4 + $0x5e8] ss:$16 sps:$4 sm:$0xff]   ;;  %v8634_v57 = vld [vmem:[%s12510_s0 + $0x10] ss:$100 sps:$4 sm:$0xff]  }
 0x183   :  { %5738 = vmatprep.mubr.bf16.mxu1 %v8636_v58  ;;  %6297 = vmatprep.mubr.bf16.mxu0 %v8636_v58  ;;  %v8639_v58 = vld [vmem:[%s12509_s4 + $0x604] ss:$16 sps:$4 sm:$0xff]  }
 0x185   :  { %5709 = vmatpush1.bf16.msra.mxu1 %v8544_v59  ;;  %6268 = vmatpush1.bf16.msra.mxu0 %v8547_v60  ;;  %v8642_v59 = vld [vmem:[%s12509_s4 + $0x60c] ss:$16 sps:$4 sm:$0xff]   ;;  %v8637_v60 = vld [vmem:[%s12509_s4 + $0x600] ss:$16 sps:$4 sm:$0xff]  }
 0x186   :  { %5710 = vmatprep.subr.bf16.mxu1 %v8552_v61  ;;  %6269 = vmatprep.subr.bf16.mxu0 %v8555_v62  ;;  %v8640_v61 = vld [vmem:[%s12509_s4 + $0x608] ss:$16 sps:$4 sm:$0xff]   ;;  %v8645_v62 = vld [vmem:[%s12509_s4 + $0x624] ss:$16 sps:$4 sm:$0xff]  }
 0x189   :  { %5711 = vmatpush1.bf16.msra.mxu1 %v8550_v63  ;;  %6270 = vmatpush1.bf16.msra.mxu0 %v8553_v0  ;;  %v8648_v63 = vld [vmem:[%s12509_s4 + $0x62c] ss:$16 sps:$4 sm:$0xff]  }
 0x18a   :  { %5712 = vmatprep.subr.bf16.mxu1 %v8558_v2  ;;  %6271 = vmatprep.subr.bf16.mxu0 %v8561_v3  ;;  %v8735_v0 = vld [vmem:[%s12510_s0 + $0x1c] ss:$100 sps:$4 sm:$0xff]   ;;  %v8646_v3 = vld [vmem:[%s12509_s4 + $0x628] ss:$16 sps:$4 sm:$0xff]  }
 0x18b   :  { %v8643_v2 = vld [vmem:[%s12509_s4 + $0x620] ss:$16 sps:$4 sm:$0xff]  }
 0x18d   :  { %5713 = vmatpush1.bf16.msra.mxu1 %v8556_v4  ;;  %6272 = vmatpush1.bf16.msra.mxu0 %v8559_v5  ;;  %v8651_v4 = vld [vmem:[%s12509_s4 + $0x644] ss:$16 sps:$4 sm:$0xff]   ;;  %v8654_v5 = vld [vmem:[%s12509_s4 + $0x64c] ss:$16 sps:$4 sm:$0xff]  }
 0x18e   :  { %5714 = vmatprep.subr.bf16.mxu1 %v8564_v6  ;;  %6273 = vmatprep.subr.bf16.mxu0 %v8567_v7  ;;  %v8649_v6 = vld [vmem:[%s12509_s4 + $0x640] ss:$16 sps:$4 sm:$0xff]   ;;  %v8652_v7 = vld [vmem:[%s12509_s4 + $0x648] ss:$16 sps:$4 sm:$0xff]  }
 0x191   :  { %5715 = vmatpush1.bf16.msra.mxu1 %v8562_v8  ;;  %6274 = vmatpush1.bf16.msra.mxu0 %v8565_v9  ;;  %v8657_v8 = vld [vmem:[%s12509_s4 + $0x664] ss:$16 sps:$4 sm:$0xff]   ;;  %v8660_v9 = vld [vmem:[%s12509_s4 + $0x66c] ss:$16 sps:$4 sm:$0xff]  }
 0x192   :  { %5716 = vmatprep.subr.bf16.mxu1 %v8570_v10  ;;  %6275 = vmatprep.subr.bf16.mxu0 %v8573_v11  ;;  %v8655_v10 = vld [vmem:[%s12509_s4 + $0x660] ss:$16 sps:$4 sm:$0xff]   ;;  %v8658_v11 = vld [vmem:[%s12509_s4 + $0x668] ss:$16 sps:$4 sm:$0xff]  }
 0x195   :  { %5717 = vmatpush1.bf16.msra.mxu1 %v8568_v12  ;;  %6276 = vmatpush1.bf16.msra.mxu0 %v8571_v13  ;;  %v8663_v12 = vld [vmem:[%s12509_s4 + $0x684] ss:$16 sps:$4 sm:$0xff]   ;;  %v8666_v13 = vld [vmem:[%s12509_s4 + $0x68c] ss:$16 sps:$4 sm:$0xff]  }
 0x196   :  { %5718 = vmatprep.subr.bf16.mxu1 %v8576_v14  ;;  %6277 = vmatprep.subr.bf16.mxu0 %v8579_v15  ;;  %v8661_v14 = vld [vmem:[%s12509_s4 + $0x680] ss:$16 sps:$4 sm:$0xff]   ;;  %v8664_v15 = vld [vmem:[%s12509_s4 + $0x688] ss:$16 sps:$4 sm:$0xff]  }
 0x199   :  { %5719 = vmatpush1.bf16.msra.mxu1 %v8574_v16  ;;  %6278 = vmatpush1.bf16.msra.mxu0 %v8577_v17  ;;  %v8669_v16 = vld [vmem:[%s12509_s4 + $0x6a4] ss:$16 sps:$4 sm:$0xff]   ;;  %v8672_v17 = vld [vmem:[%s12509_s4 + $0x6ac] ss:$16 sps:$4 sm:$0xff]  }
 0x19a   :  { %5720 = vmatprep.subr.bf16.mxu1 %v8582_v18  ;;  %6279 = vmatprep.subr.bf16.mxu0 %v8585_v19  ;;  %v8667_v18 = vld [vmem:[%s12509_s4 + $0x6a0] ss:$16 sps:$4 sm:$0xff]   ;;  %v8670_v19 = vld [vmem:[%s12509_s4 + $0x6a8] ss:$16 sps:$4 sm:$0xff]  }
 0x19d   :  { %5721 = vmatpush1.bf16.msra.mxu1 %v8580_v20  ;;  %6280 = vmatpush1.bf16.msra.mxu0 %v8583_v21  ;;  %v8675_v20 = vld [vmem:[%s12509_s4 + $0x6c4] ss:$16 sps:$4 sm:$0xff]   ;;  %v8678_v21 = vld [vmem:[%s12509_s4 + $0x6cc] ss:$16 sps:$4 sm:$0xff]  }
 0x19e   :  { %5722 = vmatprep.subr.bf16.mxu1 %v8588_v23  ;;  %6281 = vmatprep.subr.bf16.mxu0 %v8591_v26  ;;  %v8673_v23 = vld [vmem:[%s12509_s4 + $0x6c0] ss:$16 sps:$4 sm:$0xff]   ;;  %v8676_v26 = vld [vmem:[%s12509_s4 + $0x6c8] ss:$16 sps:$4 sm:$0xff]  }
 0x1a1   :  { %5723 = vmatpush1.bf16.msra.mxu1 %v8586_v27  ;;  %6282 = vmatpush1.bf16.msra.mxu0 %v8589_v28  ;;  %v8681_v27 = vld [vmem:[%s12509_s4 + $0x6e4] ss:$16 sps:$4 sm:$0xff]   ;;  %v8684_v28 = vld [vmem:[%s12509_s4 + $0x6ec] ss:$16 sps:$4 sm:$0xff]  }
 0x1a2   :  { %5724 = vmatprep.subr.bf16.mxu1 %v8594_v29  ;;  %6283 = vmatprep.subr.bf16.mxu0 %v8597_v30  ;;  %v8679_v29 = vld [vmem:[%s12509_s4 + $0x6e0] ss:$16 sps:$4 sm:$0xff]   ;;  %v8682_v30 = vld [vmem:[%s12509_s4 + $0x6e8] ss:$16 sps:$4 sm:$0xff]  }
 0x1a5   :  { %5725 = vmatpush1.bf16.msra.mxu1 %v8592_v31  ;;  %6284 = vmatpush1.bf16.msra.mxu0 %v8595_v32  ;;  %v8687_v31 = vld [vmem:[%s12509_s4 + $0x704] ss:$16 sps:$4 sm:$0xff]   ;;  %v8690_v32 = vld [vmem:[%s12509_s4 + $0x70c] ss:$16 sps:$4 sm:$0xff]  }
 0x1a6   :  { %5726 = vmatprep.subr.bf16.mxu1 %v8600_v33  ;;  %6285 = vmatprep.subr.bf16.mxu0 %v8603_v34  ;;  %v8685_v33 = vld [vmem:[%s12509_s4 + $0x700] ss:$16 sps:$4 sm:$0xff]   ;;  %v8688_v34 = vld [vmem:[%s12509_s4 + $0x708] ss:$16 sps:$4 sm:$0xff]  }
 0x1a9   :  { %5727 = vmatpush1.bf16.msra.mxu1 %v8598_v35  ;;  %6286 = vmatpush1.bf16.msra.mxu0 %v8601_v36  ;;  %v8693_v35 = vld [vmem:[%s12509_s4 + $0x724] ss:$16 sps:$4 sm:$0xff]   ;;  %v8696_v36 = vld [vmem:[%s12509_s4 + $0x72c] ss:$16 sps:$4 sm:$0xff]  }
 0x1aa   :  { %5728 = vmatprep.subr.bf16.mxu1 %v8606_v37  ;;  %6287 = vmatprep.subr.bf16.mxu0 %v8609_v38  ;;  %v8691_v37 = vld [vmem:[%s12509_s4 + $0x720] ss:$16 sps:$4 sm:$0xff]   ;;  %v8694_v38 = vld [vmem:[%s12509_s4 + $0x728] ss:$16 sps:$4 sm:$0xff]  }
 0x1ad   :  { %5729 = vmatpush1.bf16.msra.mxu1 %v8604_v39  ;;  %6288 = vmatpush1.bf16.msra.mxu0 %v8607_v40  ;;  %v8699_v39 = vld [vmem:[%s12509_s4 + $0x744] ss:$16 sps:$4 sm:$0xff]   ;;  %v8702_v40 = vld [vmem:[%s12509_s4 + $0x74c] ss:$16 sps:$4 sm:$0xff]  }
 0x1ae   :  { %5730 = vmatprep.subr.bf16.mxu1 %v8612_v41  ;;  %6289 = vmatprep.subr.bf16.mxu0 %v8615_v42  ;;  %v8697_v41 = vld [vmem:[%s12509_s4 + $0x740] ss:$16 sps:$4 sm:$0xff]   ;;  %v8700_v42 = vld [vmem:[%s12509_s4 + $0x748] ss:$16 sps:$4 sm:$0xff]  }
 0x1b1   :  { %5731 = vmatpush1.bf16.msra.mxu1 %v8610_v43  ;;  %6290 = vmatpush1.bf16.msra.mxu0 %v8613_v44  ;;  %v8705_v43 = vld [vmem:[%s12509_s4 + $0x764] ss:$16 sps:$4 sm:$0xff]   ;;  %v8708_v44 = vld [vmem:[%s12509_s4 + $0x76c] ss:$16 sps:$4 sm:$0xff]  }
 0x1b2   :  { %5732 = vmatprep.subr.bf16.mxu1 %v8618_v45  ;;  %6291 = vmatprep.subr.bf16.mxu0 %v8621_v46  ;;  %v8703_v45 = vld [vmem:[%s12509_s4 + $0x760] ss:$16 sps:$4 sm:$0xff]   ;;  %v8706_v46 = vld [vmem:[%s12509_s4 + $0x768] ss:$16 sps:$4 sm:$0xff]  }
 0x1b5   :  { %5733 = vmatpush1.bf16.msra.mxu1 %v8616_v47  ;;  %6292 = vmatpush1.bf16.msra.mxu0 %v8619_v48  ;;  %v8711_v47 = vld [vmem:[%s12509_s4 + $0x784] ss:$16 sps:$4 sm:$0xff]   ;;  %v8714_v48 = vld [vmem:[%s12509_s4 + $0x78c] ss:$16 sps:$4 sm:$0xff]  }
 0x1b6   :  { %5734 = vmatprep.subr.bf16.mxu1 %v8624_v49  ;;  %6293 = vmatprep.subr.bf16.mxu0 %v8627_v50  ;;  %v8709_v49 = vld [vmem:[%s12509_s4 + $0x780] ss:$16 sps:$4 sm:$0xff]   ;;  %v8712_v50 = vld [vmem:[%s12509_s4 + $0x788] ss:$16 sps:$4 sm:$0xff]  }
 0x1b9   :  { %5735 = vmatpush1.bf16.msra.mxu1 %v8622_v51  ;;  %6294 = vmatpush1.bf16.msra.mxu0 %v8625_v52  ;;  %v8717_v51 = vld [vmem:[%s12509_s4 + $0x7a4] ss:$16 sps:$4 sm:$0xff]   ;;  %v8720_v52 = vld [vmem:[%s12509_s4 + $0x7ac] ss:$16 sps:$4 sm:$0xff]  }
 0x1ba   :  { %5736 = vmatprep.subr.bf16.mxu1 %v8630_v53  ;;  %6295 = vmatprep.subr.bf16.mxu0 %v8633_v54  ;;  %v8715_v53 = vld [vmem:[%s12509_s4 + $0x7a0] ss:$16 sps:$4 sm:$0xff]   ;;  %v8718_v54 = vld [vmem:[%s12509_s4 + $0x7a8] ss:$16 sps:$4 sm:$0xff]  }
 0x1bd   :  { %5737 = vmatpush1.bf16.msra.mxu1 %v8628_v55  ;;  %6296 = vmatpush1.bf16.msra.mxu0 %v8631_v56  ;;  %v8723_v55 = vld [vmem:[%s12509_s4 + $0x7c4] ss:$16 sps:$4 sm:$0xff]   ;;  %v8726_v56 = vld [vmem:[%s12509_s4 + $0x7cc] ss:$16 sps:$4 sm:$0xff]  }
 0x1be   :  { %5749 = vmatprep.subr.bf16.mxu1 %v8639_v58  ;;  %6308 = vmatprep.subr.bf16.mxu0 %v8642_v59  ;;  %v8724_v58 = vld [vmem:[%s12509_s4 + $0x7c8] ss:$16 sps:$4 sm:$0xff]   ;;  %v8729_v59 = vld [vmem:[%s12509_s4 + $0x7e4] ss:$16 sps:$4 sm:$0xff]  }
 0x1c0   :  { %5739 = vmatmul.mubr.bf16.vlgmr.msra.gmra.mrb[0].mxu1 %v8634_v57  ;;  %6298 = vmatmul.mubr.bf16.vlgmr.msra.gmra.mrb[4].mxu0 %v8634_v57  ;;  %v8721_v57 = vld [vmem:[%s12509_s4 + $0x7c0] ss:$16 sps:$4 sm:$0xff]  }
 0x1c1   :  { %5750 = vmatpush1.bf16.msra.mxu1 %v8637_v60  ;;  %6309 = vmatpush1.bf16.msra.mxu0 %v8640_v61  ;;  %v8732_v60 = vld [vmem:[%s12509_s4 + $0x7ec] ss:$16 sps:$4 sm:$0xff]   ;;  %v8727_v61 = vld [vmem:[%s12509_s4 + $0x7e0] ss:$16 sps:$4 sm:$0xff]  }
 0x1c2   :  { %5751 = vmatprep.subr.bf16.mxu1 %v8645_v62  ;;  %6310 = vmatprep.subr.bf16.mxu0 %v8648_v63  ;;  %v8730_v62 = vld [vmem:[%s12509_s4 + $0x7e8] ss:$16 sps:$4 sm:$0xff]  }
 0x1c3   :  { %5781 = vmatprep.mubr.bf16.mxu1 %v8735_v0  ;;  %6340 = vmatprep.mubr.bf16.mxu0 %v8735_v0  ;;  %v8733_v63 = vld [vmem:[%s12510_s0 + $0x18] ss:$100 sps:$4 sm:$0xff]   ;;  %v8738_v0 = vld [vmem:[%s12509_s4 + $0x804] ss:$16 sps:$4 sm:$0xff]  }
 0x1c5   :  { %5752 = vmatpush1.bf16.msra.mxu1 %v8643_v2  ;;  %6311 = vmatpush1.bf16.msra.mxu0 %v8646_v3  ;;  %v8741_v2 = vld [vmem:[%s12509_s4 + $0x80c] ss:$16 sps:$4 sm:$0xff]   ;;  %v8736_v3 = vld [vmem:[%s12509_s4 + $0x800] ss:$16 sps:$4 sm:$0xff]  }
 0x1c6   :  { %5753 = vmatprep.subr.bf16.mxu1 %v8651_v4  ;;  %6312 = vmatprep.subr.bf16.mxu0 %v8654_v5  ;;  %v8739_v4 = vld [vmem:[%s12509_s4 + $0x808] ss:$16 sps:$4 sm:$0xff]   ;;  %v8744_v5 = vld [vmem:[%s12509_s4 + $0x824] ss:$16 sps:$4 sm:$0xff]  }
 0x1c9   :  { %5754 = vmatpush1.bf16.msra.mxu1 %v8649_v6  ;;  %6313 = vmatpush1.bf16.msra.mxu0 %v8652_v7  ;;  %v8747_v6 = vld [vmem:[%s12509_s4 + $0x82c] ss:$16 sps:$4 sm:$0xff]   ;;  %v8834_v7 = vld [vmem:[%s12510_s0 + $0x24] ss:$100 sps:$4 sm:$0xff]  }
 0x1ca   :  { %5755 = vmatprep.subr.bf16.mxu1 %v8657_v8  ;;  %6314 = vmatprep.subr.bf16.mxu0 %v8660_v9  ;;  %v8742_v8 = vld [vmem:[%s12509_s4 + $0x820] ss:$16 sps:$4 sm:$0xff]   ;;  %v8745_v9 = vld [vmem:[%s12509_s4 + $0x828] ss:$16 sps:$4 sm:$0xff]  }
 0x1cd   :  { %5756 = vmatpush1.bf16.msra.mxu1 %v8655_v10  ;;  %6315 = vmatpush1.bf16.msra.mxu0 %v8658_v11  ;;  %v8750_v10 = vld [vmem:[%s12509_s4 + $0x844] ss:$16 sps:$4 sm:$0xff]   ;;  %v8753_v11 = vld [vmem:[%s12509_s4 + $0x84c] ss:$16 sps:$4 sm:$0xff]  }
 0x1ce   :  { %5757 = vmatprep.subr.bf16.mxu1 %v8663_v12  ;;  %6316 = vmatprep.subr.bf16.mxu0 %v8666_v13  ;;  %v8748_v12 = vld [vmem:[%s12509_s4 + $0x840] ss:$16 sps:$4 sm:$0xff]   ;;  %v8751_v13 = vld [vmem:[%s12509_s4 + $0x848] ss:$16 sps:$4 sm:$0xff]  }
 0x1d1   :  { %5758 = vmatpush1.bf16.msra.mxu1 %v8661_v14  ;;  %6317 = vmatpush1.bf16.msra.mxu0 %v8664_v15  ;;  %v8756_v14 = vld [vmem:[%s12509_s4 + $0x864] ss:$16 sps:$4 sm:$0xff]   ;;  %v8759_v15 = vld [vmem:[%s12509_s4 + $0x86c] ss:$16 sps:$4 sm:$0xff]  }
 0x1d2   :  { %5759 = vmatprep.subr.bf16.mxu1 %v8669_v16  ;;  %6318 = vmatprep.subr.bf16.mxu0 %v8672_v17  ;;  %v8754_v16 = vld [vmem:[%s12509_s4 + $0x860] ss:$16 sps:$4 sm:$0xff]   ;;  %v8757_v17 = vld [vmem:[%s12509_s4 + $0x868] ss:$16 sps:$4 sm:$0xff]  }
 0x1d5   :  { %5760 = vmatpush1.bf16.msra.mxu1 %v8667_v18  ;;  %6319 = vmatpush1.bf16.msra.mxu0 %v8670_v19  ;;  %v8762_v18 = vld [vmem:[%s12509_s4 + $0x884] ss:$16 sps:$4 sm:$0xff]   ;;  %v8765_v19 = vld [vmem:[%s12509_s4 + $0x88c] ss:$16 sps:$4 sm:$0xff]  }
 0x1d6   :  { %5761 = vmatprep.subr.bf16.mxu1 %v8675_v20  ;;  %6320 = vmatprep.subr.bf16.mxu0 %v8678_v21  ;;  %v8760_v20 = vld [vmem:[%s12509_s4 + $0x880] ss:$16 sps:$4 sm:$0xff]   ;;  %v8763_v21 = vld [vmem:[%s12509_s4 + $0x888] ss:$16 sps:$4 sm:$0xff]  }
 0x1d9   :  { %5762 = vmatpush1.bf16.msra.mxu1 %v8673_v23  ;;  %6321 = vmatpush1.bf16.msra.mxu0 %v8676_v26  ;;  %v8768_v23 = vld [vmem:[%s12509_s4 + $0x8a4] ss:$16 sps:$4 sm:$0xff]   ;;  %v8771_v26 = vld [vmem:[%s12509_s4 + $0x8ac] ss:$16 sps:$4 sm:$0xff]  }
 0x1da   :  { %5763 = vmatprep.subr.bf16.mxu1 %v8681_v27  ;;  %6322 = vmatprep.subr.bf16.mxu0 %v8684_v28  ;;  %v8766_v27 = vld [vmem:[%s12509_s4 + $0x8a0] ss:$16 sps:$4 sm:$0xff]   ;;  %v8769_v28 = vld [vmem:[%s12509_s4 + $0x8a8] ss:$16 sps:$4 sm:$0xff]  }
 0x1dd   :  { %5764 = vmatpush1.bf16.msra.mxu1 %v8679_v29  ;;  %6323 = vmatpush1.bf16.msra.mxu0 %v8682_v30  ;;  %v8774_v29 = vld [vmem:[%s12509_s4 + $0x8c4] ss:$16 sps:$4 sm:$0xff]   ;;  %v8777_v30 = vld [vmem:[%s12509_s4 + $0x8cc] ss:$16 sps:$4 sm:$0xff]  }
 0x1de   :  { %5765 = vmatprep.subr.bf16.mxu1 %v8687_v31  ;;  %6324 = vmatprep.subr.bf16.mxu0 %v8690_v32  ;;  %v8772_v31 = vld [vmem:[%s12509_s4 + $0x8c0] ss:$16 sps:$4 sm:$0xff]   ;;  %v8775_v32 = vld [vmem:[%s12509_s4 + $0x8c8] ss:$16 sps:$4 sm:$0xff]  }
 0x1e1   :  { %5766 = vmatpush1.bf16.msra.mxu1 %v8685_v33  ;;  %6325 = vmatpush1.bf16.msra.mxu0 %v8688_v34  ;;  %v8780_v33 = vld [vmem:[%s12509_s4 + $0x8e4] ss:$16 sps:$4 sm:$0xff]   ;;  %v8783_v34 = vld [vmem:[%s12509_s4 + $0x8ec] ss:$16 sps:$4 sm:$0xff]  }
 0x1e2   :  { %5767 = vmatprep.subr.bf16.mxu1 %v8693_v35  ;;  %6326 = vmatprep.subr.bf16.mxu0 %v8696_v36  ;;  %v8778_v35 = vld [vmem:[%s12509_s4 + $0x8e0] ss:$16 sps:$4 sm:$0xff]   ;;  %v8781_v36 = vld [vmem:[%s12509_s4 + $0x8e8] ss:$16 sps:$4 sm:$0xff]  }
 0x1e5   :  { %5768 = vmatpush1.bf16.msra.mxu1 %v8691_v37  ;;  %6327 = vmatpush1.bf16.msra.mxu0 %v8694_v38  ;;  %v8786_v37 = vld [vmem:[%s12509_s4 + $0x904] ss:$16 sps:$4 sm:$0xff]   ;;  %v8789_v38 = vld [vmem:[%s12509_s4 + $0x90c] ss:$16 sps:$4 sm:$0xff]  }
 0x1e6   :  { %5769 = vmatprep.subr.bf16.mxu1 %v8699_v39  ;;  %6328 = vmatprep.subr.bf16.mxu0 %v8702_v40  ;;  %v8784_v39 = vld [vmem:[%s12509_s4 + $0x900] ss:$16 sps:$4 sm:$0xff]   ;;  %v8787_v40 = vld [vmem:[%s12509_s4 + $0x908] ss:$16 sps:$4 sm:$0xff]  }
 0x1e9   :  { %5770 = vmatpush1.bf16.msra.mxu1 %v8697_v41  ;;  %6329 = vmatpush1.bf16.msra.mxu0 %v8700_v42  ;;  %v8792_v41 = vld [vmem:[%s12509_s4 + $0x924] ss:$16 sps:$4 sm:$0xff]   ;;  %v8795_v42 = vld [vmem:[%s12509_s4 + $0x92c] ss:$16 sps:$4 sm:$0xff]  }
 0x1ea   :  { %5771 = vmatprep.subr.bf16.mxu1 %v8705_v43  ;;  %6330 = vmatprep.subr.bf16.mxu0 %v8708_v44  ;;  %v8790_v43 = vld [vmem:[%s12509_s4 + $0x920] ss:$16 sps:$4 sm:$0xff]   ;;  %v8793_v44 = vld [vmem:[%s12509_s4 + $0x928] ss:$16 sps:$4 sm:$0xff]  }
 0x1ed   :  { %5772 = vmatpush1.bf16.msra.mxu1 %v8703_v45  ;;  %6331 = vmatpush1.bf16.msra.mxu0 %v8706_v46  ;;  %v8798_v45 = vld [vmem:[%s12509_s4 + $0x944] ss:$16 sps:$4 sm:$0xff]   ;;  %v8801_v46 = vld [vmem:[%s12509_s4 + $0x94c] ss:$16 sps:$4 sm:$0xff]  }
 0x1ee   :  { %5773 = vmatprep.subr.bf16.mxu1 %v8711_v47  ;;  %6332 = vmatprep.subr.bf16.mxu0 %v8714_v48  ;;  %v8796_v47 = vld [vmem:[%s12509_s4 + $0x940] ss:$16 sps:$4 sm:$0xff]   ;;  %v8799_v48 = vld [vmem:[%s12509_s4 + $0x948] ss:$16 sps:$4 sm:$0xff]  }
 0x1f1   :  { %5774 = vmatpush1.bf16.msra.mxu1 %v8709_v49  ;;  %6333 = vmatpush1.bf16.msra.mxu0 %v8712_v50  ;;  %v8804_v49 = vld [vmem:[%s12509_s4 + $0x964] ss:$16 sps:$4 sm:$0xff]   ;;  %v8807_v50 = vld [vmem:[%s12509_s4 + $0x96c] ss:$16 sps:$4 sm:$0xff]  }
 0x1f2   :  { %5775 = vmatprep.subr.bf16.mxu1 %v8717_v51  ;;  %6334 = vmatprep.subr.bf16.mxu0 %v8720_v52  ;;  %v8802_v51 = vld [vmem:[%s12509_s4 + $0x960] ss:$16 sps:$4 sm:$0xff]   ;;  %v8805_v52 = vld [vmem:[%s12509_s4 + $0x968] ss:$16 sps:$4 sm:$0xff]  }
 0x1f5   :  { %5776 = vmatpush1.bf16.msra.mxu1 %v8715_v53  ;;  %6335 = vmatpush1.bf16.msra.mxu0 %v8718_v54  ;;  %v8810_v53 = vld [vmem:[%s12509_s4 + $0x984] ss:$16 sps:$4 sm:$0xff]   ;;  %v8813_v54 = vld [vmem:[%s12509_s4 + $0x98c] ss:$16 sps:$4 sm:$0xff]  }
 0x1f6   :  { %5777 = vmatprep.subr.bf16.mxu1 %v8723_v55  ;;  %6336 = vmatprep.subr.bf16.mxu0 %v8726_v56  ;;  %v8808_v55 = vld [vmem:[%s12509_s4 + $0x980] ss:$16 sps:$4 sm:$0xff]   ;;  %v8811_v56 = vld [vmem:[%s12509_s4 + $0x988] ss:$16 sps:$4 sm:$0xff]  }
 0x1f9   :  { %5778 = vmatpush1.bf16.msra.mxu1 %v8721_v57  ;;  %6337 = vmatpush1.bf16.msra.mxu0 %v8724_v58  ;;  %v8816_v57 = vld [vmem:[%s12509_s4 + $0x9a4] ss:$16 sps:$4 sm:$0xff]   ;;  %v8819_v58 = vld [vmem:[%s12509_s4 + $0x9ac] ss:$16 sps:$4 sm:$0xff]  }
 0x1fa   :  { %5779 = vmatprep.subr.bf16.mxu1 %v8729_v59  ;;  %6338 = vmatprep.subr.bf16.mxu0 %v8732_v60  ;;  %v8814_v59 = vld [vmem:[%s12509_s4 + $0x9a0] ss:$16 sps:$4 sm:$0xff]   ;;  %v8817_v60 = vld [vmem:[%s12509_s4 + $0x9a8] ss:$16 sps:$4 sm:$0xff]  }
 0x1fd   :  { %5780 = vmatpush1.bf16.msra.mxu1 %v8727_v61  ;;  %6339 = vmatpush1.bf16.msra.mxu0 %v8730_v62  ;;  %v8822_v61 = vld [vmem:[%s12509_s4 + $0x9c4] ss:$16 sps:$4 sm:$0xff]   ;;  %v8825_v62 = vld [vmem:[%s12509_s4 + $0x9cc] ss:$16 sps:$4 sm:$0xff]  }
 0x1fe   :  { %5792 = vmatprep.subr.bf16.mxu1 %v8738_v0  ;;  %6351 = vmatprep.subr.bf16.mxu0 %v8741_v2  ;;  %v8823_v0 = vld [vmem:[%s12509_s4 + $0x9c8] ss:$16 sps:$4 sm:$0xff]   ;;  %v8828_v2 = vld [vmem:[%s12509_s4 + $0x9e4] ss:$16 sps:$4 sm:$0xff]  }
 0x200   :  { %5782 = vmatmul.mubr.bf16.vlgmr.msra.gmra.mrb[0].mxu1 %v8733_v63  ;;  %6341 = vmatmul.mubr.bf16.vlgmr.msra.gmra.mrb[4].mxu0 %v8733_v63  ;;  %v8820_v63 = vld [vmem:[%s12509_s4 + $0x9c0] ss:$16 sps:$4 sm:$0xff]  }
 0x201   :  { %5793 = vmatpush1.bf16.msra.mxu1 %v8736_v3  ;;  %6352 = vmatpush1.bf16.msra.mxu0 %v8739_v4  ;;  %v8831_v3 = vld [vmem:[%s12509_s4 + $0x9ec] ss:$16 sps:$4 sm:$0xff]   ;;  %v8826_v4 = vld [vmem:[%s12509_s4 + $0x9e0] ss:$16 sps:$4 sm:$0xff]  }
 0x202   :  { %5794 = vmatprep.subr.bf16.mxu1 %v8744_v5  ;;  %6353 = vmatprep.subr.bf16.mxu0 %v8747_v6  ;;  %v8829_v5 = vld [vmem:[%s12509_s4 + $0x9e8] ss:$16 sps:$4 sm:$0xff]   ;;  %v8837_v6 = vld [vmem:[%s12509_s4 + $0xa04] ss:$16 sps:$4 sm:$0xff]  }
 0x203   :  { %5824 = vmatprep.mubr.bf16.mxu1 %v8834_v7  ;;  %6383 = vmatprep.mubr.bf16.mxu0 %v8834_v7  ;;  %v8840_v7 = vld [vmem:[%s12509_s4 + $0xa0c] ss:$16 sps:$4 sm:$0xff]  }
 0x205   :  { %5795 = vmatpush1.bf16.msra.mxu1 %v8742_v8  ;;  %6354 = vmatpush1.bf16.msra.mxu0 %v8745_v9  ;;  %v8832_v8 = vld [vmem:[%s12510_s0 + $0x20] ss:$100 sps:$4 sm:$0xff]  }
 0x206   :  { %5796 = vmatprep.subr.bf16.mxu1 %v8750_v10  ;;  %6355 = vmatprep.subr.bf16.mxu0 %v8753_v11  ;;  %v8835_v9 = vld [vmem:[%s12509_s4 + $0xa00] ss:$16 sps:$4 sm:$0xff]   ;;  %v8838_v10 = vld [vmem:[%s12509_s4 + $0xa08] ss:$16 sps:$4 sm:$0xff]   ;;  %v8843_v11 = vld [vmem:[%s12509_s4 + $0xa24] ss:$16 sps:$4 sm:$0xff]  }
 0x209   :  { %5797 = vmatpush1.bf16.msra.mxu1 %v8748_v12  ;;  %6356 = vmatpush1.bf16.msra.mxu0 %v8751_v13  ;;  %v8846_v12 = vld [vmem:[%s12509_s4 + $0xa2c] ss:$16 sps:$4 sm:$0xff]  }
 0x20a   :  { %5798 = vmatprep.subr.bf16.mxu1 %v8756_v14  ;;  %6357 = vmatprep.subr.bf16.mxu0 %v8759_v15  ;;  %v8933_v13 = vld [vmem:[%s12510_s0 + $0x2c] ss:$100 sps:$4 sm:$0xff]   ;;  %v8844_v15 = vld [vmem:[%s12509_s4 + $0xa28] ss:$16 sps:$4 sm:$0xff]  }
 0x20b   :  { %v8841_v14 = vld [vmem:[%s12509_s4 + $0xa20] ss:$16 sps:$4 sm:$0xff]  }
 0x20d   :  { %5799 = vmatpush1.bf16.msra.mxu1 %v8754_v16  ;;  %6358 = vmatpush1.bf16.msra.mxu0 %v8757_v17  ;;  %v8849_v16 = vld [vmem:[%s12509_s4 + $0xa44] ss:$16 sps:$4 sm:$0xff]   ;;  %v8852_v17 = vld [vmem:[%s12509_s4 + $0xa4c] ss:$16 sps:$4 sm:$0xff]  }
 0x20e   :  { %5800 = vmatprep.subr.bf16.mxu1 %v8762_v18  ;;  %6359 = vmatprep.subr.bf16.mxu0 %v8765_v19  ;;  %v8847_v18 = vld [vmem:[%s12509_s4 + $0xa40] ss:$16 sps:$4 sm:$0xff]   ;;  %v8850_v19 = vld [vmem:[%s12509_s4 + $0xa48] ss:$16 sps:$4 sm:$0xff]  }
 0x211   :  { %5801 = vmatpush1.bf16.msra.mxu1 %v8760_v20  ;;  %6360 = vmatpush1.bf16.msra.mxu0 %v8763_v21  ;;  %v8855_v20 = vld [vmem:[%s12509_s4 + $0xa64] ss:$16 sps:$4 sm:$0xff]   ;;  %v8858_v21 = vld [vmem:[%s12509_s4 + $0xa6c] ss:$16 sps:$4 sm:$0xff]  }
 0x212   :  { %5802 = vmatprep.subr.bf16.mxu1 %v8768_v23  ;;  %6361 = vmatprep.subr.bf16.mxu0 %v8771_v26  ;;  %v8853_v23 = vld [vmem:[%s12509_s4 + $0xa60] ss:$16 sps:$4 sm:$0xff]   ;;  %v8856_v26 = vld [vmem:[%s12509_s4 + $0xa68] ss:$16 sps:$4 sm:$0xff]  }
 0x215   :  { %5803 = vmatpush1.bf16.msra.mxu1 %v8766_v27  ;;  %6362 = vmatpush1.bf16.msra.mxu0 %v8769_v28  ;;  %v8861_v27 = vld [vmem:[%s12509_s4 + $0xa84] ss:$16 sps:$4 sm:$0xff]   ;;  %v8864_v28 = vld [vmem:[%s12509_s4 + $0xa8c] ss:$16 sps:$4 sm:$0xff]  }
 0x216   :  { %5804 = vmatprep.subr.bf16.mxu1 %v8774_v29  ;;  %6363 = vmatprep.subr.bf16.mxu0 %v8777_v30  ;;  %v8859_v29 = vld [vmem:[%s12509_s4 + $0xa80] ss:$16 sps:$4 sm:$0xff]   ;;  %v8862_v30 = vld [vmem:[%s12509_s4 + $0xa88] ss:$16 sps:$4 sm:$0xff]  }
 0x219   :  { %5805 = vmatpush1.bf16.msra.mxu1 %v8772_v31  ;;  %6364 = vmatpush1.bf16.msra.mxu0 %v8775_v32  ;;  %v8867_v31 = vld [vmem:[%s12509_s4 + $0xaa4] ss:$16 sps:$4 sm:$0xff]   ;;  %v8870_v32 = vld [vmem:[%s12509_s4 + $0xaac] ss:$16 sps:$4 sm:$0xff]  }
 0x21a   :  { %5806 = vmatprep.subr.bf16.mxu1 %v8780_v33  ;;  %6365 = vmatprep.subr.bf16.mxu0 %v8783_v34  ;;  %v8865_v33 = vld [vmem:[%s12509_s4 + $0xaa0] ss:$16 sps:$4 sm:$0xff]   ;;  %v8868_v34 = vld [vmem:[%s12509_s4 + $0xaa8] ss:$16 sps:$4 sm:$0xff]  }
 0x21d   :  { %5807 = vmatpush1.bf16.msra.mxu1 %v8778_v35  ;;  %6366 = vmatpush1.bf16.msra.mxu0 %v8781_v36  ;;  %v8873_v35 = vld [vmem:[%s12509_s4 + $0xac4] ss:$16 sps:$4 sm:$0xff]   ;;  %v8876_v36 = vld [vmem:[%s12509_s4 + $0xacc] ss:$16 sps:$4 sm:$0xff]  }
 0x21e   :  { %5808 = vmatprep.subr.bf16.mxu1 %v8786_v37  ;;  %6367 = vmatprep.subr.bf16.mxu0 %v8789_v38  ;;  %v8871_v37 = vld [vmem:[%s12509_s4 + $0xac0] ss:$16 sps:$4 sm:$0xff]   ;;  %v8874_v38 = vld [vmem:[%s12509_s4 + $0xac8] ss:$16 sps:$4 sm:$0xff]  }
 0x221   :  { %5809 = vmatpush1.bf16.msra.mxu1 %v8784_v39  ;;  %6368 = vmatpush1.bf16.msra.mxu0 %v8787_v40  ;;  %v8879_v39 = vld [vmem:[%s12509_s4 + $0xae4] ss:$16 sps:$4 sm:$0xff]   ;;  %v8882_v40 = vld [vmem:[%s12509_s4 + $0xaec] ss:$16 sps:$4 sm:$0xff]  }
 0x222   :  { %5810 = vmatprep.subr.bf16.mxu1 %v8792_v41  ;;  %6369 = vmatprep.subr.bf16.mxu0 %v8795_v42  ;;  %v8877_v41 = vld [vmem:[%s12509_s4 + $0xae0] ss:$16 sps:$4 sm:$0xff]   ;;  %v8880_v42 = vld [vmem:[%s12509_s4 + $0xae8] ss:$16 sps:$4 sm:$0xff]  }
 0x225   :  { %5811 = vmatpush1.bf16.msra.mxu1 %v8790_v43  ;;  %6370 = vmatpush1.bf16.msra.mxu0 %v8793_v44  ;;  %v8885_v43 = vld [vmem:[%s12509_s4 + $0xb04] ss:$16 sps:$4 sm:$0xff]   ;;  %v8888_v44 = vld [vmem:[%s12509_s4 + $0xb0c] ss:$16 sps:$4 sm:$0xff]  }
 0x226   :  { %5812 = vmatprep.subr.bf16.mxu1 %v8798_v45  ;;  %6371 = vmatprep.subr.bf16.mxu0 %v8801_v46  ;;  %v8883_v45 = vld [vmem:[%s12509_s4 + $0xb00] ss:$16 sps:$4 sm:$0xff]   ;;  %v8886_v46 = vld [vmem:[%s12509_s4 + $0xb08] ss:$16 sps:$4 sm:$0xff]  }
 0x229   :  { %5813 = vmatpush1.bf16.msra.mxu1 %v8796_v47  ;;  %6372 = vmatpush1.bf16.msra.mxu0 %v8799_v48  ;;  %v8891_v47 = vld [vmem:[%s12509_s4 + $0xb24] ss:$16 sps:$4 sm:$0xff]   ;;  %v8894_v48 = vld [vmem:[%s12509_s4 + $0xb2c] ss:$16 sps:$4 sm:$0xff]  }
 0x22a   :  { %5814 = vmatprep.subr.bf16.mxu1 %v8804_v49  ;;  %6373 = vmatprep.subr.bf16.mxu0 %v8807_v50  ;;  %v8889_v49 = vld [vmem:[%s12509_s4 + $0xb20] ss:$16 sps:$4 sm:$0xff]   ;;  %v8892_v50 = vld [vmem:[%s12509_s4 + $0xb28] ss:$16 sps:$4 sm:$0xff]  }
 0x22d   :  { %5815 = vmatpush1.bf16.msra.mxu1 %v8802_v51  ;;  %6374 = vmatpush1.bf16.msra.mxu0 %v8805_v52  ;;  %v8897_v51 = vld [vmem:[%s12509_s4 + $0xb44] ss:$16 sps:$4 sm:$0xff]   ;;  %v8900_v52 = vld [vmem:[%s12509_s4 + $0xb4c] ss:$16 sps:$4 sm:$0xff]  }
 0x22e   :  { %5816 = vmatprep.subr.bf16.mxu1 %v8810_v53  ;;  %6375 = vmatprep.subr.bf16.mxu0 %v8813_v54  ;;  %v8895_v53 = vld [vmem:[%s12509_s4 + $0xb40] ss:$16 sps:$4 sm:$0xff]   ;;  %v8898_v54 = vld [vmem:[%s12509_s4 + $0xb48] ss:$16 sps:$4 sm:$0xff]  }
 0x231   :  { %5817 = vmatpush1.bf16.msra.mxu1 %v8808_v55  ;;  %6376 = vmatpush1.bf16.msra.mxu0 %v8811_v56  ;;  %v8903_v55 = vld [vmem:[%s12509_s4 + $0xb64] ss:$16 sps:$4 sm:$0xff]   ;;  %v8906_v56 = vld [vmem:[%s12509_s4 + $0xb6c] ss:$16 sps:$4 sm:$0xff]  }
 0x232   :  { %5818 = vmatprep.subr.bf16.mxu1 %v8816_v57  ;;  %6377 = vmatprep.subr.bf16.mxu0 %v8819_v58  ;;  %v8901_v57 = vld [vmem:[%s12509_s4 + $0xb60] ss:$16 sps:$4 sm:$0xff]   ;;  %v8904_v58 = vld [vmem:[%s12509_s4 + $0xb68] ss:$16 sps:$4 sm:$0xff]  }
 0x235   :  { %5819 = vmatpush1.bf16.msra.mxu1 %v8814_v59  ;;  %6378 = vmatpush1.bf16.msra.mxu0 %v8817_v60  ;;  %v8909_v59 = vld [vmem:[%s12509_s4 + $0xb84] ss:$16 sps:$4 sm:$0xff]   ;;  %v8912_v60 = vld [vmem:[%s12509_s4 + $0xb8c] ss:$16 sps:$4 sm:$0xff]  }
 0x236   :  { %5820 = vmatprep.subr.bf16.mxu1 %v8822_v61  ;;  %6379 = vmatprep.subr.bf16.mxu0 %v8825_v62  ;;  %v8907_v61 = vld [vmem:[%s12509_s4 + $0xb80] ss:$16 sps:$4 sm:$0xff]   ;;  %v8910_v62 = vld [vmem:[%s12509_s4 + $0xb88] ss:$16 sps:$4 sm:$0xff]  }
 0x239   :  { %5821 = vmatpush1.bf16.msra.mxu1 %v8820_v63  ;;  %6380 = vmatpush1.bf16.msra.mxu0 %v8823_v0  ;;  %v8915_v63 = vld [vmem:[%s12509_s4 + $0xba4] ss:$16 sps:$4 sm:$0xff]   ;;  %v8918_v0 = vld [vmem:[%s12509_s4 + $0xbac] ss:$16 sps:$4 sm:$0xff]  }
 0x23a   :  { %5822 = vmatprep.subr.bf16.mxu1 %v8828_v2  ;;  %6381 = vmatprep.subr.bf16.mxu0 %v8831_v3  ;;  %v8913_v2 = vld [vmem:[%s12509_s4 + $0xba0] ss:$16 sps:$4 sm:$0xff]   ;;  %v8916_v3 = vld [vmem:[%s12509_s4 + $0xba8] ss:$16 sps:$4 sm:$0xff]  }
 0x23d   :  { %5823 = vmatpush1.bf16.msra.mxu1 %v8826_v4  ;;  %6382 = vmatpush1.bf16.msra.mxu0 %v8829_v5  ;;  %v8921_v4 = vld [vmem:[%s12509_s4 + $0xbc4] ss:$16 sps:$4 sm:$0xff]   ;;  %v8924_v5 = vld [vmem:[%s12509_s4 + $0xbcc] ss:$16 sps:$4 sm:$0xff]  }
 0x23e   :  { %5835 = vmatprep.subr.bf16.mxu1 %v8837_v6  ;;  %6394 = vmatprep.subr.bf16.mxu0 %v8840_v7  ;;  %v8919_v6 = vld [vmem:[%s12509_s4 + $0xbc0] ss:$16 sps:$4 sm:$0xff]   ;;  %v8922_v7 = vld [vmem:[%s12509_s4 + $0xbc8] ss:$16 sps:$4 sm:$0xff]  }
 0x240   :  { %5825 = vmatmul.mubr.bf16.vlgmr.msra.gmra.mrb[0].mxu1 %v8832_v8  ;;  %6384 = vmatmul.mubr.bf16.vlgmr.msra.gmra.mrb[4].mxu0 %v8832_v8  ;;  %v8927_v8 = vld [vmem:[%s12509_s4 + $0xbe4] ss:$16 sps:$4 sm:$0xff]  }
 0x241   :  { %5836 = vmatpush1.bf16.msra.mxu1 %v8835_v9  ;;  %6395 = vmatpush1.bf16.msra.mxu0 %v8838_v10  ;;  %v8930_v9 = vld [vmem:[%s12509_s4 + $0xbec] ss:$16 sps:$4 sm:$0xff]   ;;  %v8925_v10 = vld [vmem:[%s12509_s4 + $0xbe0] ss:$16 sps:$4 sm:$0xff]  }
 0x242   :  { %5837 = vmatprep.subr.bf16.mxu1 %v8843_v11  ;;  %6396 = vmatprep.subr.bf16.mxu0 %v8846_v12  ;;  %v8928_v11 = vld [vmem:[%s12509_s4 + $0xbe8] ss:$16 sps:$4 sm:$0xff]   ;;  %v8936_v12 = vld [vmem:[%s12509_s4 + $0xc04] ss:$16 sps:$4 sm:$0xff]  }
 0x243   :  { %5867 = vmatprep.mubr.bf16.mxu1 %v8933_v13  ;;  %6426 = vmatprep.mubr.bf16.mxu0 %v8933_v13  ;;  %v8939_v13 = vld [vmem:[%s12509_s4 + $0xc0c] ss:$16 sps:$4 sm:$0xff]  }
 0x245   :  { %5838 = vmatpush1.bf16.msra.mxu1 %v8841_v14  ;;  %6397 = vmatpush1.bf16.msra.mxu0 %v8844_v15  ;;  %v8931_v14 = vld [vmem:[%s12510_s0 + $0x28] ss:$100 sps:$4 sm:$0xff]   ;;  %v8934_v15 = vld [vmem:[%s12509_s4 + $0xc00] ss:$16 sps:$4 sm:$0xff]  }
 0x246   :  { %5839 = vmatprep.subr.bf16.mxu1 %v8849_v16  ;;  %6398 = vmatprep.subr.bf16.mxu0 %v8852_v17  ;;  %v8937_v16 = vld [vmem:[%s12509_s4 + $0xc08] ss:$16 sps:$4 sm:$0xff]   ;;  %v8942_v17 = vld [vmem:[%s12509_s4 + $0xc24] ss:$16 sps:$4 sm:$0xff]  }
 0x249   :  { %5840 = vmatpush1.bf16.msra.mxu1 %v8847_v18  ;;  %6399 = vmatpush1.bf16.msra.mxu0 %v8850_v19  ;;  %v8945_v18 = vld [vmem:[%s12509_s4 + $0xc2c] ss:$16 sps:$4 sm:$0xff]   ;;  %v9032_v19 = vld [vmem:[%s12510_s0 + $0x34] ss:$100 sps:$4 sm:$0xff]  }
 0x24a   :  { %5841 = vmatprep.subr.bf16.mxu1 %v8855_v20  ;;  %6400 = vmatprep.subr.bf16.mxu0 %v8858_v21  ;;  %v8940_v20 = vld [vmem:[%s12509_s4 + $0xc20] ss:$16 sps:$4 sm:$0xff]   ;;  %v8943_v21 = vld [vmem:[%s12509_s4 + $0xc28] ss:$16 sps:$4 sm:$0xff]  }
 0x24d   :  { %5842 = vmatpush1.bf16.msra.mxu1 %v8853_v23  ;;  %6401 = vmatpush1.bf16.msra.mxu0 %v8856_v26  ;;  %v8948_v23 = vld [vmem:[%s12509_s4 + $0xc44] ss:$16 sps:$4 sm:$0xff]   ;;  %v8951_v26 = vld [vmem:[%s12509_s4 + $0xc4c] ss:$16 sps:$4 sm:$0xff]  }
 0x24e   :  { %5843 = vmatprep.subr.bf16.mxu1 %v8861_v27  ;;  %6402 = vmatprep.subr.bf16.mxu0 %v8864_v28  ;;  %v8946_v27 = vld [vmem:[%s12509_s4 + $0xc40] ss:$16 sps:$4 sm:$0xff]   ;;  %v8949_v28 = vld [vmem:[%s12509_s4 + $0xc48] ss:$16 sps:$4 sm:$0xff]  }
 0x251   :  { %5844 = vmatpush1.bf16.msra.mxu1 %v8859_v29  ;;  %6403 = vmatpush1.bf16.msra.mxu0 %v8862_v30  ;;  %v8954_v29 = vld [vmem:[%s12509_s4 + $0xc64] ss:$16 sps:$4 sm:$0xff]   ;;  %v8957_v30 = vld [vmem:[%s12509_s4 + $0xc6c] ss:$16 sps:$4 sm:$0xff]  }
 0x252   :  { %5845 = vmatprep.subr.bf16.mxu1 %v8867_v31  ;;  %6404 = vmatprep.subr.bf16.mxu0 %v8870_v32  ;;  %v8952_v31 = vld [vmem:[%s12509_s4 + $0xc60] ss:$16 sps:$4 sm:$0xff]   ;;  %v8955_v32 = vld [vmem:[%s12509_s4 + $0xc68] ss:$16 sps:$4 sm:$0xff]  }
 0x255   :  { %5846 = vmatpush1.bf16.msra.mxu1 %v8865_v33  ;;  %6405 = vmatpush1.bf16.msra.mxu0 %v8868_v34  ;;  %v8960_v33 = vld [vmem:[%s12509_s4 + $0xc84] ss:$16 sps:$4 sm:$0xff]   ;;  %v8963_v34 = vld [vmem:[%s12509_s4 + $0xc8c] ss:$16 sps:$4 sm:$0xff]  }
 0x256   :  { %5847 = vmatprep.subr.bf16.mxu1 %v8873_v35  ;;  %6406 = vmatprep.subr.bf16.mxu0 %v8876_v36  ;;  %v8958_v35 = vld [vmem:[%s12509_s4 + $0xc80] ss:$16 sps:$4 sm:$0xff]   ;;  %v8961_v36 = vld [vmem:[%s12509_s4 + $0xc88] ss:$16 sps:$4 sm:$0xff]  }
 0x259   :  { %5848 = vmatpush1.bf16.msra.mxu1 %v8871_v37  ;;  %6407 = vmatpush1.bf16.msra.mxu0 %v8874_v38  ;;  %v8966_v37 = vld [vmem:[%s12509_s4 + $0xca4] ss:$16 sps:$4 sm:$0xff]   ;;  %v8969_v38 = vld [vmem:[%s12509_s4 + $0xcac] ss:$16 sps:$4 sm:$0xff]  }
 0x25a   :  { %5849 = vmatprep.subr.bf16.mxu1 %v8879_v39  ;;  %6408 = vmatprep.subr.bf16.mxu0 %v8882_v40  ;;  %v8964_v39 = vld [vmem:[%s12509_s4 + $0xca0] ss:$16 sps:$4 sm:$0xff]   ;;  %v8967_v40 = vld [vmem:[%s12509_s4 + $0xca8] ss:$16 sps:$4 sm:$0xff]  }
 0x25d   :  { %5850 = vmatpush1.bf16.msra.mxu1 %v8877_v41  ;;  %6409 = vmatpush1.bf16.msra.mxu0 %v8880_v42  ;;  %v8972_v41 = vld [vmem:[%s12509_s4 + $0xcc4] ss:$16 sps:$4 sm:$0xff]   ;;  %v8975_v42 = vld [vmem:[%s12509_s4 + $0xccc] ss:$16 sps:$4 sm:$0xff]  }
 0x25e   :  { %5851 = vmatprep.subr.bf16.mxu1 %v8885_v43  ;;  %6410 = vmatprep.subr.bf16.mxu0 %v8888_v44  ;;  %v8970_v43 = vld [vmem:[%s12509_s4 + $0xcc0] ss:$16 sps:$4 sm:$0xff]   ;;  %v8973_v44 = vld [vmem:[%s12509_s4 + $0xcc8] ss:$16 sps:$4 sm:$0xff]  }
 0x261   :  { %5852 = vmatpush1.bf16.msra.mxu1 %v8883_v45  ;;  %6411 = vmatpush1.bf16.msra.mxu0 %v8886_v46  ;;  %v8978_v45 = vld [vmem:[%s12509_s4 + $0xce4] ss:$16 sps:$4 sm:$0xff]   ;;  %v8981_v46 = vld [vmem:[%s12509_s4 + $0xcec] ss:$16 sps:$4 sm:$0xff]  }
 0x262   :  { %5853 = vmatprep.subr.bf16.mxu1 %v8891_v47  ;;  %6412 = vmatprep.subr.bf16.mxu0 %v8894_v48  ;;  %v8976_v47 = vld [vmem:[%s12509_s4 + $0xce0] ss:$16 sps:$4 sm:$0xff]   ;;  %v8979_v48 = vld [vmem:[%s12509_s4 + $0xce8] ss:$16 sps:$4 sm:$0xff]  }
 0x265   :  { %5854 = vmatpush1.bf16.msra.mxu1 %v8889_v49  ;;  %6413 = vmatpush1.bf16.msra.mxu0 %v8892_v50  ;;  %v8984_v49 = vld [vmem:[%s12509_s4 + $0xd04] ss:$16 sps:$4 sm:$0xff]   ;;  %v8987_v50 = vld [vmem:[%s12509_s4 + $0xd0c] ss:$16 sps:$4 sm:$0xff]  }
 0x266   :  { %5855 = vmatprep.subr.bf16.mxu1 %v8897_v51  ;;  %6414 = vmatprep.subr.bf16.mxu0 %v8900_v52  ;;  %v8982_v51 = vld [vmem:[%s12509_s4 + $0xd00] ss:$16 sps:$4 sm:$0xff]   ;;  %v8985_v52 = vld [vmem:[%s12509_s4 + $0xd08] ss:$16 sps:$4 sm:$0xff]  }
 0x269   :  { %5856 = vmatpush1.bf16.msra.mxu1 %v8895_v53  ;;  %6415 = vmatpush1.bf16.msra.mxu0 %v8898_v54  ;;  %v8990_v53 = vld [vmem:[%s12509_s4 + $0xd24] ss:$16 sps:$4 sm:$0xff]   ;;  %v8993_v54 = vld [vmem:[%s12509_s4 + $0xd2c] ss:$16 sps:$4 sm:$0xff]  }
 0x26a   :  { %5857 = vmatprep.subr.bf16.mxu1 %v8903_v55  ;;  %6416 = vmatprep.subr.bf16.mxu0 %v8906_v56  ;;  %v8988_v55 = vld [vmem:[%s12509_s4 + $0xd20] ss:$16 sps:$4 sm:$0xff]   ;;  %v8991_v56 = vld [vmem:[%s12509_s4 + $0xd28] ss:$16 sps:$4 sm:$0xff]  }
 0x26d   :  { %5858 = vmatpush1.bf16.msra.mxu1 %v8901_v57  ;;  %6417 = vmatpush1.bf16.msra.mxu0 %v8904_v58  ;;  %v8996_v57 = vld [vmem:[%s12509_s4 + $0xd44] ss:$16 sps:$4 sm:$0xff]   ;;  %v8999_v58 = vld [vmem:[%s12509_s4 + $0xd4c] ss:$16 sps:$4 sm:$0xff]  }
 0x26e   :  { %5859 = vmatprep.subr.bf16.mxu1 %v8909_v59  ;;  %6418 = vmatprep.subr.bf16.mxu0 %v8912_v60  ;;  %v8994_v59 = vld [vmem:[%s12509_s4 + $0xd40] ss:$16 sps:$4 sm:$0xff]   ;;  %v8997_v60 = vld [vmem:[%s12509_s4 + $0xd48] ss:$16 sps:$4 sm:$0xff]  }
 0x271   :  { %5860 = vmatpush1.bf16.msra.mxu1 %v8907_v61  ;;  %6419 = vmatpush1.bf16.msra.mxu0 %v8910_v62  ;;  %v9002_v61 = vld [vmem:[%s12509_s4 + $0xd64] ss:$16 sps:$4 sm:$0xff]   ;;  %v9005_v62 = vld [vmem:[%s12509_s4 + $0xd6c] ss:$16 sps:$4 sm:$0xff]  }
 0x272   :  { %5861 = vmatprep.subr.bf16.mxu1 %v8915_v63  ;;  %6420 = vmatprep.subr.bf16.mxu0 %v8918_v0  ;;  %v9000_v63 = vld [vmem:[%s12509_s4 + $0xd60] ss:$16 sps:$4 sm:$0xff]   ;;  %v9003_v0 = vld [vmem:[%s12509_s4 + $0xd68] ss:$16 sps:$4 sm:$0xff]  }
 0x275   :  { %5862 = vmatpush1.bf16.msra.mxu1 %v8913_v2  ;;  %6421 = vmatpush1.bf16.msra.mxu0 %v8916_v3  ;;  %v9008_v2 = vld [vmem:[%s12509_s4 + $0xd84] ss:$16 sps:$4 sm:$0xff]   ;;  %v9011_v3 = vld [vmem:[%s12509_s4 + $0xd8c] ss:$16 sps:$4 sm:$0xff]  }
 0x276   :  { %5863 = vmatprep.subr.bf16.mxu1 %v8921_v4  ;;  %6422 = vmatprep.subr.bf16.mxu0 %v8924_v5  ;;  %v9006_v4 = vld [vmem:[%s12509_s4 + $0xd80] ss:$16 sps:$4 sm:$0xff]   ;;  %v9009_v5 = vld [vmem:[%s12509_s4 + $0xd88] ss:$16 sps:$4 sm:$0xff]  }
 0x279   :  { %5864 = vmatpush1.bf16.msra.mxu1 %v8919_v6  ;;  %6423 = vmatpush1.bf16.msra.mxu0 %v8922_v7  ;;  %v9014_v6 = vld [vmem:[%s12509_s4 + $0xda4] ss:$16 sps:$4 sm:$0xff]   ;;  %v9017_v7 = vld [vmem:[%s12509_s4 + $0xdac] ss:$16 sps:$4 sm:$0xff]  }
 0x27a   :  { %5865 = vmatprep.subr.bf16.mxu1 %v8927_v8  ;;  %6424 = vmatprep.subr.bf16.mxu0 %v8930_v9  ;;  %v9012_v8 = vld [vmem:[%s12509_s4 + $0xda0] ss:$16 sps:$4 sm:$0xff]   ;;  %v9015_v9 = vld [vmem:[%s12509_s4 + $0xda8] ss:$16 sps:$4 sm:$0xff]  }
 0x27d   :  { %5866 = vmatpush1.bf16.msra.mxu1 %v8925_v10  ;;  %6425 = vmatpush1.bf16.msra.mxu0 %v8928_v11  ;;  %v9020_v10 = vld [vmem:[%s12509_s4 + $0xdc4] ss:$16 sps:$4 sm:$0xff]   ;;  %v9023_v11 = vld [vmem:[%s12509_s4 + $0xdcc] ss:$16 sps:$4 sm:$0xff]  }
 0x27e   :  { %5878 = vmatprep.subr.bf16.mxu1 %v8936_v12  ;;  %6437 = vmatprep.subr.bf16.mxu0 %v8939_v13  ;;  %v9018_v12 = vld [vmem:[%s12509_s4 + $0xdc0] ss:$16 sps:$4 sm:$0xff]   ;;  %v9021_v13 = vld [vmem:[%s12509_s4 + $0xdc8] ss:$16 sps:$4 sm:$0xff]  }
 0x280   :  { %5868 = vmatmul.mubr.bf16.vlgmr.msra.gmra.mrb[0].mxu1 %v8931_v14  ;;  %6427 = vmatmul.mubr.bf16.vlgmr.msra.gmra.mrb[4].mxu0 %v8931_v14  ;;  %v9026_v14 = vld [vmem:[%s12509_s4 + $0xde4] ss:$16 sps:$4 sm:$0xff]  }
 0x281   :  { %5879 = vmatpush1.bf16.msra.mxu1 %v8934_v15  ;;  %6438 = vmatpush1.bf16.msra.mxu0 %v8937_v16  ;;  %v9029_v15 = vld [vmem:[%s12509_s4 + $0xdec] ss:$16 sps:$4 sm:$0xff]   ;;  %v9024_v16 = vld [vmem:[%s12509_s4 + $0xde0] ss:$16 sps:$4 sm:$0xff]  }
 0x282   :  { %5880 = vmatprep.subr.bf16.mxu1 %v8942_v17  ;;  %6439 = vmatprep.subr.bf16.mxu0 %v8945_v18  ;;  %v9027_v17 = vld [vmem:[%s12509_s4 + $0xde8] ss:$16 sps:$4 sm:$0xff]   ;;  %v9035_v18 = vld [vmem:[%s12509_s4 + $0xe04] ss:$16 sps:$4 sm:$0xff]  }
 0x283   :  { %5910 = vmatprep.mubr.bf16.mxu1 %v9032_v19  ;;  %6469 = vmatprep.mubr.bf16.mxu0 %v9032_v19  ;;  %v9038_v19 = vld [vmem:[%s12509_s4 + $0xe0c] ss:$16 sps:$4 sm:$0xff]  }
 0x285   :  { %5881 = vmatpush1.bf16.msra.mxu1 %v8940_v20  ;;  %6440 = vmatpush1.bf16.msra.mxu0 %v8943_v21  ;;  %v9030_v20 = vld [vmem:[%s12510_s0 + $0x30] ss:$100 sps:$4 sm:$0xff]  }
 0x286   :  { %5882 = vmatprep.subr.bf16.mxu1 %v8948_v23  ;;  %6441 = vmatprep.subr.bf16.mxu0 %v8951_v26  ;;  %v9033_v21 = vld [vmem:[%s12509_s4 + $0xe00] ss:$16 sps:$4 sm:$0xff]   ;;  %v9036_v23 = vld [vmem:[%s12509_s4 + $0xe08] ss:$16 sps:$4 sm:$0xff]   ;;  %v9041_v26 = vld [vmem:[%s12509_s4 + $0xe24] ss:$16 sps:$4 sm:$0xff]  }
 0x289   :  { %5883 = vmatpush1.bf16.msra.mxu1 %v8946_v27  ;;  %6442 = vmatpush1.bf16.msra.mxu0 %v8949_v28  ;;  %v9044_v27 = vld [vmem:[%s12509_s4 + $0xe2c] ss:$16 sps:$4 sm:$0xff]  }
 0x28a   :  { %5884 = vmatprep.subr.bf16.mxu1 %v8954_v29  ;;  %6443 = vmatprep.subr.bf16.mxu0 %v8957_v30  ;;  %v9131_v28 = vld [vmem:[%s12510_s0 + $0x3c] ss:$100 sps:$4 sm:$0xff]   ;;  %v9042_v30 = vld [vmem:[%s12509_s4 + $0xe28] ss:$16 sps:$4 sm:$0xff]  }
 0x28b   :  { %v9039_v29 = vld [vmem:[%s12509_s4 + $0xe20] ss:$16 sps:$4 sm:$0xff]  }
 0x28d   :  { %5885 = vmatpush1.bf16.msra.mxu1 %v8952_v31  ;;  %6444 = vmatpush1.bf16.msra.mxu0 %v8955_v32  ;;  %v9047_v31 = vld [vmem:[%s12509_s4 + $0xe44] ss:$16 sps:$4 sm:$0xff]   ;;  %v9050_v32 = vld [vmem:[%s12509_s4 + $0xe4c] ss:$16 sps:$4 sm:$0xff]  }
 0x28e   :  { %5886 = vmatprep.subr.bf16.mxu1 %v8960_v33  ;;  %6445 = vmatprep.subr.bf16.mxu0 %v8963_v34  ;;  %v9045_v33 = vld [vmem:[%s12509_s4 + $0xe40] ss:$16 sps:$4 sm:$0xff]   ;;  %v9048_v34 = vld [vmem:[%s12509_s4 + $0xe48] ss:$16 sps:$4 sm:$0xff]  }
 0x291   :  { %5887 = vmatpush1.bf16.msra.mxu1 %v8958_v35  ;;  %6446 = vmatpush1.bf16.msra.mxu0 %v8961_v36  ;;  %v9053_v35 = vld [vmem:[%s12509_s4 + $0xe64] ss:$16 sps:$4 sm:$0xff]   ;;  %v9056_v36 = vld [vmem:[%s12509_s4 + $0xe6c] ss:$16 sps:$4 sm:$0xff]  }
 0x292   :  { %5888 = vmatprep.subr.bf16.mxu1 %v8966_v37  ;;  %6447 = vmatprep.subr.bf16.mxu0 %v8969_v38  ;;  %v9051_v37 = vld [vmem:[%s12509_s4 + $0xe60] ss:$16 sps:$4 sm:$0xff]   ;;  %v9054_v38 = vld [vmem:[%s12509_s4 + $0xe68] ss:$16 sps:$4 sm:$0xff]  }
 0x295   :  { %5889 = vmatpush1.bf16.msra.mxu1 %v8964_v39  ;;  %6448 = vmatpush1.bf16.msra.mxu0 %v8967_v40  ;;  %v9059_v39 = vld [vmem:[%s12509_s4 + $0xe84] ss:$16 sps:$4 sm:$0xff]   ;;  %v9062_v40 = vld [vmem:[%s12509_s4 + $0xe8c] ss:$16 sps:$4 sm:$0xff]  }
 0x296   :  { %5890 = vmatprep.subr.bf16.mxu1 %v8972_v41  ;;  %6449 = vmatprep.subr.bf16.mxu0 %v8975_v42  ;;  %v9057_v41 = vld [vmem:[%s12509_s4 + $0xe80] ss:$16 sps:$4 sm:$0xff]   ;;  %v9060_v42 = vld [vmem:[%s12509_s4 + $0xe88] ss:$16 sps:$4 sm:$0xff]  }
 0x299   :  { %5891 = vmatpush1.bf16.msra.mxu1 %v8970_v43  ;;  %6450 = vmatpush1.bf16.msra.mxu0 %v8973_v44  ;;  %v9065_v43 = vld [vmem:[%s12509_s4 + $0xea4] ss:$16 sps:$4 sm:$0xff]   ;;  %v9068_v44 = vld [vmem:[%s12509_s4 + $0xeac] ss:$16 sps:$4 sm:$0xff]  }
 0x29a   :  { %5892 = vmatprep.subr.bf16.mxu1 %v8978_v45  ;;  %6451 = vmatprep.subr.bf16.mxu0 %v8981_v46  ;;  %v9063_v45 = vld [vmem:[%s12509_s4 + $0xea0] ss:$16 sps:$4 sm:$0xff]   ;;  %v9066_v46 = vld [vmem:[%s12509_s4 + $0xea8] ss:$16 sps:$4 sm:$0xff]  }
 0x29d   :  { %5893 = vmatpush1.bf16.msra.mxu1 %v8976_v47  ;;  %6452 = vmatpush1.bf16.msra.mxu0 %v8979_v48  ;;  %v9071_v47 = vld [vmem:[%s12509_s4 + $0xec4] ss:$16 sps:$4 sm:$0xff]   ;;  %v9074_v48 = vld [vmem:[%s12509_s4 + $0xecc] ss:$16 sps:$4 sm:$0xff]  }
 0x29e   :  { %5894 = vmatprep.subr.bf16.mxu1 %v8984_v49  ;;  %6453 = vmatprep.subr.bf16.mxu0 %v8987_v50  ;;  %v9069_v49 = vld [vmem:[%s12509_s4 + $0xec0] ss:$16 sps:$4 sm:$0xff]   ;;  %v9072_v50 = vld [vmem:[%s12509_s4 + $0xec8] ss:$16 sps:$4 sm:$0xff]  }
 0x2a1   :  { %5895 = vmatpush1.bf16.msra.mxu1 %v8982_v51  ;;  %6454 = vmatpush1.bf16.msra.mxu0 %v8985_v52  ;;  %v9077_v51 = vld [vmem:[%s12509_s4 + $0xee4] ss:$16 sps:$4 sm:$0xff]   ;;  %v9080_v52 = vld [vmem:[%s12509_s4 + $0xeec] ss:$16 sps:$4 sm:$0xff]  }
 0x2a2   :  { %5896 = vmatprep.subr.bf16.mxu1 %v8990_v53  ;;  %6455 = vmatprep.subr.bf16.mxu0 %v8993_v54  ;;  %v9075_v53 = vld [vmem:[%s12509_s4 + $0xee0] ss:$16 sps:$4 sm:$0xff]   ;;  %v9078_v54 = vld [vmem:[%s12509_s4 + $0xee8] ss:$16 sps:$4 sm:$0xff]  }
 0x2a5   :  { %5897 = vmatpush1.bf16.msra.mxu1 %v8988_v55  ;;  %6456 = vmatpush1.bf16.msra.mxu0 %v8991_v56  ;;  %v9083_v55 = vld [vmem:[%s12509_s4 + $0xf04] ss:$16 sps:$4 sm:$0xff]   ;;  %v9086_v56 = vld [vmem:[%s12509_s4 + $0xf0c] ss:$16 sps:$4 sm:$0xff]  }
 0x2a6   :  { %5898 = vmatprep.subr.bf16.mxu1 %v8996_v57  ;;  %6457 = vmatprep.subr.bf16.mxu0 %v8999_v58  ;;  %v9081_v57 = vld [vmem:[%s12509_s4 + $0xf00] ss:$16 sps:$4 sm:$0xff]   ;;  %v9084_v58 = vld [vmem:[%s12509_s4 + $0xf08] ss:$16 sps:$4 sm:$0xff]  }
 0x2a9   :  { %5899 = vmatpush1.bf16.msra.mxu1 %v8994_v59  ;;  %6458 = vmatpush1.bf16.msra.mxu0 %v8997_v60  ;;  %v9089_v59 = vld [vmem:[%s12509_s4 + $0xf24] ss:$16 sps:$4 sm:$0xff]   ;;  %v9092_v60 = vld [vmem:[%s12509_s4 + $0xf2c] ss:$16 sps:$4 sm:$0xff]  }
 0x2aa   :  { %5900 = vmatprep.subr.bf16.mxu1 %v9002_v61  ;;  %6459 = vmatprep.subr.bf16.mxu0 %v9005_v62  ;;  %v9087_v61 = vld [vmem:[%s12509_s4 + $0xf20] ss:$16 sps:$4 sm:$0xff]   ;;  %v9090_v62 = vld [vmem:[%s12509_s4 + $0xf28] ss:$16 sps:$4 sm:$0xff]  }
 0x2ad   :  { %5901 = vmatpush1.bf16.msra.mxu1 %v9000_v63  ;;  %6460 = vmatpush1.bf16.msra.mxu0 %v9003_v0  ;;  %v9095_v63 = vld [vmem:[%s12509_s4 + $0xf44] ss:$16 sps:$4 sm:$0xff]   ;;  %v9098_v0 = vld [vmem:[%s12509_s4 + $0xf4c] ss:$16 sps:$4 sm:$0xff]  }
 0x2ae   :  { %5902 = vmatprep.subr.bf16.mxu1 %v9008_v2  ;;  %6461 = vmatprep.subr.bf16.mxu0 %v9011_v3  ;;  %v9093_v2 = vld [vmem:[%s12509_s4 + $0xf40] ss:$16 sps:$4 sm:$0xff]   ;;  %v9096_v3 = vld [vmem:[%s12509_s4 + $0xf48] ss:$16 sps:$4 sm:$0xff]  }
 0x2b1   :  { %5903 = vmatpush1.bf16.msra.mxu1 %v9006_v4  ;;  %6462 = vmatpush1.bf16.msra.mxu0 %v9009_v5  ;;  %v9101_v4 = vld [vmem:[%s12509_s4 + $0xf64] ss:$16 sps:$4 sm:$0xff]   ;;  %v9104_v5 = vld [vmem:[%s12509_s4 + $0xf6c] ss:$16 sps:$4 sm:$0xff]  }
 0x2b2   :  { %5904 = vmatprep.subr.bf16.mxu1 %v9014_v6  ;;  %6463 = vmatprep.subr.bf16.mxu0 %v9017_v7  ;;  %v9099_v6 = vld [vmem:[%s12509_s4 + $0xf60] ss:$16 sps:$4 sm:$0xff]   ;;  %v9102_v7 = vld [vmem:[%s12509_s4 + $0xf68] ss:$16 sps:$4 sm:$0xff]  }
 0x2b5   :  { %5905 = vmatpush1.bf16.msra.mxu1 %v9012_v8  ;;  %6464 = vmatpush1.bf16.msra.mxu0 %v9015_v9  ;;  %v9107_v8 = vld [vmem:[%s12509_s4 + $0xf84] ss:$16 sps:$4 sm:$0xff]   ;;  %v9110_v9 = vld [vmem:[%s12509_s4 + $0xf8c] ss:$16 sps:$4 sm:$0xff]  }
 0x2b6   :  { %5906 = vmatprep.subr.bf16.mxu1 %v9020_v10  ;;  %6465 = vmatprep.subr.bf16.mxu0 %v9023_v11  ;;  %v9105_v10 = vld [vmem:[%s12509_s4 + $0xf80] ss:$16 sps:$4 sm:$0xff]   ;;  %v9108_v11 = vld [vmem:[%s12509_s4 + $0xf88] ss:$16 sps:$4 sm:$0xff]  }
 0x2b9   :  { %5907 = vmatpush1.bf16.msra.mxu1 %v9018_v12  ;;  %6466 = vmatpush1.bf16.msra.mxu0 %v9021_v13  ;;  %v9113_v12 = vld [vmem:[%s12509_s4 + $0xfa4] ss:$16 sps:$4 sm:$0xff]   ;;  %v9116_v13 = vld [vmem:[%s12509_s4 + $0xfac] ss:$16 sps:$4 sm:$0xff]  }
 0x2ba   :  { %5908 = vmatprep.subr.bf16.mxu1 %v9026_v14  ;;  %6467 = vmatprep.subr.bf16.mxu0 %v9029_v15  ;;  %v9111_v14 = vld [vmem:[%s12509_s4 + $0xfa0] ss:$16 sps:$4 sm:$0xff]   ;;  %v9114_v15 = vld [vmem:[%s12509_s4 + $0xfa8] ss:$16 sps:$4 sm:$0xff]  }
 0x2bd   :  { %5909 = vmatpush1.bf16.msra.mxu1 %v9024_v16  ;;  %6468 = vmatpush1.bf16.msra.mxu0 %v9027_v17  ;;  %v9119_v16 = vld [vmem:[%s12509_s4 + $0xfc4] ss:$16 sps:$4 sm:$0xff]   ;;  %v9122_v17 = vld [vmem:[%s12509_s4 + $0xfcc] ss:$16 sps:$4 sm:$0xff]  }
 0x2be   :  { %5921 = vmatprep.subr.bf16.mxu1 %v9035_v18  ;;  %6480 = vmatprep.subr.bf16.mxu0 %v9038_v19  ;;  %v9117_v18 = vld [vmem:[%s12509_s4 + $0xfc0] ss:$16 sps:$4 sm:$0xff]   ;;  %v9120_v19 = vld [vmem:[%s12509_s4 + $0xfc8] ss:$16 sps:$4 sm:$0xff]  }
 0x2c0   :  { %5911 = vmatmul.mubr.bf16.vlgmr.msra.gmra.mrb[0].mxu1 %v9030_v20  ;;  %6470 = vmatmul.mubr.bf16.vlgmr.msra.gmra.mrb[4].mxu0 %v9030_v20  ;;  %v9125_v20 = vld [vmem:[%s12509_s4 + $0xfe4] ss:$16 sps:$4 sm:$0xff]  }
 0x2c1   :  { %5922 = vmatpush1.bf16.msra.mxu1 %v9033_v21  ;;  %6481 = vmatpush1.bf16.msra.mxu0 %v9036_v23  ;;  %v9128_v21 = vld [vmem:[%s12509_s4 + $0xfec] ss:$16 sps:$4 sm:$0xff]   ;;  %v9123_v23 = vld [vmem:[%s12509_s4 + $0xfe0] ss:$16 sps:$4 sm:$0xff]  }
 0x2c2   :  { %5923 = vmatprep.subr.bf16.mxu1 %v9041_v26  ;;  %6482 = vmatprep.subr.bf16.mxu0 %v9044_v27  ;;  %v9126_v26 = vld [vmem:[%s12509_s4 + $0xfe8] ss:$16 sps:$4 sm:$0xff]   ;;  %v9134_v27 = vld [vmem:[%s12509_s4 + $0x1004] ss:$16 sps:$4 sm:$0xff]  }
 0x2c3   :  { %5953 = vmatprep.mubr.bf16.mxu1 %v9131_v28  ;;  %6512 = vmatprep.mubr.bf16.mxu0 %v9131_v28  ;;  %v9137_v28 = vld [vmem:[%s12509_s4 + $0x100c] ss:$16 sps:$4 sm:$0xff]  }
 0x2c5   :  { %5924 = vmatpush1.bf16.msra.mxu1 %v9039_v29  ;;  %6483 = vmatpush1.bf16.msra.mxu0 %v9042_v30  ;;  %v9129_v29 = vld [vmem:[%s12510_s0 + $0x38] ss:$100 sps:$4 sm:$0xff]   ;;  %v9132_v30 = vld [vmem:[%s12509_s4 + $0x1000] ss:$16 sps:$4 sm:$0xff]  }
 0x2c6   :  { %5925 = vmatprep.subr.bf16.mxu1 %v9047_v31  ;;  %6484 = vmatprep.subr.bf16.mxu0 %v9050_v32  ;;  %v9135_v31 = vld [vmem:[%s12509_s4 + $0x1008] ss:$16 sps:$4 sm:$0xff]   ;;  %v9140_v32 = vld [vmem:[%s12509_s4 + $0x1024] ss:$16 sps:$4 sm:$0xff]  }
 0x2c9   :  { %5926 = vmatpush1.bf16.msra.mxu1 %v9045_v33  ;;  %6485 = vmatpush1.bf16.msra.mxu0 %v9048_v34  ;;  %v9143_v33 = vld [vmem:[%s12509_s4 + $0x102c] ss:$16 sps:$4 sm:$0xff]   ;;  %v9230_v34 = vld [vmem:[%s12510_s0 + $0x44] ss:$100 sps:$4 sm:$0xff]  }
 0x2ca   :  { %5927 = vmatprep.subr.bf16.mxu1 %v9053_v35  ;;  %6486 = vmatprep.subr.bf16.mxu0 %v9056_v36  ;;  %v9138_v35 = vld [vmem:[%s12509_s4 + $0x1020] ss:$16 sps:$4 sm:$0xff]   ;;  %v9141_v36 = vld [vmem:[%s12509_s4 + $0x1028] ss:$16 sps:$4 sm:$0xff]  }
 0x2cd   :  { %5928 = vmatpush1.bf16.msra.mxu1 %v9051_v37  ;;  %6487 = vmatpush1.bf16.msra.mxu0 %v9054_v38  ;;  %v9146_v37 = vld [vmem:[%s12509_s4 + $0x1044] ss:$16 sps:$4 sm:$0xff]   ;;  %v9149_v38 = vld [vmem:[%s12509_s4 + $0x104c] ss:$16 sps:$4 sm:$0xff]  }
 0x2ce   :  { %5929 = vmatprep.subr.bf16.mxu1 %v9059_v39  ;;  %6488 = vmatprep.subr.bf16.mxu0 %v9062_v40  ;;  %v9144_v39 = vld [vmem:[%s12509_s4 + $0x1040] ss:$16 sps:$4 sm:$0xff]   ;;  %v9147_v40 = vld [vmem:[%s12509_s4 + $0x1048] ss:$16 sps:$4 sm:$0xff]  }
 0x2d1   :  { %5930 = vmatpush1.bf16.msra.mxu1 %v9057_v41  ;;  %6489 = vmatpush1.bf16.msra.mxu0 %v9060_v42  ;;  %v9152_v41 = vld [vmem:[%s12509_s4 + $0x1064] ss:$16 sps:$4 sm:$0xff]   ;;  %v9155_v42 = vld [vmem:[%s12509_s4 + $0x106c] ss:$16 sps:$4 sm:$0xff]  }
 0x2d2   :  { %5931 = vmatprep.subr.bf16.mxu1 %v9065_v43  ;;  %6490 = vmatprep.subr.bf16.mxu0 %v9068_v44  ;;  %v9150_v43 = vld [vmem:[%s12509_s4 + $0x1060] ss:$16 sps:$4 sm:$0xff]   ;;  %v9153_v44 = vld [vmem:[%s12509_s4 + $0x1068] ss:$16 sps:$4 sm:$0xff]  }
 0x2d5   :  { %5932 = vmatpush1.bf16.msra.mxu1 %v9063_v45  ;;  %6491 = vmatpush1.bf16.msra.mxu0 %v9066_v46  ;;  %v9158_v45 = vld [vmem:[%s12509_s4 + $0x1084] ss:$16 sps:$4 sm:$0xff]   ;;  %v9161_v46 = vld [vmem:[%s12509_s4 + $0x108c] ss:$16 sps:$4 sm:$0xff]  }
 0x2d6   :  { %5933 = vmatprep.subr.bf16.mxu1 %v9071_v47  ;;  %6492 = vmatprep.subr.bf16.mxu0 %v9074_v48  ;;  %v9156_v47 = vld [vmem:[%s12509_s4 + $0x1080] ss:$16 sps:$4 sm:$0xff]   ;;  %v9159_v48 = vld [vmem:[%s12509_s4 + $0x1088] ss:$16 sps:$4 sm:$0xff]  }
 0x2d9   :  { %5934 = vmatpush1.bf16.msra.mxu1 %v9069_v49  ;;  %6493 = vmatpush1.bf16.msra.mxu0 %v9072_v50  ;;  %v9164_v49 = vld [vmem:[%s12509_s4 + $0x10a4] ss:$16 sps:$4 sm:$0xff]   ;;  %v9167_v50 = vld [vmem:[%s12509_s4 + $0x10ac] ss:$16 sps:$4 sm:$0xff]  }
 0x2da   :  { %5935 = vmatprep.subr.bf16.mxu1 %v9077_v51  ;;  %6494 = vmatprep.subr.bf16.mxu0 %v9080_v52  ;;  %v9162_v51 = vld [vmem:[%s12509_s4 + $0x10a0] ss:$16 sps:$4 sm:$0xff]   ;;  %v9165_v52 = vld [vmem:[%s12509_s4 + $0x10a8] ss:$16 sps:$4 sm:$0xff]  }
 0x2dd   :  { %5936 = vmatpush1.bf16.msra.mxu1 %v9075_v53  ;;  %6495 = vmatpush1.bf16.msra.mxu0 %v9078_v54  ;;  %v9170_v53 = vld [vmem:[%s12509_s4 + $0x10c4] ss:$16 sps:$4 sm:$0xff]   ;;  %v9173_v54 = vld [vmem:[%s12509_s4 + $0x10cc] ss:$16 sps:$4 sm:$0xff]  }
 0x2de   :  { %5937 = vmatprep.subr.bf16.mxu1 %v9083_v55  ;;  %6496 = vmatprep.subr.bf16.mxu0 %v9086_v56  ;;  %v9168_v55 = vld [vmem:[%s12509_s4 + $0x10c0] ss:$16 sps:$4 sm:$0xff]   ;;  %v9171_v56 = vld [vmem:[%s12509_s4 + $0x10c8] ss:$16 sps:$4 sm:$0xff]  }
 0x2e1   :  { %5938 = vmatpush1.bf16.msra.mxu1 %v9081_v57  ;;  %6497 = vmatpush1.bf16.msra.mxu0 %v9084_v58  ;;  %v9176_v57 = vld [vmem:[%s12509_s4 + $0x10e4] ss:$16 sps:$4 sm:$0xff]   ;;  %v9179_v58 = vld [vmem:[%s12509_s4 + $0x10ec] ss:$16 sps:$4 sm:$0xff]  }
 0x2e2   :  { %5939 = vmatprep.subr.bf16.mxu1 %v9089_v59  ;;  %6498 = vmatprep.subr.bf16.mxu0 %v9092_v60  ;;  %v9174_v59 = vld [vmem:[%s12509_s4 + $0x10e0] ss:$16 sps:$4 sm:$0xff]   ;;  %v9177_v60 = vld [vmem:[%s12509_s4 + $0x10e8] ss:$16 sps:$4 sm:$0xff]  }
 0x2e5   :  { %5940 = vmatpush1.bf16.msra.mxu1 %v9087_v61  ;;  %6499 = vmatpush1.bf16.msra.mxu0 %v9090_v62  ;;  %v9182_v61 = vld [vmem:[%s12509_s4 + $0x1104] ss:$16 sps:$4 sm:$0xff]   ;;  %v9185_v62 = vld [vmem:[%s12509_s4 + $0x110c] ss:$16 sps:$4 sm:$0xff]  }
 0x2e6   :  { %5941 = vmatprep.subr.bf16.mxu1 %v9095_v63  ;;  %6500 = vmatprep.subr.bf16.mxu0 %v9098_v0  ;;  %v9180_v63 = vld [vmem:[%s12509_s4 + $0x1100] ss:$16 sps:$4 sm:$0xff]   ;;  %v9183_v0 = vld [vmem:[%s12509_s4 + $0x1108] ss:$16 sps:$4 sm:$0xff]  }
 0x2e9   :  { %5942 = vmatpush1.bf16.msra.mxu1 %v9093_v2  ;;  %6501 = vmatpush1.bf16.msra.mxu0 %v9096_v3  ;;  %v9188_v2 = vld [vmem:[%s12509_s4 + $0x1124] ss:$16 sps:$4 sm:$0xff]   ;;  %v9191_v3 = vld [vmem:[%s12509_s4 + $0x112c] ss:$16 sps:$4 sm:$0xff]  }
 0x2ea   :  { %5943 = vmatprep.subr.bf16.mxu1 %v9101_v4  ;;  %6502 = vmatprep.subr.bf16.mxu0 %v9104_v5  ;;  %v9186_v4 = vld [vmem:[%s12509_s4 + $0x1120] ss:$16 sps:$4 sm:$0xff]   ;;  %v9189_v5 = vld [vmem:[%s12509_s4 + $0x1128] ss:$16 sps:$4 sm:$0xff]  }
 0x2ed   :  { %5944 = vmatpush1.bf16.msra.mxu1 %v9099_v6  ;;  %6503 = vmatpush1.bf16.msra.mxu0 %v9102_v7  ;;  %v9194_v6 = vld [vmem:[%s12509_s4 + $0x1144] ss:$16 sps:$4 sm:$0xff]   ;;  %v9197_v7 = vld [vmem:[%s12509_s4 + $0x114c] ss:$16 sps:$4 sm:$0xff]  }
 0x2ee   :  { %5945 = vmatprep.subr.bf16.mxu1 %v9107_v8  ;;  %6504 = vmatprep.subr.bf16.mxu0 %v9110_v9  ;;  %v9192_v8 = vld [vmem:[%s12509_s4 + $0x1140] ss:$16 sps:$4 sm:$0xff]   ;;  %v9195_v9 = vld [vmem:[%s12509_s4 + $0x1148] ss:$16 sps:$4 sm:$0xff]  }
 0x2f1   :  { %5946 = vmatpush1.bf16.msra.mxu1 %v9105_v10  ;;  %6505 = vmatpush1.bf16.msra.mxu0 %v9108_v11  ;;  %v9200_v10 = vld [vmem:[%s12509_s4 + $0x1164] ss:$16 sps:$4 sm:$0xff]   ;;  %v9203_v11 = vld [vmem:[%s12509_s4 + $0x116c] ss:$16 sps:$4 sm:$0xff]  }
 0x2f2   :  { %5947 = vmatprep.subr.bf16.mxu1 %v9113_v12  ;;  %6506 = vmatprep.subr.bf16.mxu0 %v9116_v13  ;;  %v9198_v12 = vld [vmem:[%s12509_s4 + $0x1160] ss:$16 sps:$4 sm:$0xff]   ;;  %v9201_v13 = vld [vmem:[%s12509_s4 + $0x1168] ss:$16 sps:$4 sm:$0xff]  }
 0x2f5   :  { %5948 = vmatpush1.bf16.msra.mxu1 %v9111_v14  ;;  %6507 = vmatpush1.bf16.msra.mxu0 %v9114_v15  ;;  %v9206_v14 = vld [vmem:[%s12509_s4 + $0x1184] ss:$16 sps:$4 sm:$0xff]   ;;  %v9209_v15 = vld [vmem:[%s12509_s4 + $0x118c] ss:$16 sps:$4 sm:$0xff]  }
 0x2f6   :  { %5949 = vmatprep.subr.bf16.mxu1 %v9119_v16  ;;  %6508 = vmatprep.subr.bf16.mxu0 %v9122_v17  ;;  %v9204_v16 = vld [vmem:[%s12509_s4 + $0x1180] ss:$16 sps:$4 sm:$0xff]   ;;  %v9207_v17 = vld [vmem:[%s12509_s4 + $0x1188] ss:$16 sps:$4 sm:$0xff]  }
 0x2f9   :  { %5950 = vmatpush1.bf16.msra.mxu1 %v9117_v18  ;;  %6509 = vmatpush1.bf16.msra.mxu0 %v9120_v19  ;;  %v9212_v18 = vld [vmem:[%s12509_s4 + $0x11a4] ss:$16 sps:$4 sm:$0xff]   ;;  %v9215_v19 = vld [vmem:[%s12509_s4 + $0x11ac] ss:$16 sps:$4 sm:$0xff]  }
 0x2fa   :  { %5951 = vmatprep.subr.bf16.mxu1 %v9125_v20  ;;  %6510 = vmatprep.subr.bf16.mxu0 %v9128_v21  ;;  %v9210_v20 = vld [vmem:[%s12509_s4 + $0x11a0] ss:$16 sps:$4 sm:$0xff]   ;;  %v9213_v21 = vld [vmem:[%s12509_s4 + $0x11a8] ss:$16 sps:$4 sm:$0xff]  }
 0x2fd   :  { %5952 = vmatpush1.bf16.msra.mxu1 %v9123_v23  ;;  %6511 = vmatpush1.bf16.msra.mxu0 %v9126_v26  ;;  %v9218_v23 = vld [vmem:[%s12509_s4 + $0x11c4] ss:$16 sps:$4 sm:$0xff]   ;;  %v9221_v26 = vld [vmem:[%s12509_s4 + $0x11cc] ss:$16 sps:$4 sm:$0xff]  }
 0x2fe   :  { %5964 = vmatprep.subr.bf16.mxu1 %v9134_v27  ;;  %6523 = vmatprep.subr.bf16.mxu0 %v9137_v28  ;;  %v9216_v27 = vld [vmem:[%s12509_s4 + $0x11c0] ss:$16 sps:$4 sm:$0xff]   ;;  %v9219_v28 = vld [vmem:[%s12509_s4 + $0x11c8] ss:$16 sps:$4 sm:$0xff]  }
 0x300   :  { %5954 = vmatmul.mubr.bf16.vlgmr.msra.gmra.mrb[0].mxu1 %v9129_v29  ;;  %6513 = vmatmul.mubr.bf16.vlgmr.msra.gmra.mrb[4].mxu0 %v9129_v29  ;;  %v9224_v29 = vld [vmem:[%s12509_s4 + $0x11e4] ss:$16 sps:$4 sm:$0xff]  }
 0x301   :  { %5965 = vmatpush1.bf16.msra.mxu1 %v9132_v30  ;;  %6524 = vmatpush1.bf16.msra.mxu0 %v9135_v31  ;;  %v9227_v30 = vld [vmem:[%s12509_s4 + $0x11ec] ss:$16 sps:$4 sm:$0xff]   ;;  %v9222_v31 = vld [vmem:[%s12509_s4 + $0x11e0] ss:$16 sps:$4 sm:$0xff]  }
 0x302   :  { %5966 = vmatprep.subr.bf16.mxu1 %v9140_v32  ;;  %6525 = vmatprep.subr.bf16.mxu0 %v9143_v33  ;;  %v9225_v32 = vld [vmem:[%s12509_s4 + $0x11e8] ss:$16 sps:$4 sm:$0xff]   ;;  %v9233_v33 = vld [vmem:[%s12509_s4 + $0x1204] ss:$16 sps:$4 sm:$0xff]  }
 0x303   :  { %5996 = vmatprep.mubr.bf16.mxu1 %v9230_v34  ;;  %6555 = vmatprep.mubr.bf16.mxu0 %v9230_v34  ;;  %v9236_v34 = vld [vmem:[%s12509_s4 + $0x120c] ss:$16 sps:$4 sm:$0xff]  }
 0x305   :  { %5967 = vmatpush1.bf16.msra.mxu1 %v9138_v35  ;;  %6526 = vmatpush1.bf16.msra.mxu0 %v9141_v36  ;;  %v9228_v35 = vld [vmem:[%s12510_s0 + $0x40] ss:$100 sps:$4 sm:$0xff]  }
 0x306   :  { %5968 = vmatprep.subr.bf16.mxu1 %v9146_v37  ;;  %6527 = vmatprep.subr.bf16.mxu0 %v9149_v38  ;;  %v9231_v36 = vld [vmem:[%s12509_s4 + $0x1200] ss:$16 sps:$4 sm:$0xff]   ;;  %v9234_v37 = vld [vmem:[%s12509_s4 + $0x1208] ss:$16 sps:$4 sm:$0xff]   ;;  %v9239_v38 = vld [vmem:[%s12509_s4 + $0x1224] ss:$16 sps:$4 sm:$0xff]  }
 0x309   :  { %5969 = vmatpush1.bf16.msra.mxu1 %v9144_v39  ;;  %6528 = vmatpush1.bf16.msra.mxu0 %v9147_v40  ;;  %v9242_v39 = vld [vmem:[%s12509_s4 + $0x122c] ss:$16 sps:$4 sm:$0xff]  }
 0x30a   :  { %5970 = vmatprep.subr.bf16.mxu1 %v9152_v41  ;;  %6529 = vmatprep.subr.bf16.mxu0 %v9155_v42  ;;  %v9329_v40 = vld [vmem:[%s12510_s0 + $0x4c] ss:$100 sps:$4 sm:$0xff]   ;;  %v9240_v42 = vld [vmem:[%s12509_s4 + $0x1228] ss:$16 sps:$4 sm:$0xff]  }
 0x30b   :  { %v9237_v41 = vld [vmem:[%s12509_s4 + $0x1220] ss:$16 sps:$4 sm:$0xff]  }
 0x30d   :  { %5971 = vmatpush1.bf16.msra.mxu1 %v9150_v43  ;;  %6530 = vmatpush1.bf16.msra.mxu0 %v9153_v44  ;;  %v9245_v43 = vld [vmem:[%s12509_s4 + $0x1244] ss:$16 sps:$4 sm:$0xff]   ;;  %v9248_v44 = vld [vmem:[%s12509_s4 + $0x124c] ss:$16 sps:$4 sm:$0xff]  }
 0x30e   :  { %5972 = vmatprep.subr.bf16.mxu1 %v9158_v45  ;;  %6531 = vmatprep.subr.bf16.mxu0 %v9161_v46  ;;  %v9243_v45 = vld [vmem:[%s12509_s4 + $0x1240] ss:$16 sps:$4 sm:$0xff]   ;;  %v9246_v46 = vld [vmem:[%s12509_s4 + $0x1248] ss:$16 sps:$4 sm:$0xff]  }
 0x311   :  { %5973 = vmatpush1.bf16.msra.mxu1 %v9156_v47  ;;  %6532 = vmatpush1.bf16.msra.mxu0 %v9159_v48  ;;  %v9251_v47 = vld [vmem:[%s12509_s4 + $0x1264] ss:$16 sps:$4 sm:$0xff]   ;;  %v9254_v48 = vld [vmem:[%s12509_s4 + $0x126c] ss:$16 sps:$4 sm:$0xff]  }
 0x312   :  { %5974 = vmatprep.subr.bf16.mxu1 %v9164_v49  ;;  %6533 = vmatprep.subr.bf16.mxu0 %v9167_v50  ;;  %v9249_v49 = vld [vmem:[%s12509_s4 + $0x1260] ss:$16 sps:$4 sm:$0xff]   ;;  %v9252_v50 = vld [vmem:[%s12509_s4 + $0x1268] ss:$16 sps:$4 sm:$0xff]  }
 0x315   :  { %5975 = vmatpush1.bf16.msra.mxu1 %v9162_v51  ;;  %6534 = vmatpush1.bf16.msra.mxu0 %v9165_v52  ;;  %v9257_v51 = vld [vmem:[%s12509_s4 + $0x1284] ss:$16 sps:$4 sm:$0xff]   ;;  %v9260_v52 = vld [vmem:[%s12509_s4 + $0x128c] ss:$16 sps:$4 sm:$0xff]  }
 0x316   :  { %5976 = vmatprep.subr.bf16.mxu1 %v9170_v53  ;;  %6535 = vmatprep.subr.bf16.mxu0 %v9173_v54  ;;  %v9255_v53 = vld [vmem:[%s12509_s4 + $0x1280] ss:$16 sps:$4 sm:$0xff]   ;;  %v9258_v54 = vld [vmem:[%s12509_s4 + $0x1288] ss:$16 sps:$4 sm:$0xff]  }
 0x319   :  { %5977 = vmatpush1.bf16.msra.mxu1 %v9168_v55  ;;  %6536 = vmatpush1.bf16.msra.mxu0 %v9171_v56  ;;  %v9263_v55 = vld [vmem:[%s12509_s4 + $0x12a4] ss:$16 sps:$4 sm:$0xff]   ;;  %v9266_v56 = vld [vmem:[%s12509_s4 + $0x12ac] ss:$16 sps:$4 sm:$0xff]  }
 0x31a   :  { %5978 = vmatprep.subr.bf16.mxu1 %v9176_v57  ;;  %6537 = vmatprep.subr.bf16.mxu0 %v9179_v58  ;;  %v9261_v57 = vld [vmem:[%s12509_s4 + $0x12a0] ss:$16 sps:$4 sm:$0xff]   ;;  %v9264_v58 = vld [vmem:[%s12509_s4 + $0x12a8] ss:$16 sps:$4 sm:$0xff]  }
 0x31d   :  { %5979 = vmatpush1.bf16.msra.mxu1 %v9174_v59  ;;  %6538 = vmatpush1.bf16.msra.mxu0 %v9177_v60  ;;  %v9269_v59 = vld [vmem:[%s12509_s4 + $0x12c4] ss:$16 sps:$4 sm:$0xff]   ;;  %v9272_v60 = vld [vmem:[%s12509_s4 + $0x12cc] ss:$16 sps:$4 sm:$0xff]  }
 0x31e   :  { %5980 = vmatprep.subr.bf16.mxu1 %v9182_v61  ;;  %6539 = vmatprep.subr.bf16.mxu0 %v9185_v62  ;;  %v9267_v61 = vld [vmem:[%s12509_s4 + $0x12c0] ss:$16 sps:$4 sm:$0xff]   ;;  %v9270_v62 = vld [vmem:[%s12509_s4 + $0x12c8] ss:$16 sps:$4 sm:$0xff]  }
 0x321   :  { %5981 = vmatpush1.bf16.msra.mxu1 %v9180_v63  ;;  %6540 = vmatpush1.bf16.msra.mxu0 %v9183_v0  ;;  %v9275_v63 = vld [vmem:[%s12509_s4 + $0x12e4] ss:$16 sps:$4 sm:$0xff]   ;;  %v9278_v0 = vld [vmem:[%s12509_s4 + $0x12ec] ss:$16 sps:$4 sm:$0xff]  }
 0x322   :  { %5982 = vmatprep.subr.bf16.mxu1 %v9188_v2  ;;  %6541 = vmatprep.subr.bf16.mxu0 %v9191_v3  ;;  %v9273_v2 = vld [vmem:[%s12509_s4 + $0x12e0] ss:$16 sps:$4 sm:$0xff]   ;;  %v9276_v3 = vld [vmem:[%s12509_s4 + $0x12e8] ss:$16 sps:$4 sm:$0xff]  }
 0x325   :  { %5983 = vmatpush1.bf16.msra.mxu1 %v9186_v4  ;;  %6542 = vmatpush1.bf16.msra.mxu0 %v9189_v5  ;;  %v9281_v4 = vld [vmem:[%s12509_s4 + $0x1304] ss:$16 sps:$4 sm:$0xff]   ;;  %v9284_v5 = vld [vmem:[%s12509_s4 + $0x130c] ss:$16 sps:$4 sm:$0xff]  }
 0x326   :  { %5984 = vmatprep.subr.bf16.mxu1 %v9194_v6  ;;  %6543 = vmatprep.subr.bf16.mxu0 %v9197_v7  ;;  %v9279_v6 = vld [vmem:[%s12509_s4 + $0x1300] ss:$16 sps:$4 sm:$0xff]   ;;  %v9282_v7 = vld [vmem:[%s12509_s4 + $0x1308] ss:$16 sps:$4 sm:$0xff]  }
 0x329   :  { %5985 = vmatpush1.bf16.msra.mxu1 %v9192_v8  ;;  %6544 = vmatpush1.bf16.msra.mxu0 %v9195_v9  ;;  %v9287_v8 = vld [vmem:[%s12509_s4 + $0x1324] ss:$16 sps:$4 sm:$0xff]   ;;  %v9290_v9 = vld [vmem:[%s12509_s4 + $0x132c] ss:$16 sps:$4 sm:$0xff]  }
 0x32a   :  { %5986 = vmatprep.subr.bf16.mxu1 %v9200_v10  ;;  %6545 = vmatprep.subr.bf16.mxu0 %v9203_v11  ;;  %v9285_v10 = vld [vmem:[%s12509_s4 + $0x1320] ss:$16 sps:$4 sm:$0xff]   ;;  %v9288_v11 = vld [vmem:[%s12509_s4 + $0x1328] ss:$16 sps:$4 sm:$0xff]  }
 0x32d   :  { %5987 = vmatpush1.bf16.msra.mxu1 %v9198_v12  ;;  %6546 = vmatpush1.bf16.msra.mxu0 %v9201_v13  ;;  %v9293_v12 = vld [vmem:[%s12509_s4 + $0x1344] ss:$16 sps:$4 sm:$0xff]   ;;  %v9296_v13 = vld [vmem:[%s12509_s4 + $0x134c] ss:$16 sps:$4 sm:$0xff]  }
 0x32e   :  { %5988 = vmatprep.subr.bf16.mxu1 %v9206_v14  ;;  %6547 = vmatprep.subr.bf16.mxu0 %v9209_v15  ;;  %v9291_v14 = vld [vmem:[%s12509_s4 + $0x1340] ss:$16 sps:$4 sm:$0xff]   ;;  %v9294_v15 = vld [vmem:[%s12509_s4 + $0x1348] ss:$16 sps:$4 sm:$0xff]  }
 0x331   :  { %5989 = vmatpush1.bf16.msra.mxu1 %v9204_v16  ;;  %6548 = vmatpush1.bf16.msra.mxu0 %v9207_v17  ;;  %v9299_v16 = vld [vmem:[%s12509_s4 + $0x1364] ss:$16 sps:$4 sm:$0xff]   ;;  %v9302_v17 = vld [vmem:[%s12509_s4 + $0x136c] ss:$16 sps:$4 sm:$0xff]  }
 0x332   :  { %5990 = vmatprep.subr.bf16.mxu1 %v9212_v18  ;;  %6549 = vmatprep.subr.bf16.mxu0 %v9215_v19  ;;  %v9297_v18 = vld [vmem:[%s12509_s4 + $0x1360] ss:$16 sps:$4 sm:$0xff]   ;;  %v9300_v19 = vld [vmem:[%s12509_s4 + $0x1368] ss:$16 sps:$4 sm:$0xff]  }
 0x335   :  { %5991 = vmatpush1.bf16.msra.mxu1 %v9210_v20  ;;  %6550 = vmatpush1.bf16.msra.mxu0 %v9213_v21  ;;  %v9305_v20 = vld [vmem:[%s12509_s4 + $0x1384] ss:$16 sps:$4 sm:$0xff]   ;;  %v9308_v21 = vld [vmem:[%s12509_s4 + $0x138c] ss:$16 sps:$4 sm:$0xff]  }
 0x336   :  { %5992 = vmatprep.subr.bf16.mxu1 %v9218_v23  ;;  %6551 = vmatprep.subr.bf16.mxu0 %v9221_v26  ;;  %v9303_v23 = vld [vmem:[%s12509_s4 + $0x1380] ss:$16 sps:$4 sm:$0xff]   ;;  %v9306_v26 = vld [vmem:[%s12509_s4 + $0x1388] ss:$16 sps:$4 sm:$0xff]  }
 0x339   :  { %5993 = vmatpush1.bf16.msra.mxu1 %v9216_v27  ;;  %6552 = vmatpush1.bf16.msra.mxu0 %v9219_v28  ;;  %v9311_v27 = vld [vmem:[%s12509_s4 + $0x13a4] ss:$16 sps:$4 sm:$0xff]   ;;  %v9314_v28 = vld [vmem:[%s12509_s4 + $0x13ac] ss:$16 sps:$4 sm:$0xff]  }
 0x33a   :  { %5994 = vmatprep.subr.bf16.mxu1 %v9224_v29  ;;  %6553 = vmatprep.subr.bf16.mxu0 %v9227_v30  ;;  %v9309_v29 = vld [vmem:[%s12509_s4 + $0x13a0] ss:$16 sps:$4 sm:$0xff]   ;;  %v9312_v30 = vld [vmem:[%s12509_s4 + $0x13a8] ss:$16 sps:$4 sm:$0xff]  }
 0x33d   :  { %5995 = vmatpush1.bf16.msra.mxu1 %v9222_v31  ;;  %6554 = vmatpush1.bf16.msra.mxu0 %v9225_v32  ;;  %v9317_v31 = vld [vmem:[%s12509_s4 + $0x13c4] ss:$16 sps:$4 sm:$0xff]   ;;  %v9320_v32 = vld [vmem:[%s12509_s4 + $0x13cc] ss:$16 sps:$4 sm:$0xff]  }
 0x33e   :  { %6007 = vmatprep.subr.bf16.mxu1 %v9233_v33  ;;  %6566 = vmatprep.subr.bf16.mxu0 %v9236_v34  ;;  %v9315_v33 = vld [vmem:[%s12509_s4 + $0x13c0] ss:$16 sps:$4 sm:$0xff]   ;;  %v9318_v34 = vld [vmem:[%s12509_s4 + $0x13c8] ss:$16 sps:$4 sm:$0xff]  }
 0x340   :  { %5997 = vmatmul.mubr.bf16.vlgmr.msra.gmra.mrb[0].mxu1 %v9228_v35  ;;  %6556 = vmatmul.mubr.bf16.vlgmr.msra.gmra.mrb[4].mxu0 %v9228_v35  ;;  %v9323_v35 = vld [vmem:[%s12509_s4 + $0x13e4] ss:$16 sps:$4 sm:$0xff]  }
 0x341   :  { %6008 = vmatpush1.bf16.msra.mxu1 %v9231_v36  ;;  %6567 = vmatpush1.bf16.msra.mxu0 %v9234_v37  ;;  %v9326_v36 = vld [vmem:[%s12509_s4 + $0x13ec] ss:$16 sps:$4 sm:$0xff]   ;;  %v9321_v37 = vld [vmem:[%s12509_s4 + $0x13e0] ss:$16 sps:$4 sm:$0xff]  }
 0x342   :  { %6009 = vmatprep.subr.bf16.mxu1 %v9239_v38  ;;  %6568 = vmatprep.subr.bf16.mxu0 %v9242_v39  ;;  %v9324_v38 = vld [vmem:[%s12509_s4 + $0x13e8] ss:$16 sps:$4 sm:$0xff]   ;;  %v9332_v39 = vld [vmem:[%s12509_s4 + $0x1404] ss:$16 sps:$4 sm:$0xff]  }
 0x343   :  { %6039 = vmatprep.mubr.bf16.mxu1 %v9329_v40  ;;  %6598 = vmatprep.mubr.bf16.mxu0 %v9329_v40  ;;  %v9335_v40 = vld [vmem:[%s12509_s4 + $0x140c] ss:$16 sps:$4 sm:$0xff]  }
 0x345   :  { %6010 = vmatpush1.bf16.msra.mxu1 %v9237_v41  ;;  %6569 = vmatpush1.bf16.msra.mxu0 %v9240_v42  ;;  %v9327_v41 = vld [vmem:[%s12510_s0 + $0x48] ss:$100 sps:$4 sm:$0xff]   ;;  %v9330_v42 = vld [vmem:[%s12509_s4 + $0x1400] ss:$16 sps:$4 sm:$0xff]  }
 0x346   :  { %6011 = vmatprep.subr.bf16.mxu1 %v9245_v43  ;;  %6570 = vmatprep.subr.bf16.mxu0 %v9248_v44  ;;  %v9333_v43 = vld [vmem:[%s12509_s4 + $0x1408] ss:$16 sps:$4 sm:$0xff]   ;;  %v9338_v44 = vld [vmem:[%s12509_s4 + $0x1424] ss:$16 sps:$4 sm:$0xff]  }
 0x349   :  { %6012 = vmatpush1.bf16.msra.mxu1 %v9243_v45  ;;  %6571 = vmatpush1.bf16.msra.mxu0 %v9246_v46  ;;  %v9341_v45 = vld [vmem:[%s12509_s4 + $0x142c] ss:$16 sps:$4 sm:$0xff]   ;;  %v9428_v46 = vld [vmem:[%s12510_s0 + $0x54] ss:$100 sps:$4 sm:$0xff]  }
 0x34a   :  { %6013 = vmatprep.subr.bf16.mxu1 %v9251_v47  ;;  %6572 = vmatprep.subr.bf16.mxu0 %v9254_v48  ;;  %v9336_v47 = vld [vmem:[%s12509_s4 + $0x1420] ss:$16 sps:$4 sm:$0xff]   ;;  %v9339_v48 = vld [vmem:[%s12509_s4 + $0x1428] ss:$16 sps:$4 sm:$0xff]  }
 0x34d   :  { %6014 = vmatpush1.bf16.msra.mxu1 %v9249_v49  ;;  %6573 = vmatpush1.bf16.msra.mxu0 %v9252_v50  ;;  %v9344_v49 = vld [vmem:[%s12509_s4 + $0x1444] ss:$16 sps:$4 sm:$0xff]   ;;  %v9347_v50 = vld [vmem:[%s12509_s4 + $0x144c] ss:$16 sps:$4 sm:$0xff]  }
 0x34e   :  { %6015 = vmatprep.subr.bf16.mxu1 %v9257_v51  ;;  %6574 = vmatprep.subr.bf16.mxu0 %v9260_v52  ;;  %v9342_v51 = vld [vmem:[%s12509_s4 + $0x1440] ss:$16 sps:$4 sm:$0xff]   ;;  %v9345_v52 = vld [vmem:[%s12509_s4 + $0x1448] ss:$16 sps:$4 sm:$0xff]  }
 0x351   :  { %6016 = vmatpush1.bf16.msra.mxu1 %v9255_v53  ;;  %6575 = vmatpush1.bf16.msra.mxu0 %v9258_v54  ;;  %v9350_v53 = vld [vmem:[%s12509_s4 + $0x1464] ss:$16 sps:$4 sm:$0xff]   ;;  %v9353_v54 = vld [vmem:[%s12509_s4 + $0x146c] ss:$16 sps:$4 sm:$0xff]  }
 0x352   :  { %6017 = vmatprep.subr.bf16.mxu1 %v9263_v55  ;;  %6576 = vmatprep.subr.bf16.mxu0 %v9266_v56  ;;  %v9348_v55 = vld [vmem:[%s12509_s4 + $0x1460] ss:$16 sps:$4 sm:$0xff]   ;;  %v9351_v56 = vld [vmem:[%s12509_s4 + $0x1468] ss:$16 sps:$4 sm:$0xff]  }
 0x355   :  { %6018 = vmatpush1.bf16.msra.mxu1 %v9261_v57  ;;  %6577 = vmatpush1.bf16.msra.mxu0 %v9264_v58  ;;  %v9356_v57 = vld [vmem:[%s12509_s4 + $0x1484] ss:$16 sps:$4 sm:$0xff]   ;;  %v9359_v58 = vld [vmem:[%s12509_s4 + $0x148c] ss:$16 sps:$4 sm:$0xff]  }
 0x356   :  { %6019 = vmatprep.subr.bf16.mxu1 %v9269_v59  ;;  %6578 = vmatprep.subr.bf16.mxu0 %v9272_v60  ;;  %v9354_v59 = vld [vmem:[%s12509_s4 + $0x1480] ss:$16 sps:$4 sm:$0xff]   ;;  %v9357_v60 = vld [vmem:[%s12509_s4 + $0x1488] ss:$16 sps:$4 sm:$0xff]  }
 0x359   :  { %6020 = vmatpush1.bf16.msra.mxu1 %v9267_v61  ;;  %6579 = vmatpush1.bf16.msra.mxu0 %v9270_v62  ;;  %v9362_v61 = vld [vmem:[%s12509_s4 + $0x14a4] ss:$16 sps:$4 sm:$0xff]   ;;  %v9365_v62 = vld [vmem:[%s12509_s4 + $0x14ac] ss:$16 sps:$4 sm:$0xff]  }
 0x35a   :  { %6021 = vmatprep.subr.bf16.mxu1 %v9275_v63  ;;  %6580 = vmatprep.subr.bf16.mxu0 %v9278_v0  ;;  %v9360_v63 = vld [vmem:[%s12509_s4 + $0x14a0] ss:$16 sps:$4 sm:$0xff]   ;;  %v9363_v0 = vld [vmem:[%s12509_s4 + $0x14a8] ss:$16 sps:$4 sm:$0xff]  }
 0x35d   :  { %6022 = vmatpush1.bf16.msra.mxu1 %v9273_v2  ;;  %6581 = vmatpush1.bf16.msra.mxu0 %v9276_v3  ;;  %v9368_v2 = vld [vmem:[%s12509_s4 + $0x14c4] ss:$16 sps:$4 sm:$0xff]   ;;  %v9371_v3 = vld [vmem:[%s12509_s4 + $0x14cc] ss:$16 sps:$4 sm:$0xff]  }
 0x35e   :  { %6023 = vmatprep.subr.bf16.mxu1 %v9281_v4  ;;  %6582 = vmatprep.subr.bf16.mxu0 %v9284_v5  ;;  %v9366_v4 = vld [vmem:[%s12509_s4 + $0x14c0] ss:$16 sps:$4 sm:$0xff]   ;;  %v9369_v5 = vld [vmem:[%s12509_s4 + $0x14c8] ss:$16 sps:$4 sm:$0xff]  }
 0x361   :  { %6024 = vmatpush1.bf16.msra.mxu1 %v9279_v6  ;;  %6583 = vmatpush1.bf16.msra.mxu0 %v9282_v7  ;;  %v9374_v6 = vld [vmem:[%s12509_s4 + $0x14e4] ss:$16 sps:$4 sm:$0xff]   ;;  %v9377_v7 = vld [vmem:[%s12509_s4 + $0x14ec] ss:$16 sps:$4 sm:$0xff]  }
 0x362   :  { %6025 = vmatprep.subr.bf16.mxu1 %v9287_v8  ;;  %6584 = vmatprep.subr.bf16.mxu0 %v9290_v9  ;;  %v9372_v8 = vld [vmem:[%s12509_s4 + $0x14e0] ss:$16 sps:$4 sm:$0xff]   ;;  %v9375_v9 = vld [vmem:[%s12509_s4 + $0x14e8] ss:$16 sps:$4 sm:$0xff]  }
 0x365   :  { %6026 = vmatpush1.bf16.msra.mxu1 %v9285_v10  ;;  %6585 = vmatpush1.bf16.msra.mxu0 %v9288_v11  ;;  %v9380_v10 = vld [vmem:[%s12509_s4 + $0x1504] ss:$16 sps:$4 sm:$0xff]   ;;  %v9383_v11 = vld [vmem:[%s12509_s4 + $0x150c] ss:$16 sps:$4 sm:$0xff]  }
 0x366   :  { %6027 = vmatprep.subr.bf16.mxu1 %v9293_v12  ;;  %6586 = vmatprep.subr.bf16.mxu0 %v9296_v13  ;;  %v9378_v12 = vld [vmem:[%s12509_s4 + $0x1500] ss:$16 sps:$4 sm:$0xff]   ;;  %v9381_v13 = vld [vmem:[%s12509_s4 + $0x1508] ss:$16 sps:$4 sm:$0xff]  }
 0x369   :  { %6028 = vmatpush1.bf16.msra.mxu1 %v9291_v14  ;;  %6587 = vmatpush1.bf16.msra.mxu0 %v9294_v15  ;;  %v9386_v14 = vld [vmem:[%s12509_s4 + $0x1524] ss:$16 sps:$4 sm:$0xff]   ;;  %v9389_v15 = vld [vmem:[%s12509_s4 + $0x152c] ss:$16 sps:$4 sm:$0xff]  }
 0x36a   :  { %6029 = vmatprep.subr.bf16.mxu1 %v9299_v16  ;;  %6588 = vmatprep.subr.bf16.mxu0 %v9302_v17  ;;  %v9384_v16 = vld [vmem:[%s12509_s4 + $0x1520] ss:$16 sps:$4 sm:$0xff]   ;;  %v9387_v17 = vld [vmem:[%s12509_s4 + $0x1528] ss:$16 sps:$4 sm:$0xff]  }
 0x36d   :  { %6030 = vmatpush1.bf16.msra.mxu1 %v9297_v18  ;;  %6589 = vmatpush1.bf16.msra.mxu0 %v9300_v19  ;;  %v9392_v18 = vld [vmem:[%s12509_s4 + $0x1544] ss:$16 sps:$4 sm:$0xff]   ;;  %v9395_v19 = vld [vmem:[%s12509_s4 + $0x154c] ss:$16 sps:$4 sm:$0xff]  }
 0x36e   :  { %6031 = vmatprep.subr.bf16.mxu1 %v9305_v20  ;;  %6590 = vmatprep.subr.bf16.mxu0 %v9308_v21  ;;  %v9390_v20 = vld [vmem:[%s12509_s4 + $0x1540] ss:$16 sps:$4 sm:$0xff]   ;;  %v9393_v21 = vld [vmem:[%s12509_s4 + $0x1548] ss:$16 sps:$4 sm:$0xff]  }
 0x371   :  { %6032 = vmatpush1.bf16.msra.mxu1 %v9303_v23  ;;  %6591 = vmatpush1.bf16.msra.mxu0 %v9306_v26  ;;  %v9398_v23 = vld [vmem:[%s12509_s4 + $0x1564] ss:$16 sps:$4 sm:$0xff]   ;;  %v9401_v26 = vld [vmem:[%s12509_s4 + $0x156c] ss:$16 sps:$4 sm:$0xff]  }
 0x372   :  { %6033 = vmatprep.subr.bf16.mxu1 %v9311_v27  ;;  %6592 = vmatprep.subr.bf16.mxu0 %v9314_v28  ;;  %v9396_v27 = vld [vmem:[%s12509_s4 + $0x1560] ss:$16 sps:$4 sm:$0xff]   ;;  %v9399_v28 = vld [vmem:[%s12509_s4 + $0x1568] ss:$16 sps:$4 sm:$0xff]  }
 0x375   :  { %6034 = vmatpush1.bf16.msra.mxu1 %v9309_v29  ;;  %6593 = vmatpush1.bf16.msra.mxu0 %v9312_v30  ;;  %v9404_v29 = vld [vmem:[%s12509_s4 + $0x1584] ss:$16 sps:$4 sm:$0xff]   ;;  %v9407_v30 = vld [vmem:[%s12509_s4 + $0x158c] ss:$16 sps:$4 sm:$0xff]  }
 0x376   :  { %6035 = vmatprep.subr.bf16.mxu1 %v9317_v31  ;;  %6594 = vmatprep.subr.bf16.mxu0 %v9320_v32  ;;  %v9402_v31 = vld [vmem:[%s12509_s4 + $0x1580] ss:$16 sps:$4 sm:$0xff]   ;;  %v9405_v32 = vld [vmem:[%s12509_s4 + $0x1588] ss:$16 sps:$4 sm:$0xff]  }
 0x379   :  { %6036 = vmatpush1.bf16.msra.mxu1 %v9315_v33  ;;  %6595 = vmatpush1.bf16.msra.mxu0 %v9318_v34  ;;  %v9410_v33 = vld [vmem:[%s12509_s4 + $0x15a4] ss:$16 sps:$4 sm:$0xff]   ;;  %v9413_v34 = vld [vmem:[%s12509_s4 + $0x15ac] ss:$16 sps:$4 sm:$0xff]  }
 0x37a   :  { %6037 = vmatprep.subr.bf16.mxu1 %v9323_v35  ;;  %6596 = vmatprep.subr.bf16.mxu0 %v9326_v36  ;;  %v9408_v35 = vld [vmem:[%s12509_s4 + $0x15a0] ss:$16 sps:$4 sm:$0xff]   ;;  %v9411_v36 = vld [vmem:[%s12509_s4 + $0x15a8] ss:$16 sps:$4 sm:$0xff]  }
 0x37d   :  { %6038 = vmatpush1.bf16.msra.mxu1 %v9321_v37  ;;  %6597 = vmatpush1.bf16.msra.mxu0 %v9324_v38  ;;  %v9416_v37 = vld [vmem:[%s12509_s4 + $0x15c4] ss:$16 sps:$4 sm:$0xff]   ;;  %v9419_v38 = vld [vmem:[%s12509_s4 + $0x15cc] ss:$16 sps:$4 sm:$0xff]  }
 0x37e   :  { %6050 = vmatprep.subr.bf16.mxu1 %v9332_v39  ;;  %6609 = vmatprep.subr.bf16.mxu0 %v9335_v40  ;;  %v9414_v39 = vld [vmem:[%s12509_s4 + $0x15c0] ss:$16 sps:$4 sm:$0xff]   ;;  %v9417_v40 = vld [vmem:[%s12509_s4 + $0x15c8] ss:$16 sps:$4 sm:$0xff]  }
 0x380   :  { %6040 = vmatmul.mubr.bf16.vlgmr.msra.gmra.mrb[0].mxu1 %v9327_v41  ;;  %6599 = vmatmul.mubr.bf16.vlgmr.msra.gmra.mrb[4].mxu0 %v9327_v41  ;;  %v9422_v41 = vld [vmem:[%s12509_s4 + $0x15e4] ss:$16 sps:$4 sm:$0xff]  }
 0x381   :  { %6051 = vmatpush1.bf16.msra.mxu1 %v9330_v42  ;;  %6610 = vmatpush1.bf16.msra.mxu0 %v9333_v43  ;;  %v9425_v42 = vld [vmem:[%s12509_s4 + $0x15ec] ss:$16 sps:$4 sm:$0xff]   ;;  %v9420_v43 = vld [vmem:[%s12509_s4 + $0x15e0] ss:$16 sps:$4 sm:$0xff]  }
 0x382   :  { %6052 = vmatprep.subr.bf16.mxu1 %v9338_v44  ;;  %6611 = vmatprep.subr.bf16.mxu0 %v9341_v45  ;;  %v9423_v44 = vld [vmem:[%s12509_s4 + $0x15e8] ss:$16 sps:$4 sm:$0xff]   ;;  %v9431_v45 = vld [vmem:[%s12509_s4 + $0x1604] ss:$16 sps:$4 sm:$0xff]  }
 0x383   :  { %6082 = vmatprep.mubr.bf16.mxu1 %v9428_v46  ;;  %6641 = vmatprep.mubr.bf16.mxu0 %v9428_v46  ;;  %v9434_v46 = vld [vmem:[%s12509_s4 + $0x160c] ss:$16 sps:$4 sm:$0xff]  }
 0x385   :  { %6053 = vmatpush1.bf16.msra.mxu1 %v9336_v47  ;;  %6612 = vmatpush1.bf16.msra.mxu0 %v9339_v48  ;;  %v9426_v47 = vld [vmem:[%s12510_s0 + $0x50] ss:$100 sps:$4 sm:$0xff]  }
 0x386   :  { %6054 = vmatprep.subr.bf16.mxu1 %v9344_v49  ;;  %6613 = vmatprep.subr.bf16.mxu0 %v9347_v50  ;;  %v9429_v48 = vld [vmem:[%s12509_s4 + $0x1600] ss:$16 sps:$4 sm:$0xff]   ;;  %v9432_v49 = vld [vmem:[%s12509_s4 + $0x1608] ss:$16 sps:$4 sm:$0xff]   ;;  %v9437_v50 = vld [vmem:[%s12509_s4 + $0x1624] ss:$16 sps:$4 sm:$0xff]  }
 0x389   :  { %6055 = vmatpush1.bf16.msra.mxu1 %v9342_v51  ;;  %6614 = vmatpush1.bf16.msra.mxu0 %v9345_v52  ;;  %v9440_v51 = vld [vmem:[%s12509_s4 + $0x162c] ss:$16 sps:$4 sm:$0xff]  }
 0x38a   :  { %6056 = vmatprep.subr.bf16.mxu1 %v9350_v53  ;;  %6615 = vmatprep.subr.bf16.mxu0 %v9353_v54  ;;  %v9527_v52 = vld [vmem:[%s12510_s0 + $0x5c] ss:$100 sps:$4 sm:$0xff]   ;;  %v9438_v54 = vld [vmem:[%s12509_s4 + $0x1628] ss:$16 sps:$4 sm:$0xff]  }
 0x38b   :  { %v9435_v53 = vld [vmem:[%s12509_s4 + $0x1620] ss:$16 sps:$4 sm:$0xff]  }
 0x38d   :  { %6057 = vmatpush1.bf16.msra.mxu1 %v9348_v55  ;;  %6616 = vmatpush1.bf16.msra.mxu0 %v9351_v56  ;;  %v9443_v55 = vld [vmem:[%s12509_s4 + $0x1644] ss:$16 sps:$4 sm:$0xff]   ;;  %v9446_v56 = vld [vmem:[%s12509_s4 + $0x164c] ss:$16 sps:$4 sm:$0xff]  }
 0x38e   :  { %6058 = vmatprep.subr.bf16.mxu1 %v9356_v57  ;;  %6617 = vmatprep.subr.bf16.mxu0 %v9359_v58  ;;  %v9441_v57 = vld [vmem:[%s12509_s4 + $0x1640] ss:$16 sps:$4 sm:$0xff]   ;;  %v9444_v58 = vld [vmem:[%s12509_s4 + $0x1648] ss:$16 sps:$4 sm:$0xff]  }
 0x391   :  { %6059 = vmatpush1.bf16.msra.mxu1 %v9354_v59  ;;  %6618 = vmatpush1.bf16.msra.mxu0 %v9357_v60  ;;  %v9449_v59 = vld [vmem:[%s12509_s4 + $0x1664] ss:$16 sps:$4 sm:$0xff]   ;;  %v9452_v60 = vld [vmem:[%s12509_s4 + $0x166c] ss:$16 sps:$4 sm:$0xff]  }
 0x392   :  { %6060 = vmatprep.subr.bf16.mxu1 %v9362_v61  ;;  %6619 = vmatprep.subr.bf16.mxu0 %v9365_v62  ;;  %v9447_v61 = vld [vmem:[%s12509_s4 + $0x1660] ss:$16 sps:$4 sm:$0xff]   ;;  %v9450_v62 = vld [vmem:[%s12509_s4 + $0x1668] ss:$16 sps:$4 sm:$0xff]  }
 0x395   :  { %6061 = vmatpush1.bf16.msra.mxu1 %v9360_v63  ;;  %6620 = vmatpush1.bf16.msra.mxu0 %v9363_v0  ;;  %v9455_v63 = vld [vmem:[%s12509_s4 + $0x1684] ss:$16 sps:$4 sm:$0xff]   ;;  %v9458_v0 = vld [vmem:[%s12509_s4 + $0x168c] ss:$16 sps:$4 sm:$0xff]  }
 0x396   :  { %6062 = vmatprep.subr.bf16.mxu1 %v9368_v2  ;;  %6621 = vmatprep.subr.bf16.mxu0 %v9371_v3  ;;  %v9453_v2 = vld [vmem:[%s12509_s4 + $0x1680] ss:$16 sps:$4 sm:$0xff]   ;;  %v9456_v3 = vld [vmem:[%s12509_s4 + $0x1688] ss:$16 sps:$4 sm:$0xff]  }
 0x399   :  { %6063 = vmatpush1.bf16.msra.mxu1 %v9366_v4  ;;  %6622 = vmatpush1.bf16.msra.mxu0 %v9369_v5  ;;  %v9461_v4 = vld [vmem:[%s12509_s4 + $0x16a4] ss:$16 sps:$4 sm:$0xff]   ;;  %v9464_v5 = vld [vmem:[%s12509_s4 + $0x16ac] ss:$16 sps:$4 sm:$0xff]  }
 0x39a   :  { %6064 = vmatprep.subr.bf16.mxu1 %v9374_v6  ;;  %6623 = vmatprep.subr.bf16.mxu0 %v9377_v7  ;;  %v9459_v6 = vld [vmem:[%s12509_s4 + $0x16a0] ss:$16 sps:$4 sm:$0xff]   ;;  %v9462_v7 = vld [vmem:[%s12509_s4 + $0x16a8] ss:$16 sps:$4 sm:$0xff]  }
 0x39d   :  { %6065 = vmatpush1.bf16.msra.mxu1 %v9372_v8  ;;  %6624 = vmatpush1.bf16.msra.mxu0 %v9375_v9  ;;  %v9467_v8 = vld [vmem:[%s12509_s4 + $0x16c4] ss:$16 sps:$4 sm:$0xff]   ;;  %v9470_v9 = vld [vmem:[%s12509_s4 + $0x16cc] ss:$16 sps:$4 sm:$0xff]  }
 0x39e   :  { %6066 = vmatprep.subr.bf16.mxu1 %v9380_v10  ;;  %6625 = vmatprep.subr.bf16.mxu0 %v9383_v11  ;;  %v9465_v10 = vld [vmem:[%s12509_s4 + $0x16c0] ss:$16 sps:$4 sm:$0xff]   ;;  %v9468_v11 = vld [vmem:[%s12509_s4 + $0x16c8] ss:$16 sps:$4 sm:$0xff]  }
 0x3a1   :  { %6067 = vmatpush1.bf16.msra.mxu1 %v9378_v12  ;;  %6626 = vmatpush1.bf16.msra.mxu0 %v9381_v13  ;;  %v9473_v12 = vld [vmem:[%s12509_s4 + $0x16e4] ss:$16 sps:$4 sm:$0xff]   ;;  %v9476_v13 = vld [vmem:[%s12509_s4 + $0x16ec] ss:$16 sps:$4 sm:$0xff]  }
 0x3a2   :  { %6068 = vmatprep.subr.bf16.mxu1 %v9386_v14  ;;  %6627 = vmatprep.subr.bf16.mxu0 %v9389_v15  ;;  %v9471_v14 = vld [vmem:[%s12509_s4 + $0x16e0] ss:$16 sps:$4 sm:$0xff]   ;;  %v9474_v15 = vld [vmem:[%s12509_s4 + $0x16e8] ss:$16 sps:$4 sm:$0xff]  }
 0x3a5   :  { %6069 = vmatpush1.bf16.msra.mxu1 %v9384_v16  ;;  %6628 = vmatpush1.bf16.msra.mxu0 %v9387_v17  ;;  %v9479_v16 = vld [vmem:[%s12509_s4 + $0x1704] ss:$16 sps:$4 sm:$0xff]   ;;  %v9482_v17 = vld [vmem:[%s12509_s4 + $0x170c] ss:$16 sps:$4 sm:$0xff]  }
 0x3a6   :  { %6070 = vmatprep.subr.bf16.mxu1 %v9392_v18  ;;  %6629 = vmatprep.subr.bf16.mxu0 %v9395_v19  ;;  %v9477_v18 = vld [vmem:[%s12509_s4 + $0x1700] ss:$16 sps:$4 sm:$0xff]   ;;  %v9480_v19 = vld [vmem:[%s12509_s4 + $0x1708] ss:$16 sps:$4 sm:$0xff]  }
 0x3a9   :  { %6071 = vmatpush1.bf16.msra.mxu1 %v9390_v20  ;;  %6630 = vmatpush1.bf16.msra.mxu0 %v9393_v21  ;;  %v9485_v20 = vld [vmem:[%s12509_s4 + $0x1724] ss:$16 sps:$4 sm:$0xff]   ;;  %v9488_v21 = vld [vmem:[%s12509_s4 + $0x172c] ss:$16 sps:$4 sm:$0xff]  }
 0x3aa   :  { %6072 = vmatprep.subr.bf16.mxu1 %v9398_v23  ;;  %6631 = vmatprep.subr.bf16.mxu0 %v9401_v26  ;;  %v9483_v23 = vld [vmem:[%s12509_s4 + $0x1720] ss:$16 sps:$4 sm:$0xff]   ;;  %v9486_v26 = vld [vmem:[%s12509_s4 + $0x1728] ss:$16 sps:$4 sm:$0xff]  }
 0x3ad   :  { %6073 = vmatpush1.bf16.msra.mxu1 %v9396_v27  ;;  %6632 = vmatpush1.bf16.msra.mxu0 %v9399_v28  ;;  %v9491_v27 = vld [vmem:[%s12509_s4 + $0x1744] ss:$16 sps:$4 sm:$0xff]   ;;  %v9494_v28 = vld [vmem:[%s12509_s4 + $0x174c] ss:$16 sps:$4 sm:$0xff]  }
 0x3ae   :  { %6074 = vmatprep.subr.bf16.mxu1 %v9404_v29  ;;  %6633 = vmatprep.subr.bf16.mxu0 %v9407_v30  ;;  %v9489_v29 = vld [vmem:[%s12509_s4 + $0x1740] ss:$16 sps:$4 sm:$0xff]   ;;  %v9492_v30 = vld [vmem:[%s12509_s4 + $0x1748] ss:$16 sps:$4 sm:$0xff]  }
 0x3b1   :  { %6075 = vmatpush1.bf16.msra.mxu1 %v9402_v31  ;;  %6634 = vmatpush1.bf16.msra.mxu0 %v9405_v32  ;;  %v9497_v31 = vld [vmem:[%s12509_s4 + $0x1764] ss:$16 sps:$4 sm:$0xff]   ;;  %v9500_v32 = vld [vmem:[%s12509_s4 + $0x176c] ss:$16 sps:$4 sm:$0xff]  }
 0x3b2   :  { %6076 = vmatprep.subr.bf16.mxu1 %v9410_v33  ;;  %6635 = vmatprep.subr.bf16.mxu0 %v9413_v34  ;;  %v9495_v33 = vld [vmem:[%s12509_s4 + $0x1760] ss:$16 sps:$4 sm:$0xff]   ;;  %v9498_v34 = vld [vmem:[%s12509_s4 + $0x1768] ss:$16 sps:$4 sm:$0xff]  }
 0x3b5   :  { %6077 = vmatpush1.bf16.msra.mxu1 %v9408_v35  ;;  %6636 = vmatpush1.bf16.msra.mxu0 %v9411_v36  ;;  %v9503_v35 = vld [vmem:[%s12509_s4 + $0x1784] ss:$16 sps:$4 sm:$0xff]   ;;  %v9506_v36 = vld [vmem:[%s12509_s4 + $0x178c] ss:$16 sps:$4 sm:$0xff]  }
 0x3b6   :  { %6078 = vmatprep.subr.bf16.mxu1 %v9416_v37  ;;  %6637 = vmatprep.subr.bf16.mxu0 %v9419_v38  ;;  %v9501_v37 = vld [vmem:[%s12509_s4 + $0x1780] ss:$16 sps:$4 sm:$0xff]   ;;  %v9504_v38 = vld [vmem:[%s12509_s4 + $0x1788] ss:$16 sps:$4 sm:$0xff]  }
 0x3b9   :  { %6079 = vmatpush1.bf16.msra.mxu1 %v9414_v39  ;;  %6638 = vmatpush1.bf16.msra.mxu0 %v9417_v40  ;;  %v9509_v39 = vld [vmem:[%s12509_s4 + $0x17a4] ss:$16 sps:$4 sm:$0xff]   ;;  %v9512_v40 = vld [vmem:[%s12509_s4 + $0x17ac] ss:$16 sps:$4 sm:$0xff]  }
 0x3ba   :  { %6080 = vmatprep.subr.bf16.mxu1 %v9422_v41  ;;  %6639 = vmatprep.subr.bf16.mxu0 %v9425_v42  ;;  %v9507_v41 = vld [vmem:[%s12509_s4 + $0x17a0] ss:$16 sps:$4 sm:$0xff]   ;;  %v9510_v42 = vld [vmem:[%s12509_s4 + $0x17a8] ss:$16 sps:$4 sm:$0xff]  }
 0x3bd   :  { %6081 = vmatpush1.bf16.msra.mxu1 %v9420_v43  ;;  %6640 = vmatpush1.bf16.msra.mxu0 %v9423_v44  ;;  %v9515_v43 = vld [vmem:[%s12509_s4 + $0x17c4] ss:$16 sps:$4 sm:$0xff]   ;;  %v9518_v44 = vld [vmem:[%s12509_s4 + $0x17cc] ss:$16 sps:$4 sm:$0xff]  }
 0x3be   :  { %6093 = vmatprep.subr.bf16.mxu1 %v9431_v45  ;;  %6652 = vmatprep.subr.bf16.mxu0 %v9434_v46  ;;  %v9513_v45 = vld [vmem:[%s12509_s4 + $0x17c0] ss:$16 sps:$4 sm:$0xff]   ;;  %v9516_v46 = vld [vmem:[%s12509_s4 + $0x17c8] ss:$16 sps:$4 sm:$0xff]  }
 0x3c0   :  { %6083 = vmatmul.mubr.bf16.vlgmr.msra.gmra.mrb[0].mxu1 %v9426_v47  ;;  %6642 = vmatmul.mubr.bf16.vlgmr.msra.gmra.mrb[4].mxu0 %v9426_v47  ;;  %v9521_v47 = vld [vmem:[%s12509_s4 + $0x17e4] ss:$16 sps:$4 sm:$0xff]  }
 0x3c1   :  { %6094 = vmatpush1.bf16.msra.mxu1 %v9429_v48  ;;  %6653 = vmatpush1.bf16.msra.mxu0 %v9432_v49  ;;  %v9524_v48 = vld [vmem:[%s12509_s4 + $0x17ec] ss:$16 sps:$4 sm:$0xff]   ;;  %v9519_v49 = vld [vmem:[%s12509_s4 + $0x17e0] ss:$16 sps:$4 sm:$0xff]  }
 0x3c2   :  { %6095 = vmatprep.subr.bf16.mxu1 %v9437_v50  ;;  %6654 = vmatprep.subr.bf16.mxu0 %v9440_v51  ;;  %v9522_v50 = vld [vmem:[%s12509_s4 + $0x17e8] ss:$16 sps:$4 sm:$0xff]   ;;  %v9530_v51 = vld [vmem:[%s12509_s4 + $0x1804] ss:$16 sps:$4 sm:$0xff]  }
 0x3c3   :  { %6125 = vmatprep.mubr.bf16.mxu1 %v9527_v52  ;;  %6684 = vmatprep.mubr.bf16.mxu0 %v9527_v52  ;;  %v9533_v52 = vld [vmem:[%s12509_s4 + $0x180c] ss:$16 sps:$4 sm:$0xff]  }
 0x3c5   :  { %6096 = vmatpush1.bf16.msra.mxu1 %v9435_v53  ;;  %6655 = vmatpush1.bf16.msra.mxu0 %v9438_v54  ;;  %v9525_v53 = vld [vmem:[%s12510_s0 + $0x58] ss:$100 sps:$4 sm:$0xff]   ;;  %v9528_v54 = vld [vmem:[%s12509_s4 + $0x1800] ss:$16 sps:$4 sm:$0xff]  }
 0x3c6   :  { %6097 = vmatprep.subr.bf16.mxu1 %v9443_v55  ;;  %6656 = vmatprep.subr.bf16.mxu0 %v9446_v56  ;;  %v9531_v55 = vld [vmem:[%s12509_s4 + $0x1808] ss:$16 sps:$4 sm:$0xff]   ;;  %v9536_v56 = vld [vmem:[%s12509_s4 + $0x1824] ss:$16 sps:$4 sm:$0xff]  }
 0x3c9   :  { %6098 = vmatpush1.bf16.msra.mxu1 %v9441_v57  ;;  %6657 = vmatpush1.bf16.msra.mxu0 %v9444_v58  ;;  %v9539_v57 = vld [vmem:[%s12509_s4 + $0x182c] ss:$16 sps:$4 sm:$0xff]   ;;  %v9534_v58 = vld [vmem:[%s12509_s4 + $0x1820] ss:$16 sps:$4 sm:$0xff]  }
 0x3ca   :  { %6099 = vmatprep.subr.bf16.mxu1 %v9449_v59  ;;  %6658 = vmatprep.subr.bf16.mxu0 %v9452_v60  ;;  %v9537_v59 = vld [vmem:[%s12509_s4 + $0x1828] ss:$16 sps:$4 sm:$0xff]   ;;  %v9542_v60 = vld [vmem:[%s12509_s4 + $0x1844] ss:$16 sps:$4 sm:$0xff]  }
 0x3cd   :  { %6100 = vmatpush1.bf16.msra.mxu1 %v9447_v61  ;;  %6659 = vmatpush1.bf16.msra.mxu0 %v9450_v62  ;;  %v9545_v61 = vld [vmem:[%s12509_s4 + $0x184c] ss:$16 sps:$4 sm:$0xff]   ;;  %v9540_v62 = vld [vmem:[%s12509_s4 + $0x1840] ss:$16 sps:$4 sm:$0xff]  }
 0x3ce   :  { %6101 = vmatprep.subr.bf16.mxu1 %v9455_v63  ;;  %6660 = vmatprep.subr.bf16.mxu0 %v9458_v0  ;;  %v9543_v63 = vld [vmem:[%s12509_s4 + $0x1848] ss:$16 sps:$4 sm:$0xff]   ;;  %v9548_v0 = vld [vmem:[%s12509_s4 + $0x1864] ss:$16 sps:$4 sm:$0xff]  }
 0x3d1   :  { %6102 = vmatpush1.bf16.msra.mxu1 %v9453_v2  ;;  %6661 = vmatpush1.bf16.msra.mxu0 %v9456_v3  ;;  %v9546_v2 = vld [vmem:[%s12509_s4 + $0x1860] ss:$16 sps:$4 sm:$0xff]   ;;  %v9549_v3 = vld [vmem:[%s12509_s4 + $0x1868] ss:$16 sps:$4 sm:$0xff]  }
 0x3d2   :  { %6103 = vmatprep.subr.bf16.mxu1 %v9461_v4  ;;  %6662 = vmatprep.subr.bf16.mxu0 %v9464_v5  ;;  %v9554_v4 = vld [vmem:[%s12509_s4 + $0x1884] ss:$16 sps:$4 sm:$0xff]   ;;  %v9557_v5 = vld [vmem:[%s12509_s4 + $0x188c] ss:$16 sps:$4 sm:$0xff]  }
 0x3d5   :  { %6104 = vmatpush1.bf16.msra.mxu1 %v9459_v6  ;;  %6663 = vmatpush1.bf16.msra.mxu0 %v9462_v7  ;;  %v9552_v6 = vld [vmem:[%s12509_s4 + $0x1880] ss:$16 sps:$4 sm:$0xff]   ;;  %v9555_v7 = vld [vmem:[%s12509_s4 + $0x1888] ss:$16 sps:$4 sm:$0xff]  }
 0x3d6   :  { %6105 = vmatprep.subr.bf16.mxu1 %v9467_v8  ;;  %6664 = vmatprep.subr.bf16.mxu0 %v9470_v9  ;;  %v9560_v8 = vld [vmem:[%s12509_s4 + $0x18a4] ss:$16 sps:$4 sm:$0xff]   ;;  %v9563_v9 = vld [vmem:[%s12509_s4 + $0x18ac] ss:$16 sps:$4 sm:$0xff]  }
 0x3d9   :  { %6106 = vmatpush1.bf16.msra.mxu1 %v9465_v10  ;;  %6665 = vmatpush1.bf16.msra.mxu0 %v9468_v11  ;;  %v9558_v10 = vld [vmem:[%s12509_s4 + $0x18a0] ss:$16 sps:$4 sm:$0xff]   ;;  %v9561_v11 = vld [vmem:[%s12509_s4 + $0x18a8] ss:$16 sps:$4 sm:$0xff]  }
 0x3da   :  { %6107 = vmatprep.subr.bf16.mxu1 %v9473_v12  ;;  %6666 = vmatprep.subr.bf16.mxu0 %v9476_v13  ;;  %v9566_v12 = vld [vmem:[%s12509_s4 + $0x18c4] ss:$16 sps:$4 sm:$0xff]   ;;  %v9569_v13 = vld [vmem:[%s12509_s4 + $0x18cc] ss:$16 sps:$4 sm:$0xff]  }
 0x3dd   :  { %6108 = vmatpush1.bf16.msra.mxu1 %v9471_v14  ;;  %6667 = vmatpush1.bf16.msra.mxu0 %v9474_v15  ;;  %v9564_v14 = vld [vmem:[%s12509_s4 + $0x18c0] ss:$16 sps:$4 sm:$0xff]   ;;  %v9567_v15 = vld [vmem:[%s12509_s4 + $0x18c8] ss:$16 sps:$4 sm:$0xff]  }
 0x3de   :  { %6109 = vmatprep.subr.bf16.mxu1 %v9479_v16  ;;  %6668 = vmatprep.subr.bf16.mxu0 %v9482_v17  ;;  %v9572_v16 = vld [vmem:[%s12509_s4 + $0x18e4] ss:$16 sps:$4 sm:$0xff]   ;;  %v9575_v17 = vld [vmem:[%s12509_s4 + $0x18ec] ss:$16 sps:$4 sm:$0xff]  }
 0x3e1   :  { %6110 = vmatpush1.bf16.msra.mxu1 %v9477_v18  ;;  %6669 = vmatpush1.bf16.msra.mxu0 %v9480_v19  ;;  %v9570_v18 = vld [vmem:[%s12509_s4 + $0x18e0] ss:$16 sps:$4 sm:$0xff]   ;;  %v9573_v19 = vld [vmem:[%s12509_s4 + $0x18e8] ss:$16 sps:$4 sm:$0xff]  }
 0x3e2   :  { %6111 = vmatprep.subr.bf16.mxu1 %v9485_v20  ;;  %6670 = vmatprep.subr.bf16.mxu0 %v9488_v21  ;;  %v9577_v20 = vld [vmem:[%s12512_s7 + $0x40] sm:$0xff]  }
 0x3e3   :  { %v9578_v21 = vld [vmem:[%s12512_s7 + $0xc0] sm:$0xff]  }
 0x3e5   :  { %6112 = vmatpush1.bf16.msra.mxu1 %v9483_v23  ;;  %6671 = vmatpush1.bf16.msra.mxu0 %v9486_v26  ;;  %v9576_v23 = vld [vmem:[%s12510_s0 + $0x60] ss:$100 sps:$4 sm:$0xff]  }
 0x3e6   :  { %6113 = vmatprep.subr.bf16.mxu1 %v9491_v27  ;;  %6672 = vmatprep.subr.bf16.mxu0 %v9494_v28  ;;  %v9579_v26 = vld [vmem:[%s12512_s7] sm:$0xff]   ;;  %v9581_v28 = vld [vmem:[%s12512_s7 + $0x48] sm:$0xff]  }
 0x3e7   :  { %v9580_v27 = vld [vmem:[%s12512_s7 + $0x80] sm:$0xff]  }
 0x3e9   :  { %6114 = vmatpush1.bf16.msra.mxu1 %v9489_v29  ;;  %6673 = vmatpush1.bf16.msra.mxu0 %v9492_v30  ;;  %v9582_v29 = vld [vmem:[%s12512_s7 + $0xc8] sm:$0xff]  }
 0x3ea   :  { %6115 = vmatprep.subr.bf16.mxu1 %v9497_v31  ;;  %6674 = vmatprep.subr.bf16.mxu0 %v9500_v32  ;;  %v9583_v30 = vld [vmem:[%s12512_s7 + $0x8] sm:$0xff]   ;;  %v9585_v32 = vld [vmem:[%s12512_s7 + $0x50] sm:$0xff]  }
 0x3eb   :  { %v9584_v31 = vld [vmem:[%s12512_s7 + $0x88] sm:$0xff]  }
 0x3ed   :  { %6116 = vmatpush1.bf16.msra.mxu1 %v9495_v33  ;;  %6675 = vmatpush1.bf16.msra.mxu0 %v9498_v34  ;;  %v9586_v33 = vld [vmem:[%s12512_s7 + $0xd0] sm:$0xff]  }
 0x3ee   :  { %6117 = vmatprep.subr.bf16.mxu1 %v9503_v35  ;;  %6676 = vmatprep.subr.bf16.mxu0 %v9506_v36  ;;  %v9587_v34 = vld [vmem:[%s12512_s7 + $0x10] sm:$0xff]   ;;  %v9589_v36 = vld [vmem:[%s12512_s7 + $0x58] sm:$0xff]  }
 0x3ef   :  { %v9588_v35 = vld [vmem:[%s12512_s7 + $0x90] sm:$0xff]  }
 0x3f1   :  { %6118 = vmatpush1.bf16.msra.mxu1 %v9501_v37  ;;  %6677 = vmatpush1.bf16.msra.mxu0 %v9504_v38  ;;  %v9590_v37 = vld [vmem:[%s12512_s7 + $0xd8] sm:$0xff]  }
 0x3f2   :  { %6119 = vmatprep.subr.bf16.mxu1 %v9509_v39  ;;  %6678 = vmatprep.subr.bf16.mxu0 %v9512_v40  ;;  %v9591_v38 = vld [vmem:[%s12512_s7 + $0x18] sm:$0xff]   ;;  %v9593_v40 = vld [vmem:[%s12512_s7 + $0x60] sm:$0xff]  }
 0x3f3   :  { %v9592_v39 = vld [vmem:[%s12512_s7 + $0x98] sm:$0xff]  }
 0x3f5   :  { %6120 = vmatpush1.bf16.msra.mxu1 %v9507_v41  ;;  %6679 = vmatpush1.bf16.msra.mxu0 %v9510_v42  ;;  %v9594_v41 = vld [vmem:[%s12512_s7 + $0xe0] sm:$0xff]  }
 0x3f6   :  { %6121 = vmatprep.subr.bf16.mxu1 %v9515_v43  ;;  %6680 = vmatprep.subr.bf16.mxu0 %v9518_v44  ;;  %v9595_v42 = vld [vmem:[%s12512_s7 + $0x20] sm:$0xff]   ;;  %v9597_v44 = vld [vmem:[%s12512_s7 + $0x68] sm:$0xff]  }
 0x3f7   :  { %v9596_v43 = vld [vmem:[%s12512_s7 + $0xa0] sm:$0xff]  }
 0x3f9   :  { %6122 = vmatpush1.bf16.msra.mxu1 %v9513_v45  ;;  %6681 = vmatpush1.bf16.msra.mxu0 %v9516_v46  ;;  %v9598_v45 = vld [vmem:[%s12512_s7 + $0xe8] sm:$0xff]  }
 0x3fa   :  { %6123 = vmatprep.subr.bf16.mxu1 %v9521_v47  ;;  %6682 = vmatprep.subr.bf16.mxu0 %v9524_v48  ;;  %v9599_v46 = vld [vmem:[%s12512_s7 + $0x28] sm:$0xff]   ;;  %v9601_v48 = vld [vmem:[%s12512_s7 + $0x70] sm:$0xff]  }
 0x3fb   :  { %v9600_v47 = vld [vmem:[%s12512_s7 + $0xa8] sm:$0xff]  }
 0x3fd   :  { %6124 = vmatpush1.bf16.msra.mxu1 %v9519_v49  ;;  %6683 = vmatpush1.bf16.msra.mxu0 %v9522_v50  ;;  %v9602_v49 = vld [vmem:[%s12512_s7 + $0xf0] sm:$0xff]  }
 0x3fe   :  { %6136 = vmatprep.subr.bf16.mxu1 %v9530_v51  ;;  %6695 = vmatprep.subr.bf16.mxu0 %v9533_v52  ;;  %v9603_v50 = vld [vmem:[%s12512_s7 + $0x30] sm:$0xff]   ;;  %v9605_v52 = vld [vmem:[%s12512_s7 + $0x78] sm:$0xff]  }
 0x3ff   :  { %v9604_v51 = vld [vmem:[%s12512_s7 + $0xb0] sm:$0xff]  }
 0x400   :  { %6126 = vmatmul.mubr.bf16.vlgmr.msra.gmra.mrb[0].mxu1 %v9525_v53  ;;  %6685 = vmatmul.mubr.bf16.vlgmr.msra.gmra.mrb[4].mxu0 %v9525_v53  ;;  %v9606_v53 = vld [vmem:[%s12512_s7 + $0xf8] sm:$0xff]  }
 0x401   :  { %6137 = vmatpush1.bf16.msra.mxu1 %v9528_v54  ;;  %6696 = vmatpush1.bf16.msra.mxu0 %v9531_v55  ;;  %v9607_v54 = vld [vmem:[%s12512_s7 + $0x38] sm:$0xff]  }
 0x402   :  { %6138 = vmatprep.subr.bf16.mxu1 %v9536_v56  ;;  %6697 = vmatprep.subr.bf16.mxu0 %v9539_v57  ;;  %v9608_v55 = vld [vmem:[%s12512_s7 + $0xb8] sm:$0xff]   ;;  %v6750_v56 = vsub.s32 2, %v9910_v22  ;;  %v6738_v57 = vld [vmem:[%s12513_s6] sm:$0xf] }
 0x403   :  { %6168 = vmatprep.mubr.bf16.mxu1 %v9609_v1  ;;  %6727 = vmatprep.mubr.bf16.mxu0 %v9609_v1  ;;  %v9551_v1 = vld [vmem:[%s12509_s4 + $0x186c] ss:$16 sps:$4 sm:$0xff]  }
 0x405   :  { %6139 = vmatpush1.bf16.msra.mxu1 %v9534_v58  ;;  %6698 = vmatpush1.bf16.msra.mxu0 %v9537_v59  ;;  %v6754_v58 = vsub.s32 3, %v9910_v22  ;;  %v6743_v59 = vrot.slane %v6738_v57, %v55_v24 }
 0x406   :  { %6140 = vmatprep.subr.bf16.mxu1 %v9542_v60  ;;  %6699 = vmatprep.subr.bf16.mxu0 %v9545_v61  ;;  %v6751_v60 = vrot.slane %v6738_v57, %v6750_v56  ;;  %v6747_v61 = vrot.slane %v6738_v57, %v59_v25 }
 0x409   :  { %6141 = vmatpush1.bf16.msra.mxu1 %v9540_v62  ;;  %6700 = vmatpush1.bf16.msra.mxu0 %v9543_v63  ;;  %v6755_v62 = vrot.slane %v6738_v57, %v6754_v58 }
 0x40a   :  { %6142 = vmatprep.subr.bf16.mxu1 %v9548_v0  ;;  %6701 = vmatprep.subr.bf16.mxu0 %v9551_v1 }
 0x40d   :  { %6143 = vmatpush1.bf16.msra.mxu1 %v9546_v2  ;;  %6702 = vmatpush1.bf16.msra.mxu0 %v9549_v3 }
 0x40e   :  { %6144 = vmatprep.subr.bf16.mxu1 %v9554_v4  ;;  %6703 = vmatprep.subr.bf16.mxu0 %v9557_v5 }
 0x411   :  { %6145 = vmatpush1.bf16.msra.mxu1 %v9552_v6  ;;  %6704 = vmatpush1.bf16.msra.mxu0 %v9555_v7 }
 0x412   :  { %6146 = vmatprep.subr.bf16.mxu1 %v9560_v8  ;;  %6705 = vmatprep.subr.bf16.mxu0 %v9563_v9 }
 0x415   :  { %6147 = vmatpush1.bf16.msra.mxu1 %v9558_v10  ;;  %6706 = vmatpush1.bf16.msra.mxu0 %v9561_v11 }
 0x416   :  { %6148 = vmatprep.subr.bf16.mxu1 %v9566_v12  ;;  %6707 = vmatprep.subr.bf16.mxu0 %v9569_v13 }
 0x419   :  { %6149 = vmatpush1.bf16.msra.mxu1 %v9564_v14  ;;  %6708 = vmatpush1.bf16.msra.mxu0 %v9567_v15 }
 0x41a   :  { %6150 = vmatprep.subr.bf16.mxu1 %v9572_v16  ;;  %6709 = vmatprep.subr.bf16.mxu0 %v9575_v17 }
 0x41d   :  { %6151 = vmatpush1.bf16.msra.mxu1 %v9570_v18  ;;  %6710 = vmatpush1.bf16.msra.mxu0 %v9573_v19 }
 0x41e   :  { %8070 = vmatprep.subr.bf16.mxu1 %v9577_v20  ;;  %8092 = vmatprep.subr.bf16.mxu0 %v9578_v21 }
 0x420   :  { %6169 = vmatmul.mubr.bf16.vlgmr.msra.gmra.mrb[0].mxu1 %v9576_v23  ;;  %6728 = vmatmul.mubr.bf16.vlgmr.msra.gmra.mrb[4].mxu0 %v9576_v23 }
 0x421   :  { %8071 = vmatpush3.bf16.msra.mxu1 %v9579_v26  ;;  %8093 = vmatpush3.bf16.msra.mxu0 %v9580_v27 }
 0x422   :  { %8072 = vmatprep.subr.bf16.mxu1 %v9581_v28  ;;  %8094 = vmatprep.subr.bf16.mxu0 %v9582_v29  ;;  %v8037_v29 = vld [vmem:[%s12514_s8] ss:$0 sm:$0xff] }
 0x425   :  { %8073 = vmatpush3.bf16.msra.mxu1 %v9583_v30  ;;  %8095 = vmatpush3.bf16.msra.mxu0 %v9584_v31 }
 0x426   :  { %8074 = vmatprep.subr.bf16.mxu1 %v9585_v32  ;;  %8096 = vmatprep.subr.bf16.mxu0 %v9586_v33 }
 0x429   :  { %8075 = vmatpush3.bf16.msra.mxu1 %v9587_v34  ;;  %8097 = vmatpush3.bf16.msra.mxu0 %v9588_v35 }
 0x42a   :  { %8076 = vmatprep.subr.bf16.mxu1 %v9589_v36  ;;  %8098 = vmatprep.subr.bf16.mxu0 %v9590_v37 }
 0x42d   :  { %8077 = vmatpush3.bf16.msra.mxu1 %v9591_v38  ;;  %8099 = vmatpush3.bf16.msra.mxu0 %v9592_v39 }
 0x42e   :  { %8078 = vmatprep.subr.bf16.mxu1 %v9593_v40  ;;  %8100 = vmatprep.subr.bf16.mxu0 %v9594_v41 }
 0x431   :  { %8079 = vmatpush3.bf16.msra.mxu1 %v9595_v42  ;;  %8101 = vmatpush3.bf16.msra.mxu0 %v9596_v43 }
 0x432   :  { %8080 = vmatprep.subr.bf16.mxu1 %v9597_v44  ;;  %8102 = vmatprep.subr.bf16.mxu0 %v9598_v45 }
 0x435   :  { %8081 = vmatpush3.bf16.msra.mxu1 %v9599_v46  ;;  %8103 = vmatpush3.bf16.msra.mxu0 %v9600_v47 }
 0x436   :  { %8082 = vmatprep.subr.bf16.mxu1 %v9601_v48  ;;  %8104 = vmatprep.subr.bf16.mxu0 %v9602_v49 }
 0x439   :  { %8083 = vmatpush3.bf16.msra.mxu1 %v9603_v50  ;;  %8105 = vmatpush3.bf16.msra.mxu0 %v9604_v51 }
 0x43a   :  { %8084 = vmatprep.subr.bf16.mxu1 %v9605_v52  ;;  %8106 = vmatprep.subr.bf16.mxu0 %v9606_v53 }
 0x43d   :  { %8085 = vmatpush3.bf16.msra.mxu1 %v9607_v54  ;;  %8107 = vmatpush3.bf16.msra.mxu0 %v9608_v55 }
 0x4f3   :  { %v6170_v63 = vpop.f32.mrb[0].mxu1  ;;  %v6729_v0 = vpop.f32.mrb[4].mxu0 }
 0x4f4   :  { %v6760_v1 = vadd.f32 %v6743_v59, %v6170_v63  ;;  %v6762_v2 = vadd.f32 %v6751_v60, %v6729_v0  ;;  %v6172_v3 = vpop.f32.mrb[1].mxu1  ;;  %v6731_v4 = vpop.f32.mrb[5].mxu0 }
 0x4f5   :  { %v6761_v5 = vadd.f32 %v6747_v61, %v6172_v3  ;;  %v6763_v6 = vadd.f32 %v6755_v62, %v6731_v4  ;;  %v6174_v7 = vpop.f32.mrb[2].mxu1  ;;  %v6733_v8 = vpop.f32.mrb[6].mxu0 }
 0x4f6   :  { %v6764_v9 = vadd.f32 %v6743_v59, %v6174_v7  ;;  %v6766_v10 = vadd.f32 %v6751_v60, %v6733_v8  ;;  %v6176_v11 = vpop.f32.mrb[3].mxu1  ;;  %v6735_v12 = vpop.f32.mrb[7].mxu0  ;;  %v6768_v14 = vmax.f32 %v6760_v1, 0.0  ;;  %v6770_v22 = vmax.f32 %v6762_v2, 0.0 }
 0x4f7   :  { %v6765_v24 = vadd.f32 %v6747_v61, %v6176_v11  ;;  %v6767_v13 = vadd.f32 %v6755_v62, %v6735_v12  ;;  %v6769_v16 = vmax.f32 %v6761_v5, 0.0  ;;  %v6771_v17 = vmax.f32 %v6763_v6, 0.0 }
 0x4f8   :  { %v6772_v25 = vmax.f32 %v6764_v9, 0.0  ;;  %v6774_v15 = vmax.f32 %v6766_v10, 0.0 }
 0x4f9   :  { %v6773_v18 = vmax.f32 %v6765_v24, 0.0  ;;  %v6775_v19 = vmax.f32 %v6767_v13, 0.0 }
 0x4fa   :  { %v6776_v20 = vpack.c.bf16 %v6772_v25, %v6768_v14  ;;  %v6778_v21 = vpack.c.bf16 %v6774_v15, %v6770_v22 }
 0x4fb   :  { %v6777_v23 = vpack.c.bf16 %v6773_v18, %v6769_v16  ;;  %v6779_v26 = vpack.c.bf16 %v6775_v19, %v6771_v17 }
 0x4fd   :  { %7075 = vmatprep.mubr.bf16.mxu1 %v6777_v23  ;;  %7116 = vmatprep.mubr.bf16.mxu0 %v6779_v26 }
 0x4fe   :  { %7076 = vmatmul.mubr.bf16.vlgmr.msra.gmra.mrb[4].mxu1 %v6776_v20  ;;  %7117 = vmatmul.mubr.bf16.vlgmr.msra.gmra.mrb[8].mxu0 %v6778_v21 }
 0x5d1   :  { %v8086_v27 = vpop.f32.mrb[4].mxu1  ;;  %v8108_v28 = vpop.f32.mrb[8].mxu0 }
 0x5d2   :  { %v8087_v30 = vpop.f32.mrb[5].mxu1  ;;  %v8109_v31 = vpop.f32.mrb[9].mxu0 }
 0x5d3   :  { %v8088_v32 = vadd.f32 %v8087_v30, %v8086_v27  ;;  %v8110_v33 = vadd.f32 %v8109_v31, %v8108_v28  ;;  %v8089_v34 = vpop.f32.mrb[6].mxu1  ;;  %v8111_v35 = vpop.f32.mrb[10].mxu0 }
 0x5d4   :  { %v8090_v36 = vpop.f32.mrb[7].mxu1  ;;  %v8112_v37 = vpop.f32.mrb[11].mxu0 }
 0x5d5   :  { %v7078_v38 = vadd.f32 %v8088_v32, %v8037_v29  ;;  %v8091_v39 = vadd.f32 %v8090_v36, %v8089_v34  ;;  %v8113_v40 = vadd.f32 %v8112_v37, %v8111_v35 }
 0x5d7   :  { %v7119_v41 = vadd.f32 %v8110_v33, %v7078_v38  ;;  %v7081_v42 = vadd.f32 %v8091_v39, %v8037_v29 }
 0x5d9   :  { %7125 = vst [vmem:[%s12515_s9] sm:$0xff] %v7119_v41  ;;  %v7122_v43 = vadd.f32 %v8113_v40, %v7081_v42 }
 0x5db   :  { %7126 = vst [vmem:[%s12515_s9 + $0x8] sm:$0xff] %v7122_v43 }

</bundles_post_ra>
